<compile_context>
chip_gen: v7x
topology: tpu7x:2x2x1
jax: 0.10.0
libtpu: 0.0.40
codegen_flags: <defaults>
</compile_context>

<pallas_src>
import functools

import jax
import jax.numpy as jnp
from jax.experimental import pallas as pl
from jax.experimental.pallas import tpu as pltpu

LANES = 128


def _vmem():
    return pl.BlockSpec(memory_space=pltpu.MemorySpace.VMEM)


def _cost(m, k, n):
    return pl.CostEstimate(
        flops=2 * m * k * n, transcendentals=0,
        bytes_accessed=m * k * 4 + k * n * 2 + n * 4 + m * n * 4)


# ----------------------------- Pallas kernels ------------------------------

def _mm_kernel(a_ref, w_ref, b_ref, o_ref, *, relu):
    """o = [relu](a @ w + b); a cast to bf16, w bf16, f32 accumulation."""
    a = a_ref[...].astype(jnp.bfloat16)
    acc = jnp.dot(a, w_ref[...], preferred_element_type=jnp.float32)
    acc = acc + b_ref[...]
    if relu:
        acc = jnp.maximum(acc, 0.0)
    o_ref[...] = acc.astype(o_ref.dtype)


def _prebias_mm_kernel(a_ref, pb_ref, w_ref, b_ref, o_ref, *, relu):
    """o = [relu](relu(a + pb) @ w + b); previous layer's bias+ReLU fused in."""
    a = jnp.maximum(a_ref[...] + pb_ref[...], 0.0).astype(jnp.bfloat16)
    acc = jnp.dot(a, w_ref[...], preferred_element_type=jnp.float32)
    acc = acc + b_ref[...]
    if relu:
        acc = jnp.maximum(acc, 0.0)
    o_ref[...] = acc.astype(o_ref.dtype)


def _bottleneck_kernel(x_ref, w1_ref, b1_ref, w2_ref, b2_ref, o_ref):
    """Fused lin1+lin2: relu(relu(x@w1+b1)@w2+b2); hidden stays on-chip."""
    x = x_ref[...].astype(jnp.bfloat16)
    h = jnp.dot(x, w1_ref[...], preferred_element_type=jnp.float32) + b1_ref[...]
    h = jnp.maximum(h, 0.0).astype(jnp.bfloat16)
    y = jnp.dot(h, w2_ref[...], preferred_element_type=jnp.float32) + b2_ref[...]
    o_ref[...] = jnp.maximum(y, 0.0).astype(o_ref.dtype)


def matmul_bias_act(a, w, b, *, relu, pre_b=None):
    """a:(M,K) f32, w:(K,N) bf16, b:(1,N) f32 -> (M,N) f32. Single VMEM block."""
    M, K = a.shape
    K2, N = w.shape
    assert K == K2 and b.shape == (1, N)
    out_shape = jax.ShapeDtypeStruct((M, N), jnp.float32)
    if pre_b is None:
        return pl.pallas_call(
            functools.partial(_mm_kernel, relu=relu),
            out_shape=out_shape,
            in_specs=[_vmem(), _vmem(), _vmem()],
            out_specs=_vmem(),
            cost_estimate=_cost(M, K, N),
        )(a, w, b)
    return pl.pallas_call(
        functools.partial(_prebias_mm_kernel, relu=relu),
        out_shape=out_shape,
        in_specs=[_vmem(), _vmem(), _vmem(), _vmem()],
        out_specs=_vmem(),
        cost_estimate=_cost(M, K, N),
    )(a, pre_b, w, b)


def bottleneck(x, w1, b1, w2, b2):
    B, K1 = x.shape
    N1 = w1.shape[1]
    N2 = w2.shape[1]
    cost = pl.CostEstimate(
        flops=2 * B * (K1 * N1 + N1 * N2), transcendentals=0,
        bytes_accessed=(B * K1 + B * N2 + N1 + N2) * 4 + (K1 * N1 + N1 * N2) * 2)
    return pl.pallas_call(
        _bottleneck_kernel,
        out_shape=jax.ShapeDtypeStruct((B, N2), jnp.float32),
        in_specs=[_vmem(), _vmem(), _vmem(), _vmem(), _vmem()],
        out_specs=_vmem(),
        cost_estimate=cost,
    )(x, w1, b1, w2, b2)


# -------------------------- conv / deconv layers ----------------------------

def conv2d_relu(x, wp, bp, *, k, stride, cout):
    """x NHWC (B,H,W,Cin); wp (k*k*Cin, Npad) bf16 with rows ordered (kh,kw,Cin)."""
    B, H, W, Cin = x.shape
    OH = (H - k) // stride + 1
    OW = (W - k) // stride + 1
    cols = [x[:, kh:kh + stride * (OH - 1) + 1:stride,
                 kw:kw + stride * (OW - 1) + 1:stride, :]
            for kh in range(k) for kw in range(k)]
    patches = jnp.concatenate(cols, axis=-1).reshape(B * OH * OW, k * k * Cin)
    y = matmul_bias_act(patches, wp, bp, relu=True)             # (B*OH*OW, Npad)
    return y[:, :cout].reshape(B, OH, OW, cout)


def deconv_overlap(x, wp, bp, *, k, stride, cout):
    """ConvTranspose2d with overlapping taps (k=3, s=2). Bias/ReLU deferred
    (fused into the NEXT layer's matmul as a pre-activation)."""
    B, H, W, Cin = x.shape
    OH = (H - 1) * stride + k
    OW = (W - 1) * stride + k
    y = matmul_bias_act(x.reshape(B * H * W, Cin), wp, bp, relu=False)
    y = y[:, :k * k * cout].reshape(B, H, W, k, k, cout)
    out = jnp.zeros((B, OH, OW, cout), jnp.float32)
    for kh in range(k):                       # overlap-aware col2im (layout glue)
        for kw in range(k):
            out = out.at[:, kh:kh + stride * (H - 1) + 1:stride,
                            kw:kw + stride * (W - 1) + 1:stride, :].add(
                y[:, :, :, kh, kw, :])
    return out


def deconv_nonoverlap(x, wp, bp, *, k, cout, pre_b=None):
    """ConvTranspose2d with stride == k (no overlap): matmul with fused bias+ReLU
    (and optional fused pre-activation), then a pure reshape interleave."""
    B, H, W, Cin = x.shape
    y = matmul_bias_act(x.reshape(B * H * W, Cin), wp, bp, relu=True, pre_b=pre_b)
    y = y[:, :k * k * cout].reshape(B, H, W, k, k, cout)
    y = y.transpose(0, 1, 3, 2, 4, 5).reshape(B, H * k, W * k, cout)
    return y


# ----------------------------- params & prep --------------------------------

def init_params(input_channels, key):
    """PyTorch-layout weights with U(-1/sqrt(fan_in), 1/sqrt(fan_in)) init."""
    def uni(k, shape, fan_in):
        bound = 1.0 / jnp.sqrt(jnp.float32(fan_in))
        return jax.random.uniform(k, shape, jnp.float32, -bound, bound)

    specs = {
        'conv1':   ((32, input_channels, 2, 2), (32,),  input_channels * 4),
        'conv2':   ((64, 32, 2, 2),             (64,),  32 * 4),
        'conv3':   ((128, 64, 3, 3),            (128,), 64 * 9),
        'lin1':    ((10, 1152),                 (10,),  1152),
        'lin2':    ((1152, 10),                 (1152,), 10),
        'deconv1': ((128, 64, 3, 3),            (64,),  128 * 9),
        'deconv2': ((64, 32, 2, 2),             (32,),  64 * 4),
        'deconv3': ((32, input_channels, 2, 2), (input_channels,), 32 * 4),
    }
    params = {}
    keys = jax.random.split(key, 2 * len(specs))
    for i, (name, (wshape, bshape, fan_in)) in enumerate(specs.items()):
        params[name + '_w'] = uni(keys[2 * i], wshape, fan_in)
        params[name + '_b'] = uni(keys[2 * i + 1], bshape, fan_in)
    return params


def _pad_cols(w, b):
    """Zero-pad columns of (K,N) w and (N,) b up to a multiple of 128 lanes."""
    n = w.shape[1]
    npad = max(LANES, ((n + LANES - 1) // LANES) * LANES)
    if npad != n:
        w = jnp.pad(w, ((0, 0), (0, npad - n)))
        b = jnp.pad(b, (0, npad - n))
    return w, b


def prepare_params(params):
    """One-time weight prep: matmul layouts, NCHW<->NHWC permutations folded into
    the linear weights, lane padding to 128 multiples, bf16 cast."""
    prep = {}

    def conv_prep(name, k):
        w = params[name + '_w']                              # (Cout, Cin, k, k)
        cin, cout = w.shape[1], w.shape[0]
        w2 = w.transpose(2, 3, 1, 0).reshape(k * k * cin, cout)   # rows (kh,kw,Cin)
        w2, b2 = _pad_cols(w2, params[name + '_b'])
        prep[name + '_w'] = w2.astype(jnp.bfloat16)
        prep[name + '_b'] = b2.reshape(1, -1).astype(jnp.float32)

    def deconv_prep(name, k, fuse_bias):
        w = params[name + '_w']                              # (Cin, Cout, k, k)
        cin, cout = w.shape[0], w.shape[1]
        w2 = w.transpose(0, 2, 3, 1).reshape(cin, k * k * cout)   # cols (kh,kw,Cout)
        if fuse_bias:                                        # stride == k: no overlap
            b2 = jnp.tile(params[name + '_b'], k * k)
        else:                                                # overlap: bias deferred
            b2 = jnp.zeros((k * k * cout,), jnp.float32)
        w2, b2 = _pad_cols(w2, b2)
        prep[name + '_w'] = w2.astype(jnp.bfloat16)
        prep[name + '_b'] = b2.reshape(1, -1).astype(jnp.float32)

    conv_prep('conv1', 2)
    conv_prep('conv2', 2)
    conv_prep('conv3', 3)
    deconv_prep('deconv1', 3, fuse_bias=False)
    deconv_prep('deconv2', 2, fuse_bias=True)
    deconv_prep('deconv3', 2, fuse_bias=True)
    # deconv1's bias+ReLU is applied as a fused pre-activation in deconv2's matmul.
    prep['deconv1_post_b'] = params['deconv1_b'].reshape(1, -1).astype(jnp.float32)

    # lin1: fold the NCHW-flatten order (c,oh,ow) vs. our NHWC (oh,ow,c) into a
    # row permutation of the weight; pad the 10-wide output to 128 lanes.
    w1 = params['lin1_w']                                    # (10, 1152)
    w1p = w1.reshape(10, 128, 3, 3).transpose(2, 3, 1, 0).reshape(1152, 10)
    w1p, b1p = _pad_cols(w1p, params['lin1_b'])              # (1152,128), (128,)
    # lin2: permute its output directly into NHWC order; pad K to the padded hidden.
    w2 = params['lin2_w']                                    # (1152, 10)
    w2p = w2.reshape(128, 3, 3, 10).transpose(1, 2, 0, 3).reshape(1152, 10).T
    w2p = jnp.pad(w2p, ((0, b1p.shape[0] - 10), (0, 0)))     # (128, 1152)
    b2p = params['lin2_b'].reshape(128, 3, 3).transpose(1, 2, 0).reshape(1152)
    prep['lin1_w'] = w1p.astype(jnp.bfloat16)
    prep['lin1_b'] = b1p.reshape(1, -1).astype(jnp.float32)
    prep['lin2_w'] = w2p.astype(jnp.bfloat16)
    prep['lin2_b'] = b2p.reshape(1, -1).astype(jnp.float32)
    return prep


# ------------------------------- forward ------------------------------------

@jax.jit
def cnn_autoencoder_forward(x, prep):
    """x: (B, C, 28, 28) NCHW -> (B, C, 28, 28), matching the PyTorch module."""
    B, C = x.shape[0], x.shape[1]
    x = x.transpose(0, 2, 3, 1)                                         # NHWC
    # encoder
    x = conv2d_relu(x, prep['conv1_w'], prep['conv1_b'], k=2, stride=2, cout=32)
    x = conv2d_relu(x, prep['conv2_w'], prep['conv2_b'], k=2, stride=2, cout=64)
    x = conv2d_relu(x, prep['conv3_w'], prep['conv3_b'], k=3, stride=2, cout=128)
    # fused lin1+lin2 bottleneck (flatten/unflatten baked into the weights)
    x = x.reshape(B, 3 * 3 * 128)
    x = bottleneck(x, prep['lin1_w'], prep['lin1_b'], prep['lin2_w'], prep['lin2_b'])
    x = x.reshape(B, 3, 3, 128)
    # decoder
    x = deconv_overlap(x, prep['deconv1_w'], prep['deconv1_b'], k=3, stride=2, cout=64)
    x = deconv_nonoverlap(x, prep['deconv2_w'], prep['deconv2_b'], k=2, cout=32,
                          pre_b=prep['deconv1_post_b'])
    x = deconv_nonoverlap(x, prep['deconv3_w'], prep['deconv3_b'], k=2, cout=C)
    return x.transpose(0, 3, 1, 2)                                      # NCHW


if __name__ == "__main__":
    key = jax.random.PRNGKey(0)
    k_x, k_p = jax.random.split(key)

    batch, input_channels, H, W = 2, 4, 28, 28    # 28x28 is required by lin1(1152)
    x = jax.random.normal(k_x, (batch, input_channels, H, W), jnp.float32)
    params = init_params(input_channels, k_p)
    prep = prepare_params(params)                 # one-time weight prep (hoisted)

    out = cnn_autoencoder_forward(x, prep)
    out = jax.block_until_ready(out)

    assert out.shape == (batch, input_channels, H, W), out.shape
    assert out.dtype == jnp.float32
    assert bool(jnp.all(jnp.isfinite(out)))
    print("KERNEL_OK")
</pallas_src>

<mosaic_0001>
module attributes {stable_mosaic.version = 11 : i64} {
  func.func @_mm_kernel(%arg0: memref<392x16xf32, #tpu.memory_space<vmem>>, %arg1: memref<16x128xbf16, #tpu.memory_space<vmem>>, %arg2: memref<1x128xf32, #tpu.memory_space<vmem>>, %arg3: memref<392x128xf32, #tpu.memory_space<vmem>>) attributes {dimension_semantics = [], scalar_prefetch = 0 : i64, scratch_operands = 0 : i64, tpu.core_type = #tpu.core_type<tc>} {
    %c0 = arith.constant 0 : index
    %c0_0 = arith.constant 0 : index
    %0 = vector.load %arg0[%c0, %c0_0] : memref<392x16xf32, #tpu.memory_space<vmem>>, vector<392x16xf32>
    %1 = arith.truncf %0 : vector<392x16xf32> to vector<392x16xbf16>
    %c0_1 = arith.constant 0 : index
    %c0_2 = arith.constant 0 : index
    %2 = vector.load %arg1[%c0_1, %c0_2] : memref<16x128xbf16, #tpu.memory_space<vmem>>, vector<16x128xbf16>
    %cst = arith.constant dense<0.000000e+00> : vector<392x128xf32>
    %3 = tpu.matmul %1, %2, %cst {dimension_numbers = #tpu.dot_dimension_numbers<[1], [0], [0], [1], [0, 0, 1, 1], [], []>} : vector<392x16xbf16>, vector<16x128xbf16>, vector<392x128xf32> -> vector<392x128xf32>
    %c0_3 = arith.constant 0 : index
    %c0_4 = arith.constant 0 : index
    %4 = vector.load %arg2[%c0_3, %c0_4] : memref<1x128xf32, #tpu.memory_space<vmem>>, vector<1x128xf32>
    %5 = vector.broadcast %4 : vector<1x128xf32> to vector<392x128xf32>
    %6 = arith.addf %3, %5 : vector<392x128xf32>
    %cst_5 = arith.constant 0.000000e+00 : f32
    %7 = vector.broadcast %cst_5 : f32 to vector<392x128xf32>
    %8 = arith.maximumf %6, %7 : vector<392x128xf32>
    %c0_6 = arith.constant 0 : index
    %c0_7 = arith.constant 0 : index
    %9 = vector.load %arg3[%c0_6, %c0_7] : memref<392x128xf32, #tpu.memory_space<vmem>>, vector<392x128xf32>
    tpu.vector_store %arg3[%c0_6, %c0_7], %8 {strides = array<i32>} : memref<392x128xf32, #tpu.memory_space<vmem>>, vector<392x128xf32>,
    return
  }
}

module attributes {stable_mosaic.version = 11 : i64} {
  func.func @_mm_kernel(%arg0: memref<98x128xf32, #tpu.memory_space<vmem>>, %arg1: memref<128x128xbf16, #tpu.memory_space<vmem>>, %arg2: memref<1x128xf32, #tpu.memory_space<vmem>>, %arg3: memref<98x128xf32, #tpu.memory_space<vmem>>) attributes {dimension_semantics = [], scalar_prefetch = 0 : i64, scratch_operands = 0 : i64, tpu.core_type = #tpu.core_type<tc>} {
    %c0 = arith.constant 0 : index
    %c0_0 = arith.constant 0 : index
    %0 = vector.load %arg0[%c0, %c0_0] : memref<98x128xf32, #tpu.memory_space<vmem>>, vector<98x128xf32>
    %1 = arith.truncf %0 : vector<98x128xf32> to vector<98x128xbf16>
    %c0_1 = arith.constant 0 : index
    %c0_2 = arith.constant 0 : index
    %2 = vector.load %arg1[%c0_1, %c0_2] : memref<128x128xbf16, #tpu.memory_space<vmem>>, vector<128x128xbf16>
    %cst = arith.constant dense<0.000000e+00> : vector<98x128xf32>
    %3 = tpu.matmul %1, %2, %cst {dimension_numbers = #tpu.dot_dimension_numbers<[1], [0], [0], [1], [0, 0, 1, 1], [], []>} : vector<98x128xbf16>, vector<128x128xbf16>, vector<98x128xf32> -> vector<98x128xf32>
    %c0_3 = arith.constant 0 : index
    %c0_4 = arith.constant 0 : index
    %4 = vector.load %arg2[%c0_3, %c0_4] : memref<1x128xf32, #tpu.memory_space<vmem>>, vector<1x128xf32>
    %5 = vector.broadcast %4 : vector<1x128xf32> to vector<98x128xf32>
    %6 = arith.addf %3, %5 : vector<98x128xf32>
    %cst_5 = arith.constant 0.000000e+00 : f32
    %7 = vector.broadcast %cst_5 : f32 to vector<98x128xf32>
    %8 = arith.maximumf %6, %7 : vector<98x128xf32>
    %c0_6 = arith.constant 0 : index
    %c0_7 = arith.constant 0 : index
    %9 = vector.load %arg3[%c0_6, %c0_7] : memref<98x128xf32, #tpu.memory_space<vmem>>, vector<98x128xf32>
    tpu.vector_store %arg3[%c0_6, %c0_7], %8 {strides = array<i32>} : memref<98x128xf32, #tpu.memory_space<vmem>>, vector<98x128xf32>,
    return
  }
}

module attributes {stable_mosaic.version = 11 : i64} {
  func.func @_bottleneck_kernel(%arg0: memref<2x1152xf32, #tpu.memory_space<vmem>>, %arg1: memref<1152x128xbf16, #tpu.memory_space<vmem>>, %arg2: memref<1x128xf32, #tpu.memory_space<vmem>>, %arg3: memref<128x1152xbf16, #tpu.memory_space<vmem>>, %arg4: memref<1x1152xf32, #tpu.memory_space<vmem>>, %arg5: memref<2x1152xf32, #tpu.memory_space<vmem>>) attributes {dimension_semantics = [], scalar_prefetch = 0 : i64, scratch_operands = 0 : i64, tpu.core_type = #tpu.core_type<tc>} {
    %c0 = arith.constant 0 : index
    %c0_0 = arith.constant 0 : index
    %0 = vector.load %arg0[%c0, %c0_0] : memref<2x1152xf32, #tpu.memory_space<vmem>>, vector<2x1152xf32>
    %1 = arith.truncf %0 : vector<2x1152xf32> to vector<2x1152xbf16>
    %c0_1 = arith.constant 0 : index
    %c0_2 = arith.constant 0 : index
    %2 = vector.load %arg1[%c0_1, %c0_2] : memref<1152x128xbf16, #tpu.memory_space<vmem>>, vector<1152x128xbf16>
    %cst = arith.constant dense<0.000000e+00> : vector<2x128xf32>
    %3 = tpu.matmul %1, %2, %cst {dimension_numbers = #tpu.dot_dimension_numbers<[1], [0], [0], [1], [0, 0, 1, 1], [], []>} : vector<2x1152xbf16>, vector<1152x128xbf16>, vector<2x128xf32> -> vector<2x128xf32>
    %c0_3 = arith.constant 0 : index
    %c0_4 = arith.constant 0 : index
    %4 = vector.load %arg2[%c0_3, %c0_4] : memref<1x128xf32, #tpu.memory_space<vmem>>, vector<1x128xf32>
    %5 = vector.broadcast %4 : vector<1x128xf32> to vector<2x128xf32>
    %6 = arith.addf %3, %5 : vector<2x128xf32>
    %cst_5 = arith.constant 0.000000e+00 : f32
    %7 = vector.broadcast %cst_5 : f32 to vector<2x128xf32>
    %8 = arith.maximumf %6, %7 : vector<2x128xf32>
    %9 = arith.truncf %8 : vector<2x128xf32> to vector<2x128xbf16>
    %c0_6 = arith.constant 0 : index
    %c0_7 = arith.constant 0 : index
    %10 = vector.load %arg3[%c0_6, %c0_7] : memref<128x1152xbf16, #tpu.memory_space<vmem>>, vector<128x1152xbf16>
    %cst_8 = arith.constant dense<0.000000e+00> : vector<2x1152xf32>
    %11 = tpu.matmul %9, %10, %cst_8 {dimension_numbers = #tpu.dot_dimension_numbers<[1], [0], [0], [1], [0, 0, 1, 1], [], []>} : vector<2x128xbf16>, vector<128x1152xbf16>, vector<2x1152xf32> -> vector<2x1152xf32>
    %c0_9 = arith.constant 0 : index
    %c0_10 = arith.constant 0 : index
    %12 = vector.load %arg4[%c0_9, %c0_10] : memref<1x1152xf32, #tpu.memory_space<vmem>>, vector<1x1152xf32>
    %13 = vector.broadcast %12 : vector<1x1152xf32> to vector<2x1152xf32>
    %14 = arith.addf %11, %13 : vector<2x1152xf32>
    %cst_11 = arith.constant 0.000000e+00 : f32
    %15 = vector.broadcast %cst_11 : f32 to vector<2x1152xf32>
    %16 = arith.maximumf %14, %15 : vector<2x1152xf32>
    %c0_12 = arith.constant 0 : index
    %c0_13 = arith.constant 0 : index
    %17 = vector.load %arg5[%c0_12, %c0_13] : memref<2x1152xf32, #tpu.memory_space<vmem>>, vector<2x1152xf32>
    tpu.vector_store %arg5[%c0_12, %c0_13], %16 {strides = array<i32>} : memref<2x1152xf32, #tpu.memory_space<vmem>>, vector<2x1152xf32>,
    return
  }
}

module attributes {stable_mosaic.version = 11 : i64} {
  func.func @_mm_kernel(%arg0: memref<18x576xf32, #tpu.memory_space<vmem>>, %arg1: memref<576x128xbf16, #tpu.memory_space<vmem>>, %arg2: memref<1x128xf32, #tpu.memory_space<vmem>>, %arg3: memref<18x128xf32, #tpu.memory_space<vmem>>) attributes {dimension_semantics = [], scalar_prefetch = 0 : i64, scratch_operands = 0 : i64, tpu.core_type = #tpu.core_type<tc>} {
    %c0 = arith.constant 0 : index
    %c0_0 = arith.constant 0 : index
    %0 = vector.load %arg0[%c0, %c0_0] : memref<18x576xf32, #tpu.memory_space<vmem>>, vector<18x576xf32>
    %1 = arith.truncf %0 : vector<18x576xf32> to vector<18x576xbf16>
    %c0_1 = arith.constant 0 : index
    %c0_2 = arith.constant 0 : index
    %2 = vector.load %arg1[%c0_1, %c0_2] : memref<576x128xbf16, #tpu.memory_space<vmem>>, vector<576x128xbf16>
    %cst = arith.constant dense<0.000000e+00> : vector<18x128xf32>
    %3 = tpu.matmul %1, %2, %cst {dimension_numbers = #tpu.dot_dimension_numbers<[1], [0], [0], [1], [0, 0, 1, 1], [], []>} : vector<18x576xbf16>, vector<576x128xbf16>, vector<18x128xf32> -> vector<18x128xf32>
    %c0_3 = arith.constant 0 : index
    %c0_4 = arith.constant 0 : index
    %4 = vector.load %arg2[%c0_3, %c0_4] : memref<1x128xf32, #tpu.memory_space<vmem>>, vector<1x128xf32>
    %5 = vector.broadcast %4 : vector<1x128xf32> to vector<18x128xf32>
    %6 = arith.addf %3, %5 : vector<18x128xf32>
    %cst_5 = arith.constant 0.000000e+00 : f32
    %7 = vector.broadcast %cst_5 : f32 to vector<18x128xf32>
    %8 = arith.maximumf %6, %7 : vector<18x128xf32>
    %c0_6 = arith.constant 0 : index
    %c0_7 = arith.constant 0 : index
    %9 = vector.load %arg3[%c0_6, %c0_7] : memref<18x128xf32, #tpu.memory_space<vmem>>, vector<18x128xf32>
    tpu.vector_store %arg3[%c0_6, %c0_7], %8 {strides = array<i32>} : memref<18x128xf32, #tpu.memory_space<vmem>>, vector<18x128xf32>,
    return
  }
}

module attributes {stable_mosaic.version = 11 : i64} {
  func.func @_mm_kernel(%arg0: memref<18x128xf32, #tpu.memory_space<vmem>>, %arg1: memref<128x640xbf16, #tpu.memory_space<vmem>>, %arg2: memref<1x640xf32, #tpu.memory_space<vmem>>, %arg3: memref<18x640xf32, #tpu.memory_space<vmem>>) attributes {dimension_semantics = [], scalar_prefetch = 0 : i64, scratch_operands = 0 : i64, tpu.core_type = #tpu.core_type<tc>} {
    %c0 = arith.constant 0 : index
    %c0_0 = arith.constant 0 : index
    %0 = vector.load %arg0[%c0, %c0_0] : memref<18x128xf32, #tpu.memory_space<vmem>>, vector<18x128xf32>
    %1 = arith.truncf %0 : vector<18x128xf32> to vector<18x128xbf16>
    %c0_1 = arith.constant 0 : index
    %c0_2 = arith.constant 0 : index
    %2 = vector.load %arg1[%c0_1, %c0_2] : memref<128x640xbf16, #tpu.memory_space<vmem>>, vector<128x640xbf16>
    %cst = arith.constant dense<0.000000e+00> : vector<18x640xf32>
    %3 = tpu.matmul %1, %2, %cst {dimension_numbers = #tpu.dot_dimension_numbers<[1], [0], [0], [1], [0, 0, 1, 1], [], []>} : vector<18x128xbf16>, vector<128x640xbf16>, vector<18x640xf32> -> vector<18x640xf32>
    %c0_3 = arith.constant 0 : index
    %c0_4 = arith.constant 0 : index
    %4 = vector.load %arg2[%c0_3, %c0_4] : memref<1x640xf32, #tpu.memory_space<vmem>>, vector<1x640xf32>
    %5 = vector.broadcast %4 : vector<1x640xf32> to vector<18x640xf32>
    %6 = arith.addf %3, %5 : vector<18x640xf32>
    %c0_5 = arith.constant 0 : index
    %c0_6 = arith.constant 0 : index
    %7 = vector.load %arg3[%c0_5, %c0_6] : memref<18x640xf32, #tpu.memory_space<vmem>>, vector<18x640xf32>
    tpu.vector_store %arg3[%c0_5, %c0_6], %6 {strides = array<i32>} : memref<18x640xf32, #tpu.memory_space<vmem>>, vector<18x640xf32>,
    return
  }
}

module attributes {stable_mosaic.version = 11 : i64} {
  func.func @_prebias_mm_kernel(%arg0: memref<98x64xf32, #tpu.memory_space<vmem>>, %arg1: memref<1x64xf32, #tpu.memory_space<vmem>>, %arg2: memref<64x128xbf16, #tpu.memory_space<vmem>>, %arg3: memref<1x128xf32, #tpu.memory_space<vmem>>, %arg4: memref<98x128xf32, #tpu.memory_space<vmem>>) attributes {dimension_semantics = [], scalar_prefetch = 0 : i64, scratch_operands = 0 : i64, tpu.core_type = #tpu.core_type<tc>} {
    %c0 = arith.constant 0 : index
    %c0_0 = arith.constant 0 : index
    %0 = vector.load %arg0[%c0, %c0_0] : memref<98x64xf32, #tpu.memory_space<vmem>>, vector<98x64xf32>
    %c0_1 = arith.constant 0 : index
    %c0_2 = arith.constant 0 : index
    %1 = vector.load %arg1[%c0_1, %c0_2] : memref<1x64xf32, #tpu.memory_space<vmem>>, vector<1x64xf32>
    %2 = vector.broadcast %1 : vector<1x64xf32> to vector<98x64xf32>
    %3 = arith.addf %0, %2 : vector<98x64xf32>
    %cst = arith.constant 0.000000e+00 : f32
    %4 = vector.broadcast %cst : f32 to vector<98x64xf32>
    %5 = arith.maximumf %3, %4 : vector<98x64xf32>
    %6 = arith.truncf %5 : vector<98x64xf32> to vector<98x64xbf16>
    %c0_3 = arith.constant 0 : index
    %c0_4 = arith.constant 0 : index
    %7 = vector.load %arg2[%c0_3, %c0_4] : memref<64x128xbf16, #tpu.memory_space<vmem>>, vector<64x128xbf16>
    %cst_5 = arith.constant dense<0.000000e+00> : vector<98x128xf32>
    %8 = tpu.matmul %6, %7, %cst_5 {dimension_numbers = #tpu.dot_dimension_numbers<[1], [0], [0], [1], [0, 0, 1, 1], [], []>} : vector<98x64xbf16>, vector<64x128xbf16>, vector<98x128xf32> -> vector<98x128xf32>
    %c0_6 = arith.constant 0 : index
    %c0_7 = arith.constant 0 : index
    %9 = vector.load %arg3[%c0_6, %c0_7] : memref<1x128xf32, #tpu.memory_space<vmem>>, vector<1x128xf32>
    %10 = vector.broadcast %9 : vector<1x128xf32> to vector<98x128xf32>
    %11 = arith.addf %8, %10 : vector<98x128xf32>
    %cst_8 = arith.constant 0.000000e+00 : f32
    %12 = vector.broadcast %cst_8 : f32 to vector<98x128xf32>
    %13 = arith.maximumf %11, %12 : vector<98x128xf32>
    %c0_9 = arith.constant 0 : index
    %c0_10 = arith.constant 0 : index
    %14 = vector.load %arg4[%c0_9, %c0_10] : memref<98x128xf32, #tpu.memory_space<vmem>>, vector<98x128xf32>
    tpu.vector_store %arg4[%c0_9, %c0_10], %13 {strides = array<i32>} : memref<98x128xf32, #tpu.memory_space<vmem>>, vector<98x128xf32>,
    return
  }
}

module attributes {stable_mosaic.version = 11 : i64} {
  func.func @_mm_kernel(%arg0: memref<392x32xf32, #tpu.memory_space<vmem>>, %arg1: memref<32x128xbf16, #tpu.memory_space<vmem>>, %arg2: memref<1x128xf32, #tpu.memory_space<vmem>>, %arg3: memref<392x128xf32, #tpu.memory_space<vmem>>) attributes {dimension_semantics = [], scalar_prefetch = 0 : i64, scratch_operands = 0 : i64, tpu.core_type = #tpu.core_type<tc>} {
    %c0 = arith.constant 0 : index
    %c0_0 = arith.constant 0 : index
    %0 = vector.load %arg0[%c0, %c0_0] : memref<392x32xf32, #tpu.memory_space<vmem>>, vector<392x32xf32>
    %1 = arith.truncf %0 : vector<392x32xf32> to vector<392x32xbf16>
    %c0_1 = arith.constant 0 : index
    %c0_2 = arith.constant 0 : index
    %2 = vector.load %arg1[%c0_1, %c0_2] : memref<32x128xbf16, #tpu.memory_space<vmem>>, vector<32x128xbf16>
    %cst = arith.constant dense<0.000000e+00> : vector<392x128xf32>
    %3 = tpu.matmul %1, %2, %cst {dimension_numbers = #tpu.dot_dimension_numbers<[1], [0], [0], [1], [0, 0, 1, 1], [], []>} : vector<392x32xbf16>, vector<32x128xbf16>, vector<392x128xf32> -> vector<392x128xf32>
    %c0_3 = arith.constant 0 : index
    %c0_4 = arith.constant 0 : index
    %4 = vector.load %arg2[%c0_3, %c0_4] : memref<1x128xf32, #tpu.memory_space<vmem>>, vector<1x128xf32>
    %5 = vector.broadcast %4 : vector<1x128xf32> to vector<392x128xf32>
    %6 = arith.addf %3, %5 : vector<392x128xf32>
    %cst_5 = arith.constant 0.000000e+00 : f32
    %7 = vector.broadcast %cst_5 : f32 to vector<392x128xf32>
    %8 = arith.maximumf %6, %7 : vector<392x128xf32>
    %c0_6 = arith.constant 0 : index
    %c0_7 = arith.constant 0 : index
    %9 = vector.load %arg3[%c0_6, %c0_7] : memref<392x128xf32, #tpu.memory_space<vmem>>, vector<392x128xf32>
    tpu.vector_store %arg3[%c0_6, %c0_7], %8 {strides = array<i32>} : memref<392x128xf32, #tpu.memory_space<vmem>>, vector<392x128xf32>,
    return
  }
}

</mosaic_0001>

<bundles_post_ra>
// kernel: cnn_autoencoder_forward.8
= control target key start
LH: loop header
LB: loop body
LE: loop exit
PB: predicated region body
PF: predicated region fallthrough
CT: control target
= control target key end

     0   :  { %v318_v0 = vmov 0.0   ;;  %vm319_vm0 = vmmov 0   ;;  %s490_s1 = inlined_call_operand.vmem [shape: bf16[128,128], index: 1, kind: input, shape index: {}]   ;;  %s491_s0 = inlined_call_operand.vmem [shape: f32[98,128], index: 0, kind: input, shape index: {}]   ;;  %s492_s2 = inlined_call_operand.vmem [shape: f32[1,128], index: 2, kind: input, shape index: {}]   ;;  %s493_s3 = inlined_call_operand.vmem [shape: f32[98,128], index: 3, kind: output, shape index: {}]  }
   0x1   :  { %248 = vmatprep.subr.bf16.mxu0 %v318_v0  ;;  %v310_v1 = vld [vmem:[%s490_s1] sm:$0xff]   ;;  %292 = vmatprep.subr.bf16.mxu1 %v318_v0  ;;  %v311_v2 = vld [vmem:[%s490_s1 + $0x8] sm:$0xff]   ;;  %v312_v3 = vld [vmem:[%s490_s1 + $0x10] sm:$0xff]  }
   0x2   :  { %264 = vmatprep.mubr.msk.bf16.mxu0 %vm319_vm0, %v318_v0  ;;  %280 = vmatprep.mubr.msk.bf16.mxu1 %vm319_vm0, %v318_v0  ;;  %v313_v4 = vld [vmem:[%s490_s1 + $0x18] sm:$0xff]   ;;  %v314_v5 = vld [vmem:[%s490_s1 + $0x20] sm:$0xff]   ;;  %v315_v6 = vld [vmem:[%s490_s1 + $0x28] sm:$0xff]  }
   0x3   :  { %249 = vmatpush3.bf16.msra.mxu0 %v310_v1  ;;  %300 = vmatpush3.bf16.msra.mxu1 %v310_v1  ;;  %v316_v7 = vld [vmem:[%s490_s1 + $0x30] sm:$0xff]   ;;  %v317_v8 = vld [vmem:[%s490_s1 + $0x38] sm:$0xff]   ;;  %v15_v9 = vld [vmem:[%s491_s0] sm:$0xff] }
   0x4   :  { %250 = vmatprep.subr.bf16.mxu0 %v318_v0  ;;  %293 = vmatprep.subr.bf16.mxu1 %v318_v0  ;;  %v16_v10 = vld [vmem:[%s491_s0 + $0x8] sm:$0xff]  ;;  %v23_v11 = vld [vmem:[%s491_s0 + $0x40] sm:$0xff]  ;;  %v17_v15 = vld [vmem:[%s491_s0 + $0x10] sm:$0xff] }
   0x5   :  { %v24_v12 = vld [vmem:[%s491_s0 + $0x48] sm:$0xff]  ;;  %v28_v13 = vpack.c.bf16 %v16_v10, %v15_v9  ;;  %v18_v16 = vld [vmem:[%s491_s0 + $0x18] sm:$0xff]  ;;  %v25_v17 = vld [vmem:[%s491_s0 + $0x50] sm:$0xff] }
   0x6   :  { %v32_v14 = vpack.c.bf16 %v24_v12, %v23_v11  ;;  %v26_v18 = vld [vmem:[%s491_s0 + $0x58] sm:$0xff]  ;;  %v29_v19 = vpack.c.bf16 %v18_v16, %v17_v15  ;;  %v19_v21 = vld [vmem:[%s491_s0 + $0x20] sm:$0xff]  ;;  %v20_v22 = vld [vmem:[%s491_s0 + $0x28] sm:$0xff] }
   0x7   :  { %251 = vmatpush3.bf16.msra.mxu0 %v311_v2  ;;  %301 = vmatpush3.bf16.msra.mxu1 %v311_v2  ;;  %v33_v20 = vpack.c.bf16 %v26_v18, %v25_v17  ;;  %v27_v23 = vld [vmem:[%s491_s0 + $0x60] sm:$0x3]  ;;  %v30_v24 = vpack.c.bf16 %v20_v22, %v19_v21  ;;  %v21_v26 = vld [vmem:[%s491_s0 + $0x30] sm:$0xff]  ;;  %v22_v27 = vld [vmem:[%s491_s0 + $0x38] sm:$0xff] }
   0x8   :  { %252 = vmatprep.subr.bf16.mxu0 %v318_v0  ;;  %294 = vmatprep.subr.bf16.mxu1 %v318_v0  ;;  %v34_v25 = vpack.c.bf16 %v27_v23, %v27_v23  ;;  %v31_v28 = vpack.c.bf16 %v22_v27, %v21_v26  ;;  %v436_v29 = vld [vmem:[%s492_s2] ss:$0 sm:$0xff] }
   0xb   :  { %253 = vmatpush3.bf16.msra.mxu0 %v312_v3  ;;  %302 = vmatpush3.bf16.msra.mxu1 %v312_v3 }
   0xc   :  { %254 = vmatprep.subr.bf16.mxu0 %v318_v0  ;;  %295 = vmatprep.subr.bf16.mxu1 %v318_v0 }
   0xf   :  { %255 = vmatpush3.bf16.msra.mxu0 %v313_v4  ;;  %303 = vmatpush3.bf16.msra.mxu1 %v313_v4 }
  0x10   :  { %256 = vmatprep.subr.bf16.mxu0 %v318_v0  ;;  %296 = vmatprep.subr.bf16.mxu1 %v318_v0 }
  0x13   :  { %257 = vmatpush3.bf16.msra.mxu0 %v314_v5  ;;  %304 = vmatpush3.bf16.msra.mxu1 %v314_v5 }
  0x14   :  { %258 = vmatprep.subr.bf16.mxu0 %v318_v0  ;;  %297 = vmatprep.subr.bf16.mxu1 %v318_v0 }
  0x17   :  { %259 = vmatpush3.bf16.msra.mxu0 %v315_v6  ;;  %305 = vmatpush3.bf16.msra.mxu1 %v315_v6 }
  0x18   :  { %260 = vmatprep.subr.bf16.mxu0 %v318_v0  ;;  %298 = vmatprep.subr.bf16.mxu1 %v318_v0 }
  0x1b   :  { %261 = vmatpush3.bf16.msra.mxu0 %v316_v7  ;;  %306 = vmatpush3.bf16.msra.mxu1 %v316_v7 }
  0x1c   :  { %262 = vmatprep.subr.bf16.mxu0 %v318_v0  ;;  %299 = vmatprep.subr.bf16.mxu1 %v318_v0 }
  0x1f   :  { %263 = vmatpush3.bf16.msra.mxu0 %v317_v8  ;;  %307 = vmatpush3.bf16.msra.mxu1 %v317_v8 }
  0x22   :  { %265 = vmatmul.mubr.bf16.vlgmr.msra.gmra.mrb[0].mxu0 %v28_v13  ;;  %281 = vmatmul.mubr.bf16.vlgmr.msra.gmra.mrb[0].mxu1 %v32_v14 }
  0x23   :  { %268 = vmatprep.mubr.msk.bf16.mxu0 %vm319_vm0, %v318_v0  ;;  %284 = vmatprep.mubr.msk.bf16.mxu1 %vm319_vm0, %v318_v0 }
  0x2a   :  { %269 = vmatmul.mubr.bf16.gmra.mrb[4].mxu0 %v29_v19  ;;  %285 = vmatmul.mubr.bf16.gmra.mrb[4].mxu1 %v33_v20 }
  0x2b   :  { %272 = vmatprep.mubr.msk.bf16.mxu0 %vm319_vm0, %v318_v0  ;;  %288 = vmatprep.mubr.msk.bf16.mxu1 %vm319_vm0, %v318_v0 }
  0x32   :  { %273 = vmatmul.mubr.bf16.gmra.mrb[8].mxu0 %v30_v24  ;;  %289 = vmatmul.mubr.bf16.gmra.mrb[8].mxu1 %v34_v25 }
  0x33   :  { %276 = vmatprep.mubr.msk.bf16.mxu0 %vm319_vm0, %v318_v0 }
  0x3a   :  { %277 = vmatmul.mubr.bf16.gmra.mrb[12].mxu0 %v31_v28 }
  0xf5   :  { %v140_v30 = vpop.f32.mrb[0].mxu0  ;;  %v172_v31 = vpop.f32.mrb[0].mxu1 }
  0xf6   :  { %v141_v32 = vadd.f32 %v436_v29, %v140_v30  ;;  %v266_v33 = vpop.f32.mrb[1].mxu0  ;;  %v173_v34 = vadd.f32 %v436_v29, %v172_v31  ;;  %v282_v35 = vpop.f32.mrb[1].mxu1 }
  0xf7   :  { %v143_v36 = vpop.f32.mrb[2].mxu0  ;;  %v175_v37 = vpop.f32.mrb[2].mxu1 }
  0xf8   :  { %v194_v38 = vmax.f32 %v141_v32, 0.0  ;;  %v144_v39 = vadd.f32 %v436_v29, %v143_v36  ;;  %v267_v40 = vpop.f32.mrb[3].mxu0  ;;  %v202_v41 = vmax.f32 %v173_v34, 0.0  ;;  %v176_v42 = vadd.f32 %v436_v29, %v175_v37  ;;  %v283_v43 = vpop.f32.mrb[3].mxu1 }
  0xfa   :  { %207 = vst [vmem:[%s493_s3] sm:$0xff] %v194_v38  ;;  %v195_v44 = vmax.f32 %v144_v39, 0.0  ;;  %215 = vst [vmem:[%s493_s3 + $0x40] sm:$0xff] %v202_v41  ;;  %v203_v45 = vmax.f32 %v176_v42, 0.0 }
  0xfc   :  { %208 = vst [vmem:[%s493_s3 + $0x8] sm:$0xff] %v195_v44  ;;  %216 = vst [vmem:[%s493_s3 + $0x48] sm:$0xff] %v203_v45 }
  0xfd   :  { %v148_v46 = vpop.f32.mrb[4].mxu0  ;;  %v180_v47 = vpop.f32.mrb[4].mxu1 }
  0xfe   :  { %v149_v48 = vadd.f32 %v436_v29, %v148_v46  ;;  %v270_v49 = vpop.f32.mrb[5].mxu0  ;;  %v181_v50 = vadd.f32 %v436_v29, %v180_v47  ;;  %v286_v51 = vpop.f32.mrb[5].mxu1 }
  0xff   :  { %v151_v52 = vpop.f32.mrb[6].mxu0  ;;  %v183_v53 = vpop.f32.mrb[6].mxu1 }
 0x100   :  { %v196_v54 = vmax.f32 %v149_v48, 0.0  ;;  %v152_v55 = vadd.f32 %v436_v29, %v151_v52  ;;  %v271_v56 = vpop.f32.mrb[7].mxu0  ;;  %v204_v57 = vmax.f32 %v181_v50, 0.0  ;;  %v184_v58 = vadd.f32 %v436_v29, %v183_v53  ;;  %v287_v59 = vpop.f32.mrb[7].mxu1 }
 0x102   :  { %209 = vst [vmem:[%s493_s3 + $0x10] sm:$0xff] %v196_v54  ;;  %v197_v60 = vmax.f32 %v152_v55, 0.0  ;;  %217 = vst [vmem:[%s493_s3 + $0x50] sm:$0xff] %v204_v57  ;;  %v205_v61 = vmax.f32 %v184_v58, 0.0 }
 0x104   :  { %210 = vst [vmem:[%s493_s3 + $0x18] sm:$0xff] %v197_v60  ;;  %218 = vst [vmem:[%s493_s3 + $0x58] sm:$0xff] %v205_v61 }
 0x105   :  { %v156_v62 = vpop.f32.mrb[8].mxu0  ;;  %v188_v63 = vpop.f32.mrb[8].mxu1 }
 0x106   :  { %v157_v0 = vadd.f32 %v436_v29, %v156_v62  ;;  %v274_v1 = vpop.f32.mrb[9].mxu0  ;;  %v189_v2 = vadd.f32 %v436_v29, %v188_v63  ;;  %v290_v3 = vpop.f32.mrb[9].mxu1 }
 0x107   :  { %v159_v4 = vpop.f32.mrb[10].mxu0  ;;  %v191_v5 = vpop.f32.mrb[10].mxu1 }
 0x108   :  { %v198_v6 = vmax.f32 %v157_v0, 0.0  ;;  %v160_v7 = vadd.f32 %v436_v29, %v159_v4  ;;  %v275_v8 = vpop.f32.mrb[11].mxu0  ;;  %v206_v9 = vmax.f32 %v189_v2, 0.0  ;;  %v291_v10 = vpop.f32.mrb[11].mxu1 }
 0x10a   :  { %211 = vst [vmem:[%s493_s3 + $0x20] sm:$0xff] %v198_v6  ;;  %v199_v11 = vmax.f32 %v160_v7, 0.0  ;;  %219 = vst [vmem:[%s493_s3 + $0x60] sm:$0x3] %v206_v9 }
 0x10c   :  { %212 = vst [vmem:[%s493_s3 + $0x28] sm:$0xff] %v199_v11 }
 0x10d   :  { %v164_v12 = vpop.f32.mrb[12].mxu0 }
 0x10e   :  { %v165_v13 = vadd.f32 %v436_v29, %v164_v12  ;;  %v278_v14 = vpop.f32.mrb[13].mxu0 }
 0x10f   :  { %v167_v15 = vpop.f32.mrb[14].mxu0 }
 0x110   :  { %v200_v16 = vmax.f32 %v165_v13, 0.0  ;;  %v168_v17 = vadd.f32 %v436_v29, %v167_v15  ;;  %v279_v18 = vpop.f32.mrb[15].mxu0 }
 0x112   :  { %213 = vst [vmem:[%s493_s3 + $0x30] sm:$0xff] %v200_v16  ;;  %v201_v19 = vmax.f32 %v168_v17, 0.0 }
 0x114   :  { %214 = vst [vmem:[%s493_s3 + $0x38] sm:$0xff] %v201_v19 }

// kernel: cnn_autoencoder_forward.7
= control target key start
LH: loop header
LB: loop body
LE: loop exit
PB: predicated region body
PF: predicated region fallthrough
CT: control target
= control target key end

     0   :  { %v674_v0 = vmov 0.0   ;;  %vm675_vm0 = vmmov 0   ;;  %vm104_vm1 = vcmask 130048   ;;  %s1124_s1 = inlined_call_operand.vmem [shape: bf16[16,128], index: 1, kind: input, shape index: {}]   ;;  %s1125_s0 = inlined_call_operand.vmem [shape: f32[392,16], index: 0, kind: input, shape index: {}]   ;;  %s1126_s2 = inlined_call_operand.vmem [shape: f32[1,128], index: 2, kind: input, shape index: {}]   ;;  %s1127_s3 = inlined_call_operand.vmem [shape: f32[392,128], index: 3, kind: output, shape index: {}]  }
   0x1   :  { %567 = vmatprep.subr.bf16.mxu0 %v674_v0  ;;  %v673_v1 = vld [vmem:[%s1124_s1] sm:$0xff]   ;;  %569 = vmatprep.mubr.msk.bf16.mxu0 %vm675_vm0, %v674_v0  ;;  %v16_v3 = vld [vmem:[%s1125_s0 + $0x8] sm:$0xff]  ;;  %v41_v4 = vld [vmem:[%s1125_s0 + $0xd0] sm:$0xff] }
   0x2   :  { %v15_v2 = vld [vmem:[%s1125_s0] sm:$0xff]  ;;  %669 = vmatprep.subr.bf16.mxu1 %v674_v0  ;;  %621 = vmatprep.mubr.msk.bf16.mxu1 %vm675_vm0, %v674_v0  ;;  %v42_v6 = vld [vmem:[%s1125_s0 + $0xd8] sm:$0xff]  ;;  %v17_v8 = vld [vmem:[%s1125_s0 + $0x10] sm:$0xff] }
   0x3   :  { %568 = vmatpush3.bf16.msra.mxu0 %v673_v1  ;;  %v64_v5 = vpack.c.bf16 %v16_v3, %v15_v2  ;;  %670 = vmatpush3.bf16.msra.mxu1 %v673_v1  ;;  %v77_v7 = vpack.c.bf16 %v42_v6, %v41_v4  ;;  %v18_v9 = vld [vmem:[%s1125_s0 + $0x18] sm:$0xff]  ;;  %v43_v10 = vld [vmem:[%s1125_s0 + $0xe0] sm:$0xff]  ;;  %v44_v11 = vld [vmem:[%s1125_s0 + $0xe8] sm:$0xff] }
   0x4   :  { %v65_v12 = vpack.c.bf16 %v18_v9, %v17_v8  ;;  %v78_v13 = vpack.c.bf16 %v44_v11, %v43_v10  ;;  %v19_v14 = vld [vmem:[%s1125_s0 + $0x20] sm:$0xff]  ;;  %v20_v15 = vld [vmem:[%s1125_s0 + $0x28] sm:$0xff]  ;;  %v45_v16 = vld [vmem:[%s1125_s0 + $0xf0] sm:$0xff] }
   0x5   :  { %v46_v17 = vld [vmem:[%s1125_s0 + $0xf8] sm:$0xff]  ;;  %v66_v18 = vpack.c.bf16 %v20_v15, %v19_v14  ;;  %v21_v20 = vld [vmem:[%s1125_s0 + $0x30] sm:$0xff]  ;;  %v47_v22 = vld [vmem:[%s1125_s0 + $0x100] sm:$0xff] }
   0x6   :  { %570 = vmatmul.mubr.msk.bf16.vlgmr.msra.gmra.mrb[0].mxu0 %vm104_vm1, %v64_v5  ;;  %622 = vmatmul.mubr.msk.bf16.vlgmr.msra.gmra.mrb[0].mxu1 %vm104_vm1, %v77_v7  ;;  %v79_v19 = vpack.c.bf16 %v46_v17, %v45_v16  ;;  %v22_v21 = vld [vmem:[%s1125_s0 + $0x38] sm:$0xff]  ;;  %v48_v23 = vld [vmem:[%s1125_s0 + $0x108] sm:$0xff]  ;;  %v23_v26 = vld [vmem:[%s1125_s0 + $0x40] sm:$0xff] }
   0x7   :  { %573 = vmatprep.mubr.msk.bf16.mxu0 %vm675_vm0, %v674_v0  ;;  %625 = vmatprep.mubr.msk.bf16.mxu1 %vm675_vm0, %v674_v0  ;;  %v67_v24 = vpack.c.bf16 %v22_v21, %v21_v20  ;;  %v80_v25 = vpack.c.bf16 %v48_v23, %v47_v22  ;;  %v24_v27 = vld [vmem:[%s1125_s0 + $0x48] sm:$0xff]  ;;  %v49_v28 = vld [vmem:[%s1125_s0 + $0x110] sm:$0xff]  ;;  %v50_v29 = vld [vmem:[%s1125_s0 + $0x118] sm:$0xff] }
   0x8   :  { %v68_v30 = vpack.c.bf16 %v24_v27, %v23_v26  ;;  %v81_v31 = vpack.c.bf16 %v50_v29, %v49_v28  ;;  %v25_v32 = vld [vmem:[%s1125_s0 + $0x50] sm:$0xff]  ;;  %v26_v33 = vld [vmem:[%s1125_s0 + $0x58] sm:$0xff]  ;;  %v51_v34 = vld [vmem:[%s1125_s0 + $0x120] sm:$0xff] }
   0x9   :  { %v52_v35 = vld [vmem:[%s1125_s0 + $0x128] sm:$0xff]  ;;  %v69_v36 = vpack.c.bf16 %v26_v33, %v25_v32  ;;  %v27_v38 = vld [vmem:[%s1125_s0 + $0x60] sm:$0xff]  ;;  %v53_v40 = vld [vmem:[%s1125_s0 + $0x130] sm:$0xff] }
   0xa   :  { %v82_v37 = vpack.c.bf16 %v52_v35, %v51_v34  ;;  %v28_v39 = vld [vmem:[%s1125_s0 + $0x68] sm:$0xff]  ;;  %v54_v41 = vld [vmem:[%s1125_s0 + $0x138] sm:$0xff]  ;;  %v29_v44 = vld [vmem:[%s1125_s0 + $0x70] sm:$0xff] }
   0xb   :  { %v70_v42 = vpack.c.bf16 %v28_v39, %v27_v38  ;;  %v83_v43 = vpack.c.bf16 %v54_v41, %v53_v40  ;;  %v30_v45 = vld [vmem:[%s1125_s0 + $0x78] sm:$0xff]  ;;  %v55_v46 = vld [vmem:[%s1125_s0 + $0x140] sm:$0xff]  ;;  %v56_v47 = vld [vmem:[%s1125_s0 + $0x148] sm:$0xff] }
   0xc   :  { %v71_v48 = vpack.c.bf16 %v30_v45, %v29_v44  ;;  %v84_v49 = vpack.c.bf16 %v56_v47, %v55_v46  ;;  %v31_v50 = vld [vmem:[%s1125_s0 + $0x80] sm:$0xff]  ;;  %v32_v51 = vld [vmem:[%s1125_s0 + $0x88] sm:$0xff]  ;;  %v57_v52 = vld [vmem:[%s1125_s0 + $0x150] sm:$0xff] }
   0xd   :  { %v58_v53 = vld [vmem:[%s1125_s0 + $0x158] sm:$0xff]  ;;  %v72_v54 = vpack.c.bf16 %v32_v51, %v31_v50  ;;  %v33_v56 = vld [vmem:[%s1125_s0 + $0x90] sm:$0xff]  ;;  %v59_v58 = vld [vmem:[%s1125_s0 + $0x160] sm:$0xff] }
   0xe   :  { %574 = vmatmul.mubr.msk.bf16.gmra.mrb[4].mxu0 %vm104_vm1, %v65_v12  ;;  %626 = vmatmul.mubr.msk.bf16.gmra.mrb[4].mxu1 %vm104_vm1, %v78_v13  ;;  %v85_v55 = vpack.c.bf16 %v58_v53, %v57_v52  ;;  %v34_v57 = vld [vmem:[%s1125_s0 + $0x98] sm:$0xff]  ;;  %v60_v59 = vld [vmem:[%s1125_s0 + $0x168] sm:$0xff]  ;;  %v35_v62 = vld [vmem:[%s1125_s0 + $0xa0] sm:$0xff] }
   0xf   :  { %577 = vmatprep.mubr.msk.bf16.mxu0 %vm675_vm0, %v674_v0  ;;  %629 = vmatprep.mubr.msk.bf16.mxu1 %vm675_vm0, %v674_v0  ;;  %v73_v60 = vpack.c.bf16 %v34_v57, %v33_v56  ;;  %v86_v61 = vpack.c.bf16 %v60_v59, %v59_v58  ;;  %v36_v63 = vld [vmem:[%s1125_s0 + $0xa8] sm:$0xff]  ;;  %v61_v1 = vld [vmem:[%s1125_s0 + $0x170] sm:$0xff]  ;;  %v62_v2 = vld [vmem:[%s1125_s0 + $0x178] sm:$0xff] }
  0x10   :  { %v74_v3 = vpack.c.bf16 %v36_v63, %v35_v62  ;;  %v87_v4 = vpack.c.bf16 %v62_v2, %v61_v1  ;;  %v37_v5 = vld [vmem:[%s1125_s0 + $0xb0] sm:$0xff]  ;;  %v38_v6 = vld [vmem:[%s1125_s0 + $0xb8] sm:$0xff]  ;;  %v63_v7 = vld [vmem:[%s1125_s0 + $0x180] sm:$0xff] }
  0x11   :  { %v75_v8 = vpack.c.bf16 %v38_v6, %v37_v5  ;;  %v88_v9 = vpack.c.bf16 %v63_v7, %v63_v7  ;;  %v39_v10 = vld [vmem:[%s1125_s0 + $0xc0] sm:$0xff]  ;;  %v40_v11 = vld [vmem:[%s1125_s0 + $0xc8] sm:$0xff] }
  0x12   :  { %v76_v12 = vpack.c.bf16 %v40_v11, %v39_v10  ;;  %v926_v13 = vld [vmem:[%s1126_s2] ss:$0 sm:$0xff] }
  0x16   :  { %578 = vmatmul.mubr.msk.bf16.gmra.mrb[8].mxu0 %vm104_vm1, %v66_v18  ;;  %630 = vmatmul.mubr.msk.bf16.gmra.mrb[8].mxu1 %vm104_vm1, %v79_v19 }
  0x17   :  { %581 = vmatprep.mubr.msk.bf16.mxu0 %vm675_vm0, %v674_v0  ;;  %633 = vmatprep.mubr.msk.bf16.mxu1 %vm675_vm0, %v674_v0 }
  0x1e   :  { %582 = vmatmul.mubr.msk.bf16.gmra.mrb[12].mxu0 %vm104_vm1, %v67_v24  ;;  %634 = vmatmul.mubr.msk.bf16.gmra.mrb[12].mxu1 %vm104_vm1, %v80_v25 }
  0x1f   :  { %585 = vmatprep.mubr.msk.bf16.mxu0 %vm675_vm0, %v674_v0  ;;  %637 = vmatprep.mubr.msk.bf16.mxu1 %vm675_vm0, %v674_v0 }
  0x26   :  { %586 = vmatmul.mubr.msk.bf16.gmra.mrb[16].mxu0 %vm104_vm1, %v68_v30  ;;  %638 = vmatmul.mubr.msk.bf16.gmra.mrb[16].mxu1 %vm104_vm1, %v81_v31 }
  0x27   :  { %589 = vmatprep.mubr.msk.bf16.mxu0 %vm675_vm0, %v674_v0  ;;  %641 = vmatprep.mubr.msk.bf16.mxu1 %vm675_vm0, %v674_v0 }
  0x2e   :  { %590 = vmatmul.mubr.msk.bf16.gmra.mrb[20].mxu0 %vm104_vm1, %v69_v36  ;;  %642 = vmatmul.mubr.msk.bf16.gmra.mrb[20].mxu1 %vm104_vm1, %v82_v37 }
  0x2f   :  { %593 = vmatprep.mubr.msk.bf16.mxu0 %vm675_vm0, %v674_v0  ;;  %645 = vmatprep.mubr.msk.bf16.mxu1 %vm675_vm0, %v674_v0 }
  0x36   :  { %594 = vmatmul.mubr.msk.bf16.gmra.mrb[24].mxu0 %vm104_vm1, %v70_v42  ;;  %646 = vmatmul.mubr.msk.bf16.gmra.mrb[24].mxu1 %vm104_vm1, %v83_v43 }
  0x37   :  { %597 = vmatprep.mubr.msk.bf16.mxu0 %vm675_vm0, %v674_v0  ;;  %649 = vmatprep.mubr.msk.bf16.mxu1 %vm675_vm0, %v674_v0 }
  0x3e   :  { %598 = vmatmul.mubr.msk.bf16.gmra.mrb[28].mxu0 %vm104_vm1, %v71_v48  ;;  %650 = vmatmul.mubr.msk.bf16.gmra.mrb[28].mxu1 %vm104_vm1, %v84_v49 }
  0x3f   :  { %601 = vmatprep.mubr.msk.bf16.mxu0 %vm675_vm0, %v674_v0  ;;  %653 = vmatprep.mubr.msk.bf16.mxu1 %vm675_vm0, %v674_v0 }
  0x46   :  { %602 = vmatmul.mubr.msk.bf16.gmra.mrb[32].mxu0 %vm104_vm1, %v72_v54  ;;  %654 = vmatmul.mubr.msk.bf16.gmra.mrb[32].mxu1 %vm104_vm1, %v85_v55 }
  0x47   :  { %605 = vmatprep.mubr.msk.bf16.mxu0 %vm675_vm0, %v674_v0  ;;  %657 = vmatprep.mubr.msk.bf16.mxu1 %vm675_vm0, %v674_v0 }
  0x4e   :  { %606 = vmatmul.mubr.msk.bf16.gmra.mrb[36].mxu0 %vm104_vm1, %v73_v60  ;;  %658 = vmatmul.mubr.msk.bf16.gmra.mrb[36].mxu1 %vm104_vm1, %v86_v61 }
  0x4f   :  { %609 = vmatprep.mubr.msk.bf16.mxu0 %vm675_vm0, %v674_v0  ;;  %661 = vmatprep.mubr.msk.bf16.mxu1 %vm675_vm0, %v674_v0 }
  0x56   :  { %610 = vmatmul.mubr.msk.bf16.gmra.mrb[40].mxu0 %vm104_vm1, %v74_v3  ;;  %662 = vmatmul.mubr.msk.bf16.gmra.mrb[40].mxu1 %vm104_vm1, %v87_v4 }
  0x57   :  { %613 = vmatprep.mubr.msk.bf16.mxu0 %vm675_vm0, %v674_v0  ;;  %665 = vmatprep.mubr.msk.bf16.mxu1 %vm675_vm0, %v674_v0 }
  0x5e   :  { %614 = vmatmul.mubr.msk.bf16.gmra.mrb[44].mxu0 %vm104_vm1, %v75_v8  ;;  %666 = vmatmul.mubr.msk.bf16.gmra.mrb[44].mxu1 %vm104_vm1, %v88_v9 }
  0x5f   :  { %617 = vmatprep.mubr.msk.bf16.mxu0 %vm675_vm0, %v674_v0 }
  0x66   :  { %618 = vmatmul.mubr.msk.bf16.gmra.mrb[48].mxu0 %vm104_vm1, %v76_v12 }
  0xd9   :  { %v214_v14 = vpop.f32.mrb[0].mxu0  ;;  %v318_v15 = vpop.f32.mrb[0].mxu1 }
  0xda   :  { %v215_v0 = vadd.f32 %v926_v13, %v214_v14  ;;  %v571_v16 = vpop.f32.mrb[1].mxu0  ;;  %v319_v17 = vadd.f32 %v926_v13, %v318_v15  ;;  %v623_v18 = vpop.f32.mrb[1].mxu1 }
  0xdb   :  { %v217_v19 = vpop.f32.mrb[2].mxu0  ;;  %v321_v20 = vpop.f32.mrb[2].mxu1 }
  0xdc   :  { %v412_v21 = vmax.f32 %v215_v0, 0.0  ;;  %v218_v22 = vadd.f32 %v926_v13, %v217_v19  ;;  %v572_v23 = vpop.f32.mrb[3].mxu0  ;;  %v438_v24 = vmax.f32 %v319_v17, 0.0  ;;  %v322_v25 = vadd.f32 %v926_v13, %v321_v20  ;;  %v624_v26 = vpop.f32.mrb[3].mxu1 }
  0xde   :  { %461 = vst [vmem:[%s1127_s3] sm:$0xff] %v412_v21  ;;  %v413_v27 = vmax.f32 %v218_v22, 0.0  ;;  %487 = vst [vmem:[%s1127_s3 + $0xd0] sm:$0xff] %v438_v24  ;;  %v439_v28 = vmax.f32 %v322_v25, 0.0 }
  0xe0   :  { %462 = vst [vmem:[%s1127_s3 + $0x8] sm:$0xff] %v413_v27  ;;  %488 = vst [vmem:[%s1127_s3 + $0xd8] sm:$0xff] %v439_v28 }
  0xe1   :  { %v222_v29 = vpop.f32.mrb[4].mxu0  ;;  %v326_v30 = vpop.f32.mrb[4].mxu1 }
  0xe2   :  { %v223_v31 = vadd.f32 %v926_v13, %v222_v29  ;;  %v575_v32 = vpop.f32.mrb[5].mxu0  ;;  %v327_v33 = vadd.f32 %v926_v13, %v326_v30  ;;  %v627_v34 = vpop.f32.mrb[5].mxu1 }
  0xe3   :  { %v225_v35 = vpop.f32.mrb[6].mxu0  ;;  %v329_v36 = vpop.f32.mrb[6].mxu1 }
  0xe4   :  { %v414_v37 = vmax.f32 %v223_v31, 0.0  ;;  %v226_v38 = vadd.f32 %v926_v13, %v225_v35  ;;  %v576_v39 = vpop.f32.mrb[7].mxu0  ;;  %v440_v40 = vmax.f32 %v327_v33, 0.0  ;;  %v330_v41 = vadd.f32 %v926_v13, %v329_v36  ;;  %v628_v42 = vpop.f32.mrb[7].mxu1 }
  0xe6   :  { %463 = vst [vmem:[%s1127_s3 + $0x10] sm:$0xff] %v414_v37  ;;  %v415_v43 = vmax.f32 %v226_v38, 0.0  ;;  %489 = vst [vmem:[%s1127_s3 + $0xe0] sm:$0xff] %v440_v40  ;;  %v441_v44 = vmax.f32 %v330_v41, 0.0 }
  0xe8   :  { %464 = vst [vmem:[%s1127_s3 + $0x18] sm:$0xff] %v415_v43  ;;  %490 = vst [vmem:[%s1127_s3 + $0xe8] sm:$0xff] %v441_v44 }
  0xe9   :  { %v230_v45 = vpop.f32.mrb[8].mxu0  ;;  %v334_v46 = vpop.f32.mrb[8].mxu1 }
  0xea   :  { %v231_v47 = vadd.f32 %v926_v13, %v230_v45  ;;  %v579_v48 = vpop.f32.mrb[9].mxu0  ;;  %v335_v49 = vadd.f32 %v926_v13, %v334_v46  ;;  %v631_v50 = vpop.f32.mrb[9].mxu1 }
  0xeb   :  { %v233_v51 = vpop.f32.mrb[10].mxu0  ;;  %v337_v52 = vpop.f32.mrb[10].mxu1 }
  0xec   :  { %v416_v53 = vmax.f32 %v231_v47, 0.0  ;;  %v234_v54 = vadd.f32 %v926_v13, %v233_v51  ;;  %v580_v55 = vpop.f32.mrb[11].mxu0  ;;  %v442_v56 = vmax.f32 %v335_v49, 0.0  ;;  %v338_v57 = vadd.f32 %v926_v13, %v337_v52  ;;  %v632_v58 = vpop.f32.mrb[11].mxu1 }
  0xee   :  { %465 = vst [vmem:[%s1127_s3 + $0x20] sm:$0xff] %v416_v53  ;;  %v417_v59 = vmax.f32 %v234_v54, 0.0  ;;  %491 = vst [vmem:[%s1127_s3 + $0xf0] sm:$0xff] %v442_v56  ;;  %v443_v60 = vmax.f32 %v338_v57, 0.0 }
  0xf0   :  { %466 = vst [vmem:[%s1127_s3 + $0x28] sm:$0xff] %v417_v59  ;;  %492 = vst [vmem:[%s1127_s3 + $0xf8] sm:$0xff] %v443_v60 }
  0xf1   :  { %v238_v61 = vpop.f32.mrb[12].mxu0  ;;  %v342_v62 = vpop.f32.mrb[12].mxu1 }
  0xf2   :  { %v239_v63 = vadd.f32 %v926_v13, %v238_v61  ;;  %v583_v1 = vpop.f32.mrb[13].mxu0  ;;  %v343_v2 = vadd.f32 %v926_v13, %v342_v62  ;;  %v635_v3 = vpop.f32.mrb[13].mxu1 }
  0xf3   :  { %v241_v4 = vpop.f32.mrb[14].mxu0  ;;  %v345_v5 = vpop.f32.mrb[14].mxu1 }
  0xf4   :  { %v418_v6 = vmax.f32 %v239_v63, 0.0  ;;  %v242_v7 = vadd.f32 %v926_v13, %v241_v4  ;;  %v584_v8 = vpop.f32.mrb[15].mxu0  ;;  %v444_v9 = vmax.f32 %v343_v2, 0.0  ;;  %v346_v10 = vadd.f32 %v926_v13, %v345_v5  ;;  %v636_v11 = vpop.f32.mrb[15].mxu1 }
  0xf6   :  { %467 = vst [vmem:[%s1127_s3 + $0x30] sm:$0xff] %v418_v6  ;;  %v419_v12 = vmax.f32 %v242_v7, 0.0  ;;  %493 = vst [vmem:[%s1127_s3 + $0x100] sm:$0xff] %v444_v9  ;;  %v445_v14 = vmax.f32 %v346_v10, 0.0 }
  0xf8   :  { %468 = vst [vmem:[%s1127_s3 + $0x38] sm:$0xff] %v419_v12  ;;  %494 = vst [vmem:[%s1127_s3 + $0x108] sm:$0xff] %v445_v14 }
  0xf9   :  { %v246_v15 = vpop.f32.mrb[16].mxu0  ;;  %v350_v0 = vpop.f32.mrb[16].mxu1 }
  0xfa   :  { %v247_v16 = vadd.f32 %v926_v13, %v246_v15  ;;  %v587_v17 = vpop.f32.mrb[17].mxu0  ;;  %v351_v18 = vadd.f32 %v926_v13, %v350_v0  ;;  %v639_v19 = vpop.f32.mrb[17].mxu1 }
  0xfb   :  { %v249_v20 = vpop.f32.mrb[18].mxu0  ;;  %v353_v21 = vpop.f32.mrb[18].mxu1 }
  0xfc   :  { %v420_v22 = vmax.f32 %v247_v16, 0.0  ;;  %v250_v23 = vadd.f32 %v926_v13, %v249_v20  ;;  %v588_v24 = vpop.f32.mrb[19].mxu0  ;;  %v446_v25 = vmax.f32 %v351_v18, 0.0  ;;  %v354_v26 = vadd.f32 %v926_v13, %v353_v21  ;;  %v640_v27 = vpop.f32.mrb[19].mxu1 }
  0xfe   :  { %469 = vst [vmem:[%s1127_s3 + $0x40] sm:$0xff] %v420_v22  ;;  %v421_v28 = vmax.f32 %v250_v23, 0.0  ;;  %495 = vst [vmem:[%s1127_s3 + $0x110] sm:$0xff] %v446_v25  ;;  %v447_v29 = vmax.f32 %v354_v26, 0.0 }
 0x100   :  { %470 = vst [vmem:[%s1127_s3 + $0x48] sm:$0xff] %v421_v28  ;;  %496 = vst [vmem:[%s1127_s3 + $0x118] sm:$0xff] %v447_v29 }
 0x101   :  { %v254_v30 = vpop.f32.mrb[20].mxu0  ;;  %v358_v31 = vpop.f32.mrb[20].mxu1 }
 0x102   :  { %v255_v32 = vadd.f32 %v926_v13, %v254_v30  ;;  %v591_v33 = vpop.f32.mrb[21].mxu0  ;;  %v359_v34 = vadd.f32 %v926_v13, %v358_v31  ;;  %v643_v35 = vpop.f32.mrb[21].mxu1 }
 0x103   :  { %v257_v36 = vpop.f32.mrb[22].mxu0  ;;  %v361_v37 = vpop.f32.mrb[22].mxu1 }
 0x104   :  { %v422_v38 = vmax.f32 %v255_v32, 0.0  ;;  %v258_v39 = vadd.f32 %v926_v13, %v257_v36  ;;  %v592_v40 = vpop.f32.mrb[23].mxu0  ;;  %v448_v41 = vmax.f32 %v359_v34, 0.0  ;;  %v362_v42 = vadd.f32 %v926_v13, %v361_v37  ;;  %v644_v43 = vpop.f32.mrb[23].mxu1 }
 0x106   :  { %471 = vst [vmem:[%s1127_s3 + $0x50] sm:$0xff] %v422_v38  ;;  %v423_v44 = vmax.f32 %v258_v39, 0.0  ;;  %497 = vst [vmem:[%s1127_s3 + $0x120] sm:$0xff] %v448_v41  ;;  %v449_v45 = vmax.f32 %v362_v42, 0.0 }
 0x108   :  { %472 = vst [vmem:[%s1127_s3 + $0x58] sm:$0xff] %v423_v44  ;;  %498 = vst [vmem:[%s1127_s3 + $0x128] sm:$0xff] %v449_v45 }
 0x109   :  { %v262_v46 = vpop.f32.mrb[24].mxu0  ;;  %v366_v47 = vpop.f32.mrb[24].mxu1 }
 0x10a   :  { %v263_v48 = vadd.f32 %v926_v13, %v262_v46  ;;  %v595_v49 = vpop.f32.mrb[25].mxu0  ;;  %v367_v50 = vadd.f32 %v926_v13, %v366_v47  ;;  %v647_v51 = vpop.f32.mrb[25].mxu1 }
 0x10b   :  { %v265_v52 = vpop.f32.mrb[26].mxu0  ;;  %v369_v53 = vpop.f32.mrb[26].mxu1 }
 0x10c   :  { %v424_v54 = vmax.f32 %v263_v48, 0.0  ;;  %v266_v55 = vadd.f32 %v926_v13, %v265_v52  ;;  %v596_v56 = vpop.f32.mrb[27].mxu0  ;;  %v450_v57 = vmax.f32 %v367_v50, 0.0  ;;  %v370_v58 = vadd.f32 %v926_v13, %v369_v53  ;;  %v648_v59 = vpop.f32.mrb[27].mxu1 }
 0x10e   :  { %473 = vst [vmem:[%s1127_s3 + $0x60] sm:$0xff] %v424_v54  ;;  %v425_v60 = vmax.f32 %v266_v55, 0.0  ;;  %499 = vst [vmem:[%s1127_s3 + $0x130] sm:$0xff] %v450_v57  ;;  %v451_v61 = vmax.f32 %v370_v58, 0.0 }
 0x110   :  { %474 = vst [vmem:[%s1127_s3 + $0x68] sm:$0xff] %v425_v60  ;;  %500 = vst [vmem:[%s1127_s3 + $0x138] sm:$0xff] %v451_v61 }
 0x111   :  { %v270_v62 = vpop.f32.mrb[28].mxu0  ;;  %v374_v63 = vpop.f32.mrb[28].mxu1 }
 0x112   :  { %v271_v1 = vadd.f32 %v926_v13, %v270_v62  ;;  %v599_v2 = vpop.f32.mrb[29].mxu0  ;;  %v375_v3 = vadd.f32 %v926_v13, %v374_v63  ;;  %v651_v4 = vpop.f32.mrb[29].mxu1 }
 0x113   :  { %v273_v5 = vpop.f32.mrb[30].mxu0  ;;  %v377_v6 = vpop.f32.mrb[30].mxu1 }
 0x114   :  { %v426_v7 = vmax.f32 %v271_v1, 0.0  ;;  %v274_v8 = vadd.f32 %v926_v13, %v273_v5  ;;  %v600_v9 = vpop.f32.mrb[31].mxu0  ;;  %v452_v10 = vmax.f32 %v375_v3, 0.0  ;;  %v378_v11 = vadd.f32 %v926_v13, %v377_v6  ;;  %v652_v12 = vpop.f32.mrb[31].mxu1 }
 0x116   :  { %475 = vst [vmem:[%s1127_s3 + $0x70] sm:$0xff] %v426_v7  ;;  %v427_v14 = vmax.f32 %v274_v8, 0.0  ;;  %501 = vst [vmem:[%s1127_s3 + $0x140] sm:$0xff] %v452_v10  ;;  %v453_v15 = vmax.f32 %v378_v11, 0.0 }
 0x118   :  { %476 = vst [vmem:[%s1127_s3 + $0x78] sm:$0xff] %v427_v14  ;;  %502 = vst [vmem:[%s1127_s3 + $0x148] sm:$0xff] %v453_v15 }
 0x119   :  { %v278_v0 = vpop.f32.mrb[32].mxu0  ;;  %v382_v16 = vpop.f32.mrb[32].mxu1 }
 0x11a   :  { %v279_v17 = vadd.f32 %v926_v13, %v278_v0  ;;  %v603_v18 = vpop.f32.mrb[33].mxu0  ;;  %v383_v19 = vadd.f32 %v926_v13, %v382_v16  ;;  %v655_v20 = vpop.f32.mrb[33].mxu1 }
 0x11b   :  { %v281_v21 = vpop.f32.mrb[34].mxu0  ;;  %v385_v22 = vpop.f32.mrb[34].mxu1 }
 0x11c   :  { %v428_v23 = vmax.f32 %v279_v17, 0.0  ;;  %v282_v24 = vadd.f32 %v926_v13, %v281_v21  ;;  %v604_v25 = vpop.f32.mrb[35].mxu0  ;;  %v454_v26 = vmax.f32 %v383_v19, 0.0  ;;  %v386_v27 = vadd.f32 %v926_v13, %v385_v22  ;;  %v656_v28 = vpop.f32.mrb[35].mxu1 }
 0x11e   :  { %477 = vst [vmem:[%s1127_s3 + $0x80] sm:$0xff] %v428_v23  ;;  %v429_v29 = vmax.f32 %v282_v24, 0.0  ;;  %503 = vst [vmem:[%s1127_s3 + $0x150] sm:$0xff] %v454_v26  ;;  %v455_v30 = vmax.f32 %v386_v27, 0.0 }
 0x120   :  { %478 = vst [vmem:[%s1127_s3 + $0x88] sm:$0xff] %v429_v29  ;;  %504 = vst [vmem:[%s1127_s3 + $0x158] sm:$0xff] %v455_v30 }
 0x121   :  { %v286_v31 = vpop.f32.mrb[36].mxu0  ;;  %v390_v32 = vpop.f32.mrb[36].mxu1 }
 0x122   :  { %v287_v33 = vadd.f32 %v926_v13, %v286_v31  ;;  %v607_v34 = vpop.f32.mrb[37].mxu0  ;;  %v391_v35 = vadd.f32 %v926_v13, %v390_v32  ;;  %v659_v36 = vpop.f32.mrb[37].mxu1 }
 0x123   :  { %v289_v37 = vpop.f32.mrb[38].mxu0  ;;  %v393_v38 = vpop.f32.mrb[38].mxu1 }
 0x124   :  { %v430_v39 = vmax.f32 %v287_v33, 0.0  ;;  %v290_v40 = vadd.f32 %v926_v13, %v289_v37  ;;  %v608_v41 = vpop.f32.mrb[39].mxu0  ;;  %v456_v42 = vmax.f32 %v391_v35, 0.0  ;;  %v394_v43 = vadd.f32 %v926_v13, %v393_v38  ;;  %v660_v44 = vpop.f32.mrb[39].mxu1 }
 0x126   :  { %479 = vst [vmem:[%s1127_s3 + $0x90] sm:$0xff] %v430_v39  ;;  %v431_v45 = vmax.f32 %v290_v40, 0.0  ;;  %505 = vst [vmem:[%s1127_s3 + $0x160] sm:$0xff] %v456_v42  ;;  %v457_v46 = vmax.f32 %v394_v43, 0.0 }
 0x128   :  { %480 = vst [vmem:[%s1127_s3 + $0x98] sm:$0xff] %v431_v45  ;;  %506 = vst [vmem:[%s1127_s3 + $0x168] sm:$0xff] %v457_v46 }
 0x129   :  { %v294_v47 = vpop.f32.mrb[40].mxu0  ;;  %v398_v48 = vpop.f32.mrb[40].mxu1 }
 0x12a   :  { %v295_v49 = vadd.f32 %v926_v13, %v294_v47  ;;  %v611_v50 = vpop.f32.mrb[41].mxu0  ;;  %v399_v51 = vadd.f32 %v926_v13, %v398_v48  ;;  %v663_v52 = vpop.f32.mrb[41].mxu1 }
 0x12b   :  { %v297_v53 = vpop.f32.mrb[42].mxu0  ;;  %v401_v54 = vpop.f32.mrb[42].mxu1 }
 0x12c   :  { %v432_v55 = vmax.f32 %v295_v49, 0.0  ;;  %v298_v56 = vadd.f32 %v926_v13, %v297_v53  ;;  %v612_v57 = vpop.f32.mrb[43].mxu0  ;;  %v458_v58 = vmax.f32 %v399_v51, 0.0  ;;  %v402_v59 = vadd.f32 %v926_v13, %v401_v54  ;;  %v664_v60 = vpop.f32.mrb[43].mxu1 }
 0x12e   :  { %481 = vst [vmem:[%s1127_s3 + $0xa0] sm:$0xff] %v432_v55  ;;  %v433_v61 = vmax.f32 %v298_v56, 0.0  ;;  %507 = vst [vmem:[%s1127_s3 + $0x170] sm:$0xff] %v458_v58  ;;  %v459_v62 = vmax.f32 %v402_v59, 0.0 }
 0x130   :  { %482 = vst [vmem:[%s1127_s3 + $0xa8] sm:$0xff] %v433_v61  ;;  %508 = vst [vmem:[%s1127_s3 + $0x178] sm:$0xff] %v459_v62 }
 0x131   :  { %v302_v63 = vpop.f32.mrb[44].mxu0  ;;  %v406_v1 = vpop.f32.mrb[44].mxu1 }
 0x132   :  { %v303_v2 = vadd.f32 %v926_v13, %v302_v63  ;;  %v615_v3 = vpop.f32.mrb[45].mxu0  ;;  %v407_v4 = vadd.f32 %v926_v13, %v406_v1  ;;  %v667_v5 = vpop.f32.mrb[45].mxu1 }
 0x133   :  { %v305_v6 = vpop.f32.mrb[46].mxu0  ;;  %v409_v7 = vpop.f32.mrb[46].mxu1 }
 0x134   :  { %v434_v8 = vmax.f32 %v303_v2, 0.0  ;;  %v306_v9 = vadd.f32 %v926_v13, %v305_v6  ;;  %v616_v10 = vpop.f32.mrb[47].mxu0  ;;  %v460_v11 = vmax.f32 %v407_v4, 0.0  ;;  %v668_v12 = vpop.f32.mrb[47].mxu1 }
 0x136   :  { %483 = vst [vmem:[%s1127_s3 + $0xb0] sm:$0xff] %v434_v8  ;;  %v435_v14 = vmax.f32 %v306_v9, 0.0  ;;  %509 = vst [vmem:[%s1127_s3 + $0x180] sm:$0xff] %v460_v11 }
 0x138   :  { %484 = vst [vmem:[%s1127_s3 + $0xb8] sm:$0xff] %v435_v14 }
 0x139   :  { %v310_v15 = vpop.f32.mrb[48].mxu0 }
 0x13a   :  { %v311_v0 = vadd.f32 %v926_v13, %v310_v15  ;;  %v619_v16 = vpop.f32.mrb[49].mxu0 }
 0x13b   :  { %v313_v17 = vpop.f32.mrb[50].mxu0 }
 0x13c   :  { %v436_v18 = vmax.f32 %v311_v0, 0.0  ;;  %v314_v19 = vadd.f32 %v926_v13, %v313_v17  ;;  %v620_v20 = vpop.f32.mrb[51].mxu0 }
 0x13e   :  { %485 = vst [vmem:[%s1127_s3 + $0xc0] sm:$0xff] %v436_v18  ;;  %v437_v21 = vmax.f32 %v314_v19, 0.0 }
 0x140   :  { %486 = vst [vmem:[%s1127_s3 + $0xc8] sm:$0xff] %v437_v21 }

// kernel: cnn_autoencoder_forward.9
= control target key start
LH: loop header
LB: loop body
LE: loop exit
PB: predicated region body
PF: predicated region fallthrough
CT: control target
= control target key end

     0   :  { %vm335_vm0 = vcmask 523264   ;;  %s830_s1 = inlined_call_operand.vmem [shape: bf16[576,128], index: 1, kind: input, shape index: {}]   ;;  %s831_s0 = inlined_call_operand.vmem [shape: f32[18,576], index: 0, kind: input, shape index: {}]   ;;  %s832_s2 = inlined_call_operand.vmem [shape: f32[1,128], index: 2, kind: input, shape index: {}]   ;;  %s833_s3 = inlined_call_operand.vmem [shape: f32[18,128], index: 3, kind: output, shape index: {}]  }
   0x1   :  { %v609_v0 = vld [vmem:[%s830_s1 + $0x40] sm:$0xff]   ;;  %v613_v4 = vld [vmem:[%s830_s1 + $0x48] sm:$0xff]   ;;  %v617_v8 = vld [vmem:[%s830_s1 + $0x50] sm:$0xff]  }
   0x2   :  { %v610_v1 = vld [vmem:[%s830_s1] sm:$0xff]   ;;  %535 = vmatprep.subr.bf16.mxu0 %v609_v0  ;;  %v614_v5 = vld [vmem:[%s830_s1 + $0x8] sm:$0xff]   ;;  %v618_v9 = vld [vmem:[%s830_s1 + $0x10] sm:$0xff]  }
   0x3   :  { %v611_v2 = vld [vmem:[%s830_s1 + $0xc0] sm:$0xff]   ;;  %536 = vmatpush3.bf16.msra.mxu0 %v610_v1  ;;  %v615_v6 = vld [vmem:[%s830_s1 + $0xc8] sm:$0xff]   ;;  %v619_v10 = vld [vmem:[%s830_s1 + $0xd0] sm:$0xff]  }
   0x4   :  { %v612_v3 = vld [vmem:[%s830_s1 + $0x80] sm:$0xff]   ;;  %563 = vmatprep.subr.bf16.mxu1 %v611_v2  ;;  %537 = vmatprep.subr.bf16.mxu0 %v613_v4  ;;  %v616_v7 = vld [vmem:[%s830_s1 + $0x88] sm:$0xff]   ;;  %v620_v11 = vld [vmem:[%s830_s1 + $0x90] sm:$0xff]  }
   0x5   :  { %564 = vmatpush3.bf16.msra.mxu1 %v612_v3  ;;  %v621_v12 = vld [vmem:[%s830_s1 + $0x58] sm:$0xff]   ;;  %v625_v16 = vld [vmem:[%s830_s1 + $0x60] sm:$0xff]   ;;  %v629_v20 = vld [vmem:[%s830_s1 + $0x68] sm:$0xff]  }
   0x6   :  { %565 = vmatprep.subr.bf16.mxu1 %v615_v6  ;;  %v622_v13 = vld [vmem:[%s830_s1 + $0x18] sm:$0xff]   ;;  %v626_v17 = vld [vmem:[%s830_s1 + $0x20] sm:$0xff]   ;;  %v630_v21 = vld [vmem:[%s830_s1 + $0x28] sm:$0xff]  }
   0x7   :  { %538 = vmatpush3.bf16.msra.mxu0 %v614_v5  ;;  %v623_v14 = vld [vmem:[%s830_s1 + $0xd8] sm:$0xff]   ;;  %v627_v18 = vld [vmem:[%s830_s1 + $0xe0] sm:$0xff]   ;;  %v631_v22 = vld [vmem:[%s830_s1 + $0xe8] sm:$0xff]  }
   0x8   :  { %539 = vmatprep.subr.bf16.mxu0 %v617_v8  ;;  %v624_v15 = vld [vmem:[%s830_s1 + $0x98] sm:$0xff]   ;;  %v628_v19 = vld [vmem:[%s830_s1 + $0xa0] sm:$0xff]   ;;  %v632_v23 = vld [vmem:[%s830_s1 + $0xa8] sm:$0xff]  }
   0x9   :  { %566 = vmatpush3.bf16.msra.mxu1 %v616_v7  ;;  %v633_v24 = vld [vmem:[%s830_s1 + $0x70] sm:$0xff]   ;;  %v637_v28 = vld [vmem:[%s830_s1 + $0x78] sm:$0xff]   ;;  %v16_v31 = vld [vmem:[%s831_s0 + $0x8] sm:$0xff] }
   0xa   :  { %567 = vmatprep.subr.bf16.mxu1 %v619_v10  ;;  %v634_v25 = vld [vmem:[%s830_s1 + $0x30] sm:$0xff]   ;;  %v638_v29 = vld [vmem:[%s830_s1 + $0x38] sm:$0xff]   ;;  %v15_v35 = vld [vmem:[%s831_s0] sm:$0xff] }
   0xb   :  { %540 = vmatpush3.bf16.msra.mxu0 %v618_v9  ;;  %v635_v26 = vld [vmem:[%s830_s1 + $0xf0] sm:$0xff]   ;;  %v639_v30 = vld [vmem:[%s830_s1 + $0xf8] sm:$0xff]   ;;  %v20_v36 = vld [vmem:[%s831_s0 + $0x28] sm:$0xff] }
   0xc   :  { %541 = vmatprep.subr.bf16.mxu0 %v621_v12  ;;  %v636_v27 = vld [vmem:[%s830_s1 + $0xb0] sm:$0xff]   ;;  %v640_v34 = vld [vmem:[%s830_s1 + $0xb8] sm:$0xff]   ;;  %v30_v37 = vpack.c.bf16 %v20_v36, %v15_v35  ;;  %v641_v38 = vld [vmem:[%s830_s1 + $0x100] sm:$0xff]  }
   0xd   :  { %568 = vmatpush3.bf16.msra.mxu1 %v620_v11  ;;  %v21_v32 = vld [vmem:[%s831_s0 + $0x30] sm:$0xff]  ;;  %v18_v39 = vld [vmem:[%s831_s0 + $0x18] sm:$0xff]  ;;  %v23_v40 = vld [vmem:[%s831_s0 + $0x40] sm:$0xff] }
   0xe   :  { %569 = vmatprep.subr.bf16.mxu1 %v623_v14  ;;  %v31_v33 = vpack.c.bf16 %v21_v32, %v16_v31  ;;  %v33_v41 = vpack.c.bf16 %v23_v40, %v18_v39  ;;  %v17_v42 = vld [vmem:[%s831_s0 + $0x10] sm:$0xff]  ;;  %v22_v43 = vld [vmem:[%s831_s0 + $0x38] sm:$0xff]  ;;  %v642_v45 = vld [vmem:[%s830_s1 + $0x108] sm:$0xff]  }
   0xf   :  { %542 = vmatpush3.bf16.msra.mxu0 %v622_v13  ;;  %v32_v44 = vpack.c.bf16 %v22_v43, %v17_v42  ;;  %v26_v46 = vld [vmem:[%s831_s0 + $0x58] sm:$0x3]  ;;  %v25_v48 = vld [vmem:[%s831_s0 + $0x50] sm:$0x3]  ;;  %v28_v50 = vld [vmem:[%s831_s0 + $0x68] sm:$0x3] }
  0x10   :  { %543 = vmatprep.subr.bf16.mxu0 %v625_v16  ;;  %374 = vmatprep.mubr.bf16.mxu0 %v31_v33  ;;  %v36_v47 = vpack.c.bf16 %v26_v46, %v26_v46  ;;  %v643_v49 = vld [vmem:[%s830_s1 + $0x110] sm:$0xff]   ;;  %v38_v51 = vpack.c.bf16 %v28_v50, %v28_v50  ;;  %v27_v52 = vld [vmem:[%s831_s0 + $0x60] sm:$0x3]  ;;  %v35_v53 = vpack.c.bf16 %v25_v48, %v25_v48  ;;  %v24_v55 = vld [vmem:[%s831_s0 + $0x48] sm:$0xff] }
  0x11   :  { %570 = vmatpush3.bf16.msra.mxu1 %v624_v15  ;;  %422 = vmatprep.mubr.bf16.mxu1 %v33_v41  ;;  %v19_v54 = vld [vmem:[%s831_s0 + $0x20] sm:$0xff]  ;;  %v37_v57 = vpack.c.bf16 %v27_v52, %v27_v52  ;;  %v644_v58 = vld [vmem:[%s830_s1 + $0x118] sm:$0xff]   ;;  %v29_v59 = vld [vmem:[%s831_s0 + $0x70] sm:$0x3] }
  0x12   :  { %571 = vmatprep.subr.bf16.mxu1 %v627_v18  ;;  %v34_v56 = vpack.c.bf16 %v24_v55, %v19_v54  ;;  %v39_v60 = vpack.c.bf16 %v29_v59, %v29_v59  ;;  %v496_v62 = vld [vmem:[%s832_s2] ss:$0 sm:$0xff] }
  0x13   :  { %544 = vmatpush3.bf16.msra.mxu0 %v626_v17 }
  0x14   :  { %545 = vmatprep.subr.bf16.mxu0 %v629_v20 }
  0x15   :  { %572 = vmatpush3.bf16.msra.mxu1 %v628_v19 }
  0x16   :  { %573 = vmatprep.subr.bf16.mxu1 %v631_v22 }
  0x17   :  { %546 = vmatpush3.bf16.msra.mxu0 %v630_v21 }
  0x18   :  { %547 = vmatprep.subr.bf16.mxu0 %v633_v24 }
  0x19   :  { %574 = vmatpush3.bf16.msra.mxu1 %v632_v23 }
  0x1a   :  { %575 = vmatprep.subr.bf16.mxu1 %v635_v26 }
  0x1b   :  { %548 = vmatpush3.bf16.msra.mxu0 %v634_v25 }
  0x1c   :  { %549 = vmatprep.subr.bf16.mxu0 %v637_v28 }
  0x1d   :  { %576 = vmatpush3.bf16.msra.mxu1 %v636_v27 }
  0x1e   :  { %577 = vmatprep.subr.bf16.mxu1 %v639_v30 }
  0x1f   :  { %550 = vmatpush3.bf16.msra.mxu0 %v638_v29 }
  0x20   :  { %597 = vmatprep.subr.bf16.mxu0 %v641_v38 }
  0x21   :  { %578 = vmatpush3.bf16.msra.mxu1 %v640_v34 }
  0x22   :  { %375 = vmatmul.mubr.bf16.vlgmr.msra.gmra.mrb[0].mxu0 %v30_v37 }
  0x23   :  { %598 = vmatpush3.bf16.msra.mxu0 %v641_v38  ;;  %382 = vmatprep.mubr.bf16.mxu0 %v36_v47 }
  0x24   :  { %423 = vmatmul.mubr.bf16.vlgmr.msra.gmra.mrb[0].mxu1 %v32_v44  ;;  %599 = vmatprep.subr.bf16.mxu0 %v642_v45 }
  0x25   :  { %430 = vmatprep.mubr.bf16.mxu1 %v38_v51 }
  0x27   :  { %600 = vmatpush3.bf16.msra.mxu0 %v642_v45 }
  0x28   :  { %601 = vmatprep.subr.bf16.mxu0 %v643_v49 }
  0x2a   :  { %383 = vmatmul.mubr.bf16.gmra.mrb[4].mxu0 %v35_v53 }
  0x2b   :  { %602 = vmatpush3.bf16.msra.mxu0 %v643_v49  ;;  %605 = vmatprep.mubr.msk.bf16.mxu0 %vm335_vm0, %v34_v56 }
  0x2c   :  { %431 = vmatmul.mubr.bf16.gmra.mrb[4].mxu1 %v37_v57  ;;  %603 = vmatprep.subr.bf16.mxu0 %v644_v58 }
  0x2f   :  { %604 = vmatpush3.bf16.msra.mxu0 %v644_v58 }
  0x32   :  { %606 = vmatmul.mubr.msk.bf16.vlgmr.msra.gmra.mrb[8].mxu0 %vm335_vm0, %v39_v60 }
  0xf5   :  { %v551_v61 = vpop.f32.mrb[0].mxu0 }
  0xf6   :  { %v552_v63 = vpop.f32.mrb[1].mxu0 }
  0xf7   :  { %v553_v0 = vadd.f32 %v552_v63, %v551_v61  ;;  %v554_v1 = vpop.f32.mrb[2].mxu0  ;;  %v579_v2 = vpop.f32.mrb[0].mxu1 }
  0xf8   :  { %v555_v3 = vpop.f32.mrb[3].mxu0  ;;  %v580_v4 = vpop.f32.mrb[1].mxu1 }
  0xf9   :  { %v377_v5 = vadd.f32 %v553_v0, %v496_v62  ;;  %v556_v6 = vadd.f32 %v555_v3, %v554_v1  ;;  %v581_v7 = vadd.f32 %v580_v4, %v579_v2  ;;  %v582_v8 = vpop.f32.mrb[2].mxu1 }
  0xfa   :  { %v583_v9 = vpop.f32.mrb[3].mxu1 }
  0xfb   :  { %v380_v10 = vadd.f32 %v556_v6, %v496_v62  ;;  %v584_v11 = vadd.f32 %v583_v9, %v582_v8  ;;  %v425_v12 = vadd.f32 %v581_v7, %v377_v5 }
  0xfd   :  { %v557_v13 = vpop.f32.mrb[4].mxu0  ;;  %v428_v14 = vadd.f32 %v584_v11, %v380_v10 }
  0xfe   :  { %v558_v15 = vpop.f32.mrb[5].mxu0 }
  0xff   :  { %v559_v16 = vadd.f32 %v558_v15, %v557_v13  ;;  %v560_v17 = vpop.f32.mrb[6].mxu0  ;;  %v585_v18 = vpop.f32.mrb[4].mxu1 }
 0x100   :  { %v561_v19 = vpop.f32.mrb[7].mxu0  ;;  %v586_v20 = vpop.f32.mrb[5].mxu1 }
 0x101   :  { %v385_v21 = vadd.f32 %v559_v16, %v496_v62  ;;  %v587_v22 = vadd.f32 %v586_v20, %v585_v18  ;;  %v588_v23 = vpop.f32.mrb[6].mxu1 }
 0x102   :  { %v589_v24 = vpop.f32.mrb[7].mxu1 }
 0x103   :  { %v433_v25 = vadd.f32 %v587_v22, %v385_v21 }
 0x105   :  { %v607_v26 = vpop.f32.mrb[8].mxu0 }
 0x106   :  { %v481_v27 = vadd.f32 %v607_v26, %v433_v25  ;;  %v472_v28 = vpop.f32.mrb[9].mxu0 }
 0x107   :  { %v473_v29 = vadd.f32 %v472_v28, %v425_v12  ;;  %v608_v30 = vpop.f32.mrb[10].mxu0 }
 0x108   :  { %v488_v31 = vmax.f32 %v481_v27, 0.0  ;;  %v475_v32 = vpop.f32.mrb[11].mxu0 }
 0x109   :  { %v486_v33 = vmax.f32 %v473_v29, 0.0  ;;  %v476_v34 = vadd.f32 %v475_v32, %v428_v14 }
 0x10a   :  { %491 = vst [vmem:[%s833_s3 + $0x10] sm:$0x3] %v488_v31 }
 0x10b   :  { %489 = vst [vmem:[%s833_s3] sm:$0xff] %v486_v33  ;;  %v487_v35 = vmax.f32 %v476_v34, 0.0 }
 0x10d   :  { %490 = vst [vmem:[%s833_s3 + $0x8] sm:$0xff] %v487_v35 }

// kernel: cnn_autoencoder_forward.11
= control target key start
LH: loop header
LB: loop body
LE: loop exit
PB: predicated region body
PF: predicated region fallthrough
CT: control target
= control target key end

     0   :  { %v599_v1 = vmov 0   ;;  %v70_v46 = vlaneseq  ;;  %s801_s1 = inlined_call_operand.vmem [shape: bf16[128,640], index: 1, kind: input, shape index: {}]   ;;  %s802_s0 = inlined_call_operand.vmem [shape: f32[18,128], index: 0, kind: input, shape index: {}]   ;;  %s803_s2 = inlined_call_operand.vmem [shape: f32[1,640], index: 2, kind: input, shape index: {}]   ;;  %s804_s3 = inlined_call_operand.vmem [shape: f32[18,640], index: 3, kind: output, shape index: {}]  }
   0x1   :  { %v543_v0 = vld [vmem:[%s801_s1 + $0x4] ss:$20 sps:$4 sm:$0xff]   ;;  %335 = vmatprep.mubr.bf16.mxu0 %v599_v1  ;;  %386 = vmatprep.mubr.bf16.mxu1 %v599_v1  ;;  %v545_v2 = vld [vmem:[%s801_s1] ss:$20 sps:$4 sm:$0xff]   ;;  %v548_v4 = vld [vmem:[%s801_s1 + $0x28] ss:$20 sps:$4 sm:$0xff]  }
   0x2   :  { %303 = vmatprep.subr.bf16.mxu0 %v543_v0  ;;  %v546_v3 = vld [vmem:[%s801_s1 + $0x2c] ss:$20 sps:$4 sm:$0xff]   ;;  %v549_v5 = vld [vmem:[%s801_s1 + $0x54] ss:$20 sps:$4 sm:$0xff]   ;;  %v551_v6 = vld [vmem:[%s801_s1 + $0x50] ss:$20 sps:$4 sm:$0xff]  }
   0x3   :  { %304 = vmatpush1.bf16.msra.mxu0 %v545_v2  ;;  %v552_v7 = vld [vmem:[%s801_s1 + $0x7c] ss:$20 sps:$4 sm:$0xff]   ;;  %v561_v8 = vld [vmem:[%s801_s1 + $0xc] ss:$20 sps:$4 sm:$0xff]   ;;  %v567_v11 = vld [vmem:[%s801_s1 + $0x34] ss:$20 sps:$4 sm:$0xff]  }
   0x4   :  { %305 = vmatprep.subr.bf16.mxu0 %v546_v3  ;;  %v554_v9 = vld [vmem:[%s801_s1 + $0x78] ss:$20 sps:$4 sm:$0xff]   ;;  %354 = vmatprep.subr.bf16.mxu1 %v561_v8  ;;  %v565_v10 = vld [vmem:[%s801_s1 + $0x8] ss:$20 sps:$4 sm:$0xff]   ;;  %v571_v13 = vld [vmem:[%s801_s1 + $0x30] ss:$20 sps:$4 sm:$0xff]  }
   0x5   :  { %v555_v12 = vld [vmem:[%s801_s1 + $0xa4] ss:$20 sps:$4 sm:$0xff]   ;;  %355 = vmatpush1.bf16.msra.mxu1 %v565_v10  ;;  %v557_v14 = vld [vmem:[%s801_s1 + $0xa0] ss:$20 sps:$4 sm:$0xff]   ;;  %v573_v15 = vld [vmem:[%s801_s1 + $0x5c] ss:$20 sps:$4 sm:$0xff]  }
   0x6   :  { %356 = vmatprep.subr.bf16.mxu1 %v567_v11  ;;  %v558_v16 = vld [vmem:[%s801_s1 + $0xcc] ss:$20 sps:$4 sm:$0xff]   ;;  %v577_v18 = vld [vmem:[%s801_s1 + $0x84] ss:$20 sps:$4 sm:$0xff]   ;;  %v560_v19 = vld [vmem:[%s801_s1 + $0xc8] ss:$20 sps:$4 sm:$0xff]  }
   0x7   :  { %306 = vmatpush1.bf16.msra.mxu0 %v548_v4  ;;  %v575_v17 = vld [vmem:[%s801_s1 + $0x58] ss:$20 sps:$4 sm:$0xff]   ;;  %v563_v20 = vld [vmem:[%s801_s1 + $0xf4] ss:$20 sps:$4 sm:$0xff]   ;;  %v566_v23 = vld [vmem:[%s801_s1 + $0xf0] ss:$20 sps:$4 sm:$0xff]  }
   0x8   :  { %307 = vmatprep.subr.bf16.mxu0 %v549_v5  ;;  %v579_v21 = vld [vmem:[%s801_s1 + $0x80] ss:$20 sps:$4 sm:$0xff]   ;;  %v569_v24 = vld [vmem:[%s801_s1 + $0x11c] ss:$20 sps:$4 sm:$0xff]   ;;  %v572_v26 = vld [vmem:[%s801_s1 + $0x118] ss:$20 sps:$4 sm:$0xff]  }
   0x9   :  { %357 = vmatpush1.bf16.msra.mxu1 %v571_v13  ;;  %v581_v22 = vld [vmem:[%s801_s1 + $0xac] ss:$20 sps:$4 sm:$0xff]   ;;  %v583_v25 = vld [vmem:[%s801_s1 + $0xa8] ss:$20 sps:$4 sm:$0xff]   ;;  %v576_v30 = vld [vmem:[%s801_s1 + $0x10] ss:$20 sps:$4 sm:$0xff]  }
   0xa   :  { %358 = vmatprep.subr.bf16.mxu1 %v573_v15  ;;  %v585_v27 = vld [vmem:[%s801_s1 + $0xd4] ss:$20 sps:$4 sm:$0xff]   ;;  %v15_v28 = vld [vmem:[%s802_s0] sm:$0xff]  ;;  %v589_v32 = vld [vmem:[%s801_s1 + $0xfc] ss:$20 sps:$4 sm:$0xff]   ;;  %v71_v47 = vshrl.u32 %v70_v46, 7 }
   0xb   :  { %308 = vmatpush1.bf16.msra.mxu0 %v551_v6  ;;  %v16_v29 = vld [vmem:[%s802_s0 + $0x8] sm:$0xff]  ;;  %v587_v31 = vld [vmem:[%s801_s1 + $0xd0] ss:$20 sps:$4 sm:$0xff]   ;;  %v584_v38 = vld [vmem:[%s801_s1 + $0x60] ss:$20 sps:$4 sm:$0xff]  }
   0xc   :  { %309 = vmatprep.subr.bf16.mxu0 %v552_v7  ;;  %v18_v33 = vpack.c.bf16 %v16_v29, %v15_v28  ;;  %v580_v34 = vld [vmem:[%s801_s1 + $0x38] ss:$20 sps:$4 sm:$0xff]   ;;  %v17_v37 = vld [vmem:[%s802_s0 + $0x10] sm:$0x3]  ;;  %v595_v39 = vld [vmem:[%s801_s1 + $0x120] ss:$20 sps:$4 sm:$0xff]  }
   0xd   :  { %359 = vmatpush1.bf16.msra.mxu1 %v575_v17  ;;  %v591_v35 = vld [vmem:[%s801_s1 + $0xf8] ss:$20 sps:$4 sm:$0xff]   ;;  %v19_v40 = vpack.c.bf16 %v17_v37, %v17_v37  ;;  %v588_v41 = vld [vmem:[%s801_s1 + $0x88] ss:$20 sps:$4 sm:$0xff]   ;;  %v592_v42 = vld [vmem:[%s801_s1 + $0xb0] ss:$20 sps:$4 sm:$0xff]  }
   0xe   :  { %360 = vmatprep.subr.bf16.mxu1 %v577_v18  ;;  %v593_v36 = vld [vmem:[%s801_s1 + $0x124] ss:$20 sps:$4 sm:$0xff]   ;;  %v597_v44 = vld [vmem:[%s801_s1 + $0x100] ss:$20 sps:$4 sm:$0xff]   ;;  %v598_v45 = vld [vmem:[%s801_s1 + $0x128] ss:$20 sps:$4 sm:$0xff]  }
   0xf   :  { %310 = vmatpush1.bf16.msra.mxu0 %v554_v9  ;;  %v596_v43 = vld [vmem:[%s801_s1 + $0xd8] ss:$20 sps:$4 sm:$0xff]   ;;  %v72_v48 = vsub.s32 0, %v71_v47  ;;  %v68_v49 = vld [vmem:[%s803_s2] sm:$0x1f]  ;;  %v76_v50 = vsub.s32 1, %v71_v47 }
  0x10   :  { %311 = vmatprep.subr.bf16.mxu0 %v555_v12  ;;  %v80_v58 = vsub.s32 2, %v71_v47  ;;  %v84_v61 = vsub.s32 3, %v71_v47 }
  0x11   :  { %361 = vmatpush1.bf16.msra.mxu1 %v579_v21  ;;  %v73_v51 = vrot.slane %v68_v49, %v72_v48  ;;  %v77_v52 = vrot.slane %v68_v49, %v76_v50  ;;  %v88_v21 = vsub.s32 4, %v71_v47 }
  0x12   :  { %362 = vmatprep.subr.bf16.mxu1 %v581_v22  ;;  %v81_v63 = vrot.slane %v68_v49, %v80_v58  ;;  %v85_v0 = vrot.slane %v68_v49, %v84_v61 }
  0x13   :  { %312 = vmatpush1.bf16.msra.mxu0 %v557_v14  ;;  %v89_v22 = vrot.slane %v68_v49, %v88_v21 }
  0x14   :  { %313 = vmatprep.subr.bf16.mxu0 %v558_v16 }
  0x15   :  { %363 = vmatpush1.bf16.msra.mxu1 %v583_v25 }
  0x16   :  { %364 = vmatprep.subr.bf16.mxu1 %v585_v27 }
  0x17   :  { %314 = vmatpush1.bf16.msra.mxu0 %v560_v19 }
  0x18   :  { %315 = vmatprep.subr.bf16.mxu0 %v563_v20 }
  0x19   :  { %365 = vmatpush1.bf16.msra.mxu1 %v587_v31 }
  0x1a   :  { %366 = vmatprep.subr.bf16.mxu1 %v589_v32 }
  0x1b   :  { %316 = vmatpush1.bf16.msra.mxu0 %v566_v23 }
  0x1c   :  { %317 = vmatprep.subr.bf16.mxu0 %v569_v24 }
  0x1d   :  { %367 = vmatpush1.bf16.msra.mxu1 %v591_v35 }
  0x1e   :  { %368 = vmatprep.subr.bf16.mxu1 %v593_v36 }
  0x1f   :  { %318 = vmatpush1.bf16.msra.mxu0 %v572_v26 }
  0x20   :  { %522 = vmatprep.subr.bf16.mxu0 %v576_v30 }
  0x21   :  { %369 = vmatpush1.bf16.msra.mxu1 %v595_v39 }
  0x22   :  { %336 = vmatmul.mubr.bf16.vlgmr.msra.gmra.mrb[0].mxu0 %v18_v33 }
  0x23   :  { %523 = vmatpush3.bf16.msra.mxu0 %v576_v30  ;;  %345 = vmatprep.mubr.bf16.mxu0 %v599_v1 }
  0x24   :  { %524 = vmatprep.subr.bf16.mxu0 %v580_v34  ;;  %387 = vmatmul.mubr.bf16.vlgmr.msra.gmra.mrb[0].mxu1 %v18_v33 }
  0x25   :  { %396 = vmatprep.mubr.bf16.mxu1 %v599_v1 }
  0x27   :  { %525 = vmatpush3.bf16.msra.mxu0 %v580_v34 }
  0x28   :  { %526 = vmatprep.subr.bf16.mxu0 %v584_v38 }
  0x2a   :  { %346 = vmatmul.mubr.bf16.gmra.mrb[4].mxu0 %v19_v40 }
  0x2b   :  { %527 = vmatpush3.bf16.msra.mxu0 %v584_v38  ;;  %538 = vmatprep.mubr.bf16.mxu0 %v18_v33 }
  0x2c   :  { %528 = vmatprep.subr.bf16.mxu0 %v588_v41  ;;  %397 = vmatmul.mubr.bf16.gmra.mrb[4].mxu1 %v19_v40 }
  0x2f   :  { %529 = vmatpush3.bf16.msra.mxu0 %v588_v41 }
  0x30   :  { %530 = vmatprep.subr.bf16.mxu0 %v592_v42 }
  0x33   :  { %531 = vmatpush3.bf16.msra.mxu0 %v592_v42 }
  0x34   :  { %532 = vmatprep.subr.bf16.mxu0 %v596_v43 }
  0x37   :  { %533 = vmatpush3.bf16.msra.mxu0 %v596_v43 }
  0x38   :  { %534 = vmatprep.subr.bf16.mxu0 %v597_v44 }
  0x3b   :  { %535 = vmatpush3.bf16.msra.mxu0 %v597_v44 }
  0x3c   :  { %536 = vmatprep.subr.bf16.mxu0 %v598_v45 }
  0x3f   :  { %537 = vmatpush3.bf16.msra.mxu0 %v598_v45 }
  0x42   :  { %539 = vmatmul.mubr.bf16.vlgmr.msra.gmra.mrb[8].mxu0 %v19_v40 }
  0xf5   :  { %v337_v53 = vpop.f32.mrb[0].mxu0 }
  0xf6   :  { %v338_v54 = vadd.f32 %v337_v53, %v73_v51  ;;  %v339_v55 = vpop.f32.mrb[1].mxu0 }
  0xf7   :  { %v340_v56 = vadd.f32 %v339_v55, %v77_v52  ;;  %v341_v57 = vpop.f32.mrb[2].mxu0  ;;  %v388_v4 = vpop.f32.mrb[0].mxu1 }
  0xf8   :  { %453 = vst [vmem:[%s804_s3] sm:$0xff] %v338_v54  ;;  %v342_v59 = vadd.f32 %v341_v57, %v73_v51  ;;  %v343_v60 = vpop.f32.mrb[3].mxu0  ;;  %v389_v7 = vadd.f32 %v388_v4, %v81_v63  ;;  %v390_v8 = vpop.f32.mrb[1].mxu1 }
  0xf9   :  { %454 = vst [vmem:[%s804_s3 + $0x8] sm:$0xff] %v340_v56  ;;  %v344_v62 = vadd.f32 %v343_v60, %v77_v52  ;;  %v391_v10 = vadd.f32 %v390_v8, %v85_v0  ;;  %v392_v11 = vpop.f32.mrb[2].mxu1 }
  0xfa   :  { %458 = vst [vmem:[%s804_s3 + $0x28] sm:$0xff] %v342_v59  ;;  %455 = vst [vmem:[%s804_s3 + $0x10] sm:$0xff] %v389_v7  ;;  %v393_v12 = vadd.f32 %v392_v11, %v81_v63  ;;  %v394_v13 = vpop.f32.mrb[3].mxu1 }
  0xfb   :  { %459 = vst [vmem:[%s804_s3 + $0x30] sm:$0xff] %v344_v62  ;;  %456 = vst [vmem:[%s804_s3 + $0x18] sm:$0xff] %v391_v10  ;;  %v395_v14 = vadd.f32 %v394_v13, %v85_v0 }
  0xfc   :  { %460 = vst [vmem:[%s804_s3 + $0x38] sm:$0xff] %v393_v12 }
  0xfd   :  { %v347_v1 = vpop.f32.mrb[4].mxu0  ;;  %461 = vst [vmem:[%s804_s3 + $0x40] sm:$0xff] %v395_v14 }
  0xfe   :  { %v348_v2 = vadd.f32 %v347_v1, %v73_v51  ;;  %v349_v3 = vpop.f32.mrb[5].mxu0 }
  0xff   :  { %v350_v5 = vadd.f32 %v349_v3, %v77_v52  ;;  %v351_v6 = vpop.f32.mrb[6].mxu0  ;;  %v398_v15 = vpop.f32.mrb[4].mxu1 }
 0x100   :  { %463 = vst [vmem:[%s804_s3 + $0x50] sm:$0x3] %v348_v2  ;;  %v352_v9 = vpop.f32.mrb[7].mxu0  ;;  %v399_v16 = vadd.f32 %v398_v15, %v81_v63  ;;  %v400_v17 = vpop.f32.mrb[5].mxu1 }
 0x101   :  { %464 = vst [vmem:[%s804_s3 + $0x58] sm:$0x3] %v350_v5  ;;  %v401_v18 = vadd.f32 %v400_v17, %v85_v0  ;;  %v402_v19 = vpop.f32.mrb[6].mxu1 }
 0x102   :  { %465 = vst [vmem:[%s804_s3 + $0x60] sm:$0x3] %v399_v16  ;;  %v403_v20 = vpop.f32.mrb[7].mxu1 }
 0x103   :  { %466 = vst [vmem:[%s804_s3 + $0x68] sm:$0x3] %v401_v18 }
 0x115   :  { %v540_v23 = vpop.f32.mrb[8].mxu0 }
 0x116   :  { %v448_v24 = vadd.f32 %v540_v23, %v89_v22  ;;  %v439_v25 = vpop.f32.mrb[9].mxu0 }
 0x117   :  { %v440_v26 = vadd.f32 %v439_v25, %v89_v22  ;;  %v541_v27 = vpop.f32.mrb[10].mxu0 }
 0x118   :  { %467 = vst [vmem:[%s804_s3 + $0x70] sm:$0x3] %v448_v24  ;;  %v442_v28 = vpop.f32.mrb[11].mxu0 }
 0x119   :  { %457 = vst [vmem:[%s804_s3 + $0x20] sm:$0xff] %v440_v26  ;;  %v443_v29 = vadd.f32 %v442_v28, %v89_v22 }
 0x11b   :  { %462 = vst [vmem:[%s804_s3 + $0x48] sm:$0xff] %v443_v29 }

// kernel: cnn_autoencoder_forward.10
= control target key start
LH: loop header
LB: loop body
LE: loop exit
PB: predicated region body
PF: predicated region fallthrough
CT: control target
= control target key end

     0   :  { %v2117_v21 = vmov 1983009808   ;;  %v31_v23 = vlaneseq  ;;  %vm2119_vm0 = vmmov 0   ;;  %s2658_s1 = inlined_call_operand.vmem [shape: bf16[1152,128], index: 1, kind: input, shape index: {}]   ;;  %s2659_s0 = inlined_call_operand.vmem [shape: f32[2,1152], index: 0, kind: input, shape index: {}]   ;;  %s2660_s3 = inlined_call_operand.vmem [shape: bf16[128,1152], index: 3, kind: input, shape index: {}]   ;;  %s2661_s2 = inlined_call_operand.vmem [shape: f32[1,128], index: 2, kind: input, shape index: {}]   ;;  %s2662_s4 = inlined_call_operand.vmem [shape: f32[1,1152], index: 4, kind: input, shape index: {}]   ;;  %s2663_s5 = inlined_call_operand.vmem [shape: f32[2,1152], index: 5, kind: output, shape index: {}]  }
   0x1   :  { %v1939_v0 = vld [vmem:[%s2658_s1 + $0x40] sm:$0xff]   ;;  %v1943_v4 = vld [vmem:[%s2658_s1 + $0x48] sm:$0xff]   ;;  %v1947_v8 = vld [vmem:[%s2658_s1 + $0x50] sm:$0xff]   ;;  %v29_v22 = vunpack.c.l.s4 %v2117_v21 }
   0x2   :  { %v1940_v1 = vld [vmem:[%s2658_s1] sm:$0xff]   ;;  %1789 = vmatprep.subr.bf16.mxu0 %v1939_v0  ;;  %v1944_v5 = vld [vmem:[%s2658_s1 + $0x8] sm:$0xff]   ;;  %v1948_v9 = vld [vmem:[%s2658_s1 + $0x10] sm:$0xff]   ;;  %v2226_v29 = vshrl.u32 %v31_v23, 7 }
   0x3   :  { %v1941_v2 = vld [vmem:[%s2658_s1 + $0xc0] sm:$0xff]   ;;  %1790 = vmatpush3.bf16.msra.mxu0 %v1940_v1  ;;  %v1945_v6 = vld [vmem:[%s2658_s1 + $0xc8] sm:$0xff]   ;;  %v1949_v10 = vld [vmem:[%s2658_s1 + $0xd0] sm:$0xff]   ;;  %v30_v28 = vunpack.c.0.s8 %v29_v22 }
   0x4   :  { %v1942_v3 = vld [vmem:[%s2658_s1 + $0x80] sm:$0xff]   ;;  %1811 = vmatprep.subr.bf16.mxu1 %v1941_v2  ;;  %1791 = vmatprep.subr.bf16.mxu0 %v1943_v4  ;;  %v1946_v7 = vld [vmem:[%s2658_s1 + $0x88] sm:$0xff]   ;;  %v1950_v11 = vld [vmem:[%s2658_s1 + $0x90] sm:$0xff]  }
   0x5   :  { %1812 = vmatpush3.bf16.msra.mxu1 %v1942_v3  ;;  %v1951_v12 = vld [vmem:[%s2658_s1 + $0x58] sm:$0xff]   ;;  %v1955_v16 = vld [vmem:[%s2658_s1 + $0x60] sm:$0xff]   ;;  %v1959_v20 = vld [vmem:[%s2658_s1 + $0x68] sm:$0xff]   ;;  %v2241_v34 = vsub.s32 %v30_v28, %v2226_v29 }
   0x6   :  { %1813 = vmatprep.subr.bf16.mxu1 %v1945_v6  ;;  %v1952_v13 = vld [vmem:[%s2658_s1 + $0x18] sm:$0xff]   ;;  %v1956_v17 = vld [vmem:[%s2658_s1 + $0x20] sm:$0xff]   ;;  %v1960_v24 = vld [vmem:[%s2658_s1 + $0x28] sm:$0xff]  }
   0x7   :  { %1792 = vmatpush3.bf16.msra.mxu0 %v1944_v5  ;;  %v1953_v14 = vld [vmem:[%s2658_s1 + $0xd8] sm:$0xff]   ;;  %v1957_v18 = vld [vmem:[%s2658_s1 + $0xe0] sm:$0xff]   ;;  %v1961_v25 = vld [vmem:[%s2658_s1 + $0xe8] sm:$0xff]  }
   0x8   :  { %1793 = vmatprep.subr.bf16.mxu0 %v1947_v8  ;;  %v1954_v15 = vld [vmem:[%s2658_s1 + $0x98] sm:$0xff]   ;;  %v1958_v19 = vld [vmem:[%s2658_s1 + $0xa0] sm:$0xff]   ;;  %v1962_v26 = vld [vmem:[%s2658_s1 + $0xa8] sm:$0xff]  }
   0x9   :  { %1814 = vmatpush3.bf16.msra.mxu1 %v1946_v7  ;;  %v1963_v27 = vld [vmem:[%s2658_s1 + $0x70] sm:$0xff]   ;;  %v1967_v33 = vld [vmem:[%s2658_s1 + $0x78] sm:$0xff]   ;;  %v21_v37 = vld [vmem:[%s2659_s0] sm:$0xff] }
   0xa   :  { %1815 = vmatprep.subr.bf16.mxu1 %v1949_v10  ;;  %v1964_v30 = vld [vmem:[%s2658_s1 + $0x30] sm:$0xff]   ;;  %v1968_v35 = vld [vmem:[%s2658_s1 + $0x38] sm:$0xff]   ;;  %v34_v38 = vrot.slane %v21_v37, %v2241_v34  ;;  %v27_v40 = vcombine.high %v21_v37, %v21_v37  ;;  %v1971_v41 = vld [vmem:[%s2658_s1 + $0x140] sm:$0xff]  }
   0xb   :  { %1794 = vmatpush3.bf16.msra.mxu0 %v1948_v9  ;;  %v1965_v31 = vld [vmem:[%s2658_s1 + $0xf0] sm:$0xff]   ;;  %v1969_v36 = vld [vmem:[%s2658_s1 + $0xf8] sm:$0xff]   ;;  %v1974_v45 = vld [vmem:[%s2658_s1 + $0x1c0] sm:$0xff]  }
   0xc   :  { %1795 = vmatprep.subr.bf16.mxu0 %v1951_v12  ;;  %v1966_v32 = vld [vmem:[%s2658_s1 + $0xb0] sm:$0xff]   ;;  %v1970_v39 = vld [vmem:[%s2658_s1 + $0xb8] sm:$0xff]   ;;  %v42_v42 = vcombine.high %v34_v38, %v34_v38  ;;  %v41_v43 = vrot.slane %v27_v40, %v2241_v34  ;;  %v77_v44 = vpack.c.bf16 %v34_v38, %v34_v38  ;;  %v1973_v48 = vld [vmem:[%s2658_s1 + $0x100] sm:$0xff]  }
   0xd   :  { %1816 = vmatpush3.bf16.msra.mxu1 %v1950_v11  ;;  %v1976_v50 = vld [vmem:[%s2658_s1 + $0x148] sm:$0xff]   ;;  %v1975_v52 = vld [vmem:[%s2658_s1 + $0x180] sm:$0xff]   ;;  %v1980_v55 = vld [vmem:[%s2658_s1 + $0x150] sm:$0xff]  }
   0xe   :  { %1817 = vmatprep.subr.bf16.mxu1 %v1953_v14  ;;  %v78_v46 = vpack.c.bf16 %v42_v42, %v42_v42  ;;  %v43_v47 = vcombine.high %v41_v43, %v41_v43  ;;  %v79_v49 = vpack.c.bf16 %v41_v43, %v41_v43  ;;  %v1978_v53 = vld [vmem:[%s2658_s1 + $0x1c8] sm:$0xff]   ;;  %v1982_v57 = vld [vmem:[%s2658_s1 + $0x1d0] sm:$0xff]   ;;  %v1984_v59 = vld [vmem:[%s2658_s1 + $0x158] sm:$0xff]  }
   0xf   :  { %1796 = vmatpush3.bf16.msra.mxu0 %v1952_v13  ;;  %v1977_v54 = vld [vmem:[%s2658_s1 + $0x108] sm:$0xff]   ;;  %v1981_v58 = vld [vmem:[%s2658_s1 + $0x110] sm:$0xff]   ;;  %v1986_v61 = vld [vmem:[%s2658_s1 + $0x1d8] sm:$0xff]  }
  0x10   :  { %1797 = vmatprep.subr.bf16.mxu0 %v1955_v16  ;;  %701 = vmatprep.mubr.bf16.mxu0 %v78_v46  ;;  %v80_v51 = vpack.c.bf16 %v43_v47, %v43_v47  ;;  %v1979_v56 = vld [vmem:[%s2658_s1 + $0x188] sm:$0xff]   ;;  %v1983_v60 = vld [vmem:[%s2658_s1 + $0x190] sm:$0xff]   ;;  %v1985_v62 = vld [vmem:[%s2658_s1 + $0x118] sm:$0xff]  }
  0x11   :  { %1818 = vmatpush3.bf16.msra.mxu1 %v1954_v15  ;;  %v1988_v63 = vld [vmem:[%s2658_s1 + $0x160] sm:$0xff]   ;;  %v1987_v0 = vld [vmem:[%s2658_s1 + $0x198] sm:$0xff]   ;;  %v1992_v3 = vld [vmem:[%s2658_s1 + $0x168] sm:$0xff]  }
  0x12   :  { %1819 = vmatprep.subr.bf16.mxu1 %v1957_v18  ;;  %741 = vmatprep.mubr.bf16.mxu1 %v80_v51  ;;  %v1990_v1 = vld [vmem:[%s2658_s1 + $0x1e0] sm:$0xff]   ;;  %v1994_v5 = vld [vmem:[%s2658_s1 + $0x1e8] sm:$0xff]   ;;  %v1996_v7 = vld [vmem:[%s2658_s1 + $0x170] sm:$0xff]  }
  0x13   :  { %1798 = vmatpush3.bf16.msra.mxu0 %v1956_v17  ;;  %v1989_v2 = vld [vmem:[%s2658_s1 + $0x120] sm:$0xff]   ;;  %v1993_v6 = vld [vmem:[%s2658_s1 + $0x128] sm:$0xff]   ;;  %v1998_v9 = vld [vmem:[%s2658_s1 + $0x1f0] sm:$0xff]  }
  0x14   :  { %1799 = vmatprep.subr.bf16.mxu0 %v1959_v20  ;;  %v1991_v4 = vld [vmem:[%s2658_s1 + $0x1a0] sm:$0xff]   ;;  %v1995_v8 = vld [vmem:[%s2658_s1 + $0x1a8] sm:$0xff]   ;;  %v1997_v10 = vld [vmem:[%s2658_s1 + $0x130] sm:$0xff]  }
  0x15   :  { %1820 = vmatpush3.bf16.msra.mxu1 %v1958_v19  ;;  %v2000_v11 = vld [vmem:[%s2658_s1 + $0x178] sm:$0xff]   ;;  %v1999_v12 = vld [vmem:[%s2658_s1 + $0x1b0] sm:$0xff]   ;;  %v22_v14 = vld [vmem:[%s2659_s0 + $0x8] sm:$0xff] }
  0x16   :  { %1821 = vmatprep.subr.bf16.mxu1 %v1961_v25  ;;  %v2002_v13 = vld [vmem:[%s2658_s1 + $0x1f8] sm:$0xff]   ;;  %v51_v16 = vrot.slane %v22_v14, %v2241_v34  ;;  %v44_v17 = vcombine.high %v22_v14, %v22_v14  ;;  %v2118_v25 = vmov 0.0   ;;  %v2006_v28 = vld [vmem:[%s2658_s1 + $0x208] sm:$0xff]  }
  0x17   :  { %1800 = vmatpush3.bf16.msra.mxu0 %v1960_v24  ;;  %v2001_v15 = vld [vmem:[%s2658_s1 + $0x138] sm:$0xff]   ;;  %v2005_v24 = vld [vmem:[%s2658_s1 + $0x200] sm:$0xff]   ;;  %v1641_v37 = vld.sshfl [vmem:[%s2659_s0 + $0x10] sm:$0x3 pattern:$0x76325410] }
  0x18   :  { %1801 = vmatprep.subr.bf16.mxu0 %v1963_v27  ;;  %v59_v18 = vcombine.high %v51_v16, %v51_v16  ;;  %v2003_v19 = vld [vmem:[%s2658_s1 + $0x1b8] sm:$0xff]   ;;  %v58_v20 = vrot.slane %v44_v17, %v2241_v34  ;;  %v81_v21 = vpack.c.bf16 %v51_v16, %v51_v16  ;;  %v85_v38 = vpack.c.bf16 %v1641_v37, %v1641_v37  ;;  %v2015_v40 = vld [vmem:[%s2660_s3 + $0x4] ss:$36 sps:$4 sm:$0xff]   ;;  %v2018_v42 = vld [vmem:[%s2660_s3 + $0xc] ss:$36 sps:$4 sm:$0xff]  }
  0x19   :  { %1822 = vmatpush3.bf16.msra.mxu1 %v1962_v26  ;;  %v2019_v43 = vld [vmem:[%s2660_s3 + $0x48] ss:$36 sps:$4 sm:$0xff]   ;;  %v2024_v46 = vld [vmem:[%s2660_s3 + $0x54] ss:$36 sps:$4 sm:$0xff]   ;;  %v2033_v51 = vld [vmem:[%s2660_s3 + $0xdc] ss:$36 sps:$4 sm:$0xff]  }
  0x1a   :  { %1823 = vmatprep.subr.bf16.mxu1 %v1965_v31  ;;  %v82_v22 = vpack.c.bf16 %v59_v18, %v59_v18  ;;  %v60_v23 = vcombine.high %v58_v20, %v58_v20  ;;  %v83_v26 = vpack.c.bf16 %v58_v20, %v58_v20  ;;  %v2008_v31 = vld [vmem:[%s2658_s1 + $0x218] sm:$0xff]  }
  0x1b   :  { %1802 = vmatpush3.bf16.msra.mxu0 %v1964_v30  ;;  %v2007_v30 = vld [vmem:[%s2658_s1 + $0x210] sm:$0xff]  }
  0x1c   :  { %1803 = vmatprep.subr.bf16.mxu0 %v1967_v33  ;;  %v84_v27 = vpack.c.bf16 %v60_v23, %v60_v23  ;;  %v2010_v33 = vld [vmem:[%s2658_s1 + $0x228] sm:$0xff]   ;;  %v2027_v47 = vld [vmem:[%s2660_s3 + $0x94] ss:$36 sps:$4 sm:$0xff]  }
  0x1d   :  { %1824 = vmatpush3.bf16.msra.mxu1 %v1966_v32  ;;  %v2009_v32 = vld [vmem:[%s2658_s1 + $0x220] sm:$0xff]  }
  0x1e   :  { %1825 = vmatprep.subr.bf16.mxu1 %v1969_v36  ;;  %v2012_v36 = vld [vmem:[%s2658_s1 + $0x238] sm:$0xff]  }
  0x1f   :  { %1804 = vmatpush3.bf16.msra.mxu0 %v1968_v35  ;;  %v2011_v35 = vld [vmem:[%s2658_s1 + $0x230] sm:$0xff]  }
  0x20   :  { %1833 = vmatprep.subr.bf16.mxu0 %v1971_v41  ;;  %v2016_v41 = vld [vmem:[%s2660_s3 + $0x8] ss:$36 sps:$4 sm:$0xff]  }
  0x21   :  { %1826 = vmatpush3.bf16.msra.mxu1 %v1970_v39  ;;  %v2013_v39 = vld [vmem:[%s2660_s3] ss:$36 sps:$4 sm:$0xff]  }
  0x22   :  { %1855 = vmatprep.subr.bf16.mxu1 %v1974_v45  ;;  %702 = vmatmul.mubr.bf16.vlgmr.msra.gmra.mrb[0].mxu0 %v77_v44  ;;  %v2021_v44 = vld [vmem:[%s2660_s3 + $0x4c] ss:$36 sps:$4 sm:$0xff]  }
  0x23   :  { %1834 = vmatpush3.bf16.msra.mxu0 %v1973_v48  ;;  %781 = vmatprep.mubr.bf16.mxu0 %v82_v22  ;;  %v2022_v45 = vld [vmem:[%s2660_s3 + $0x50] ss:$36 sps:$4 sm:$0xff]  }
  0x24   :  { %742 = vmatmul.mubr.bf16.vlgmr.msra.gmra.mrb[0].mxu1 %v79_v49  ;;  %1835 = vmatprep.subr.bf16.mxu0 %v1976_v50  ;;  %v2025_v48 = vld [vmem:[%s2660_s3 + $0x90] ss:$36 sps:$4 sm:$0xff]   ;;  %v2030_v49 = vld [vmem:[%s2660_s3 + $0x9c] ss:$36 sps:$4 sm:$0xff]  }
  0x25   :  { %1856 = vmatpush3.bf16.msra.mxu1 %v1975_v52  ;;  %821 = vmatprep.mubr.bf16.mxu1 %v84_v27  ;;  %v2028_v50 = vld [vmem:[%s2660_s3 + $0x98] ss:$36 sps:$4 sm:$0xff]   ;;  %v2036_v52 = vld [vmem:[%s2660_s3 + $0xe4] ss:$36 sps:$4 sm:$0xff]  }
  0x26   :  { %1857 = vmatprep.subr.bf16.mxu1 %v1978_v53  ;;  %v2031_v53 = vld [vmem:[%s2660_s3 + $0xd8] ss:$36 sps:$4 sm:$0xff]  }
  0x27   :  { %1836 = vmatpush3.bf16.msra.mxu0 %v1977_v54  ;;  %v2034_v54 = vld [vmem:[%s2660_s3 + $0xe0] ss:$36 sps:$4 sm:$0xff]  }
  0x28   :  { %1837 = vmatprep.subr.bf16.mxu0 %v1980_v55  ;;  %v2039_v55 = vld [vmem:[%s2660_s3 + $0x124] ss:$36 sps:$4 sm:$0xff]  }
  0x29   :  { %1858 = vmatpush3.bf16.msra.mxu1 %v1979_v56  ;;  %v2042_v56 = vld [vmem:[%s2660_s3 + $0x12c] ss:$36 sps:$4 sm:$0xff]  }
  0x2a   :  { %1859 = vmatprep.subr.bf16.mxu1 %v1982_v57  ;;  %v2037_v57 = vld [vmem:[%s2660_s3 + $0x120] ss:$36 sps:$4 sm:$0xff]  }
  0x2b   :  { %1838 = vmatpush3.bf16.msra.mxu0 %v1981_v58  ;;  %v2040_v58 = vld [vmem:[%s2660_s3 + $0x128] ss:$36 sps:$4 sm:$0xff]  }
  0x2c   :  { %1839 = vmatprep.subr.bf16.mxu0 %v1984_v59  ;;  %v2045_v59 = vld [vmem:[%s2660_s3 + $0x16c] ss:$36 sps:$4 sm:$0xff]  }
  0x2d   :  { %1860 = vmatpush3.bf16.msra.mxu1 %v1983_v60  ;;  %v2043_v60 = vld [vmem:[%s2660_s3 + $0x168] ss:$36 sps:$4 sm:$0xff]  }
  0x2e   :  { %1861 = vmatprep.subr.bf16.mxu1 %v1986_v61  ;;  %v2048_v61 = vld [vmem:[%s2660_s3 + $0x174] ss:$36 sps:$4 sm:$0xff]  }
  0x2f   :  { %1840 = vmatpush3.bf16.msra.mxu0 %v1985_v62  ;;  %v2046_v62 = vld [vmem:[%s2660_s3 + $0x170] ss:$36 sps:$4 sm:$0xff]  }
  0x30   :  { %1841 = vmatprep.subr.bf16.mxu0 %v1988_v63  ;;  %v2051_v63 = vld [vmem:[%s2660_s3 + $0x1b4] ss:$36 sps:$4 sm:$0xff]  }
  0x31   :  { %1862 = vmatpush3.bf16.msra.mxu1 %v1987_v0  ;;  %v2054_v0 = vld [vmem:[%s2660_s3 + $0x1bc] ss:$36 sps:$4 sm:$0xff]  }
  0x32   :  { %1863 = vmatprep.subr.bf16.mxu1 %v1990_v1  ;;  %v2049_v1 = vld [vmem:[%s2660_s3 + $0x1b0] ss:$36 sps:$4 sm:$0xff]  }
  0x33   :  { %1842 = vmatpush3.bf16.msra.mxu0 %v1989_v2  ;;  %v2052_v2 = vld [vmem:[%s2660_s3 + $0x1b8] ss:$36 sps:$4 sm:$0xff]  }
  0x34   :  { %1843 = vmatprep.subr.bf16.mxu0 %v1992_v3  ;;  %v2057_v3 = vld [vmem:[%s2660_s3 + $0x1fc] ss:$36 sps:$4 sm:$0xff]  }
  0x35   :  { %1864 = vmatpush3.bf16.msra.mxu1 %v1991_v4  ;;  %v2060_v4 = vld [vmem:[%s2660_s3 + $0x204] ss:$36 sps:$4 sm:$0xff]  }
  0x36   :  { %1865 = vmatprep.subr.bf16.mxu1 %v1994_v5  ;;  %v2055_v5 = vld [vmem:[%s2660_s3 + $0x1f8] ss:$36 sps:$4 sm:$0xff]  }
  0x37   :  { %1844 = vmatpush3.bf16.msra.mxu0 %v1993_v6  ;;  %v2058_v6 = vld [vmem:[%s2660_s3 + $0x200] ss:$36 sps:$4 sm:$0xff]  }
  0x38   :  { %1845 = vmatprep.subr.bf16.mxu0 %v1996_v7  ;;  %v2063_v7 = vld [vmem:[%s2660_s3 + $0x14] ss:$36 sps:$4 sm:$0xff]  }
  0x39   :  { %1866 = vmatpush3.bf16.msra.mxu1 %v1995_v8  ;;  %v2066_v8 = vld [vmem:[%s2660_s3 + $0x1c] ss:$36 sps:$4 sm:$0xff]  }
  0x3a   :  { %1867 = vmatprep.subr.bf16.mxu1 %v1998_v9  ;;  %v2120_v9 = vmov 0  }
  0x3b   :  { %1846 = vmatpush3.bf16.msra.mxu0 %v1997_v10 }
  0x3c   :  { %1847 = vmatprep.subr.bf16.mxu0 %v2000_v11  ;;  %v1642_v11 = vld [vmem:[%s2661_s2] ss:$0 sm:$0xff] }
  0x3d   :  { %1868 = vmatpush3.bf16.msra.mxu1 %v1999_v12 }
  0x3e   :  { %1869 = vmatprep.subr.bf16.mxu1 %v2002_v13 }
  0x3f   :  { %1848 = vmatpush3.bf16.msra.mxu0 %v2001_v15 }
  0x40   :  { %1895 = vmatprep.subr.bf16.mxu0 %v2118_v25 }
  0x41   :  { %1870 = vmatpush3.bf16.msra.mxu1 %v2003_v19 }
  0x42   :  { %782 = vmatmul.mubr.bf16.vlgmr.msra.gmra.mrb[4].mxu0 %v81_v21  ;;  %1368 = vmatprep.subr.bf16.mxu1 %v2015_v40 }
  0x43   :  { %1896 = vmatpush3.bf16.msra.mxu0 %v2005_v24  ;;  %1911 = vmatprep.mubr.msk.bf16.mxu0 %vm2119_vm0, %v2118_v25 }
  0x44   :  { %822 = vmatmul.mubr.bf16.vlgmr.msra.gmra.mrb[4].mxu1 %v83_v26  ;;  %1897 = vmatprep.subr.bf16.mxu0 %v2118_v25 }
  0x45   :  { %1369 = vmatpush1.bf16.msra.mxu1 %v2013_v39  ;;  %1400 = vmatprep.mubr.bf16.mxu1 %v2120_v9 }
  0x46   :  { %1370 = vmatprep.subr.bf16.mxu1 %v2021_v44  ;;  %v2061_v44 = vld [vmem:[%s2660_s3 + $0x10] ss:$36 sps:$4 sm:$0xff]  }
  0x47   :  { %1898 = vmatpush3.bf16.msra.mxu0 %v2006_v28 }
  0x48   :  { %1899 = vmatprep.subr.bf16.mxu0 %v2118_v25 }
  0x49   :  { %1371 = vmatpush1.bf16.msra.mxu1 %v2019_v43 }
  0x4a   :  { %1372 = vmatprep.subr.bf16.mxu1 %v2027_v47  ;;  %v2069_v47 = vld [vmem:[%s2660_s3 + $0x5c] ss:$36 sps:$4 sm:$0xff]  }
  0x4b   :  { %1900 = vmatpush3.bf16.msra.mxu0 %v2007_v30 }
  0x4c   :  { %1901 = vmatprep.subr.bf16.mxu0 %v2118_v25 }
  0x4d   :  { %1373 = vmatpush1.bf16.msra.mxu1 %v2025_v48  ;;  %v2072_v48 = vld [vmem:[%s2660_s3 + $0x64] ss:$36 sps:$4 sm:$0xff]  }
  0x4e   :  { %1374 = vmatprep.subr.bf16.mxu1 %v2033_v51  ;;  %v2075_v51 = vld [vmem:[%s2660_s3 + $0xa4] ss:$36 sps:$4 sm:$0xff]  }
  0x4f   :  { %1902 = vmatpush3.bf16.msra.mxu0 %v2008_v31 }
  0x50   :  { %1903 = vmatprep.subr.bf16.mxu0 %v2118_v25 }
  0x51   :  { %1375 = vmatpush1.bf16.msra.mxu1 %v2031_v53  ;;  %v2073_v53 = vld [vmem:[%s2660_s3 + $0xa0] ss:$36 sps:$4 sm:$0xff]  }
  0x52   :  { %1376 = vmatprep.subr.bf16.mxu1 %v2039_v55  ;;  %v2081_v55 = vld [vmem:[%s2660_s3 + $0xec] ss:$36 sps:$4 sm:$0xff]  }
  0x53   :  { %1904 = vmatpush3.bf16.msra.mxu0 %v2009_v32 }
  0x54   :  { %1905 = vmatprep.subr.bf16.mxu0 %v2118_v25 }
  0x55   :  { %1377 = vmatpush1.bf16.msra.mxu1 %v2037_v57  ;;  %v2079_v57 = vld [vmem:[%s2660_s3 + $0xe8] ss:$36 sps:$4 sm:$0xff]  }
  0x56   :  { %1378 = vmatprep.subr.bf16.mxu1 %v2045_v59  ;;  %v2087_v59 = vld [vmem:[%s2660_s3 + $0x134] ss:$36 sps:$4 sm:$0xff]  }
  0x57   :  { %1906 = vmatpush3.bf16.msra.mxu0 %v2010_v33 }
  0x58   :  { %1907 = vmatprep.subr.bf16.mxu0 %v2118_v25 }
  0x59   :  { %1379 = vmatpush1.bf16.msra.mxu1 %v2043_v60  ;;  %v2090_v60 = vld [vmem:[%s2660_s3 + $0x13c] ss:$36 sps:$4 sm:$0xff]  }
  0x5a   :  { %1380 = vmatprep.subr.bf16.mxu1 %v2051_v63  ;;  %v2093_v63 = vld [vmem:[%s2660_s3 + $0x17c] ss:$36 sps:$4 sm:$0xff]  }
  0x5b   :  { %1908 = vmatpush3.bf16.msra.mxu0 %v2011_v35 }
  0x5c   :  { %1909 = vmatprep.subr.bf16.mxu0 %v2118_v25 }
  0x5d   :  { %1381 = vmatpush1.bf16.msra.mxu1 %v2049_v1  ;;  %v2091_v1 = vld [vmem:[%s2660_s3 + $0x178] ss:$36 sps:$4 sm:$0xff]  }
  0x5e   :  { %1382 = vmatprep.subr.bf16.mxu1 %v2057_v3  ;;  %v2099_v3 = vld [vmem:[%s2660_s3 + $0x1c4] ss:$36 sps:$4 sm:$0xff]  }
  0x5f   :  { %1910 = vmatpush3.bf16.msra.mxu0 %v2012_v36 }
  0x60   :  { %1409 = vmatprep.subr.bf16.mxu0 %v2018_v42 }
  0x61   :  { %1383 = vmatpush1.bf16.msra.mxu1 %v2055_v5  ;;  %v2097_v5 = vld [vmem:[%s2660_s3 + $0x1c0] ss:$36 sps:$4 sm:$0xff]  }
  0x62   :  { %1912 = vmatmul.mubr.bf16.vlgmr.msra.gmra.mrb[8].mxu0 %v85_v38  ;;  %1450 = vmatprep.subr.bf16.mxu1 %v2063_v7  ;;  %v2105_v7 = vld [vmem:[%s2660_s3 + $0x20c] ss:$36 sps:$4 sm:$0xff]  }
  0x63   :  { %1410 = vmatpush1.bf16.msra.mxu0 %v2016_v41  ;;  %1441 = vmatprep.mubr.bf16.mxu0 %v2120_v9 }
  0x64   :  { %1411 = vmatprep.subr.bf16.mxu0 %v2024_v46 }
  0x67   :  { %1412 = vmatpush1.bf16.msra.mxu0 %v2022_v45  ;;  %v2064_v45 = vld [vmem:[%s2660_s3 + $0x18] ss:$36 sps:$4 sm:$0xff]  }
  0x68   :  { %1413 = vmatprep.subr.bf16.mxu0 %v2030_v49  ;;  %v2067_v49 = vld [vmem:[%s2660_s3 + $0x58] ss:$36 sps:$4 sm:$0xff]  }
  0x6b   :  { %1414 = vmatpush1.bf16.msra.mxu0 %v2028_v50  ;;  %v2070_v50 = vld [vmem:[%s2660_s3 + $0x60] ss:$36 sps:$4 sm:$0xff]  }
  0x6c   :  { %1415 = vmatprep.subr.bf16.mxu0 %v2036_v52  ;;  %v2078_v52 = vld [vmem:[%s2660_s3 + $0xac] ss:$36 sps:$4 sm:$0xff]  }
  0x6f   :  { %1416 = vmatpush1.bf16.msra.mxu0 %v2034_v54  ;;  %v2076_v54 = vld [vmem:[%s2660_s3 + $0xa8] ss:$36 sps:$4 sm:$0xff]  }
  0x70   :  { %1417 = vmatprep.subr.bf16.mxu0 %v2042_v56  ;;  %v2084_v56 = vld [vmem:[%s2660_s3 + $0xf4] ss:$36 sps:$4 sm:$0xff]  }
  0x73   :  { %1418 = vmatpush1.bf16.msra.mxu0 %v2040_v58  ;;  %v2082_v58 = vld [vmem:[%s2660_s3 + $0xf0] ss:$36 sps:$4 sm:$0xff]  }
  0x74   :  { %1419 = vmatprep.subr.bf16.mxu0 %v2048_v61  ;;  %v2085_v61 = vld [vmem:[%s2660_s3 + $0x130] ss:$36 sps:$4 sm:$0xff]  }
  0x77   :  { %1420 = vmatpush1.bf16.msra.mxu0 %v2046_v62  ;;  %v2088_v62 = vld [vmem:[%s2660_s3 + $0x138] ss:$36 sps:$4 sm:$0xff]  }
  0x78   :  { %1421 = vmatprep.subr.bf16.mxu0 %v2054_v0  ;;  %v2096_v0 = vld [vmem:[%s2660_s3 + $0x184] ss:$36 sps:$4 sm:$0xff]  }
  0x7b   :  { %1422 = vmatpush1.bf16.msra.mxu0 %v2052_v2  ;;  %v2094_v2 = vld [vmem:[%s2660_s3 + $0x180] ss:$36 sps:$4 sm:$0xff]  }
  0x7c   :  { %1423 = vmatprep.subr.bf16.mxu0 %v2060_v4  ;;  %v2102_v4 = vld [vmem:[%s2660_s3 + $0x1cc] ss:$36 sps:$4 sm:$0xff]  }
  0x7f   :  { %1424 = vmatpush1.bf16.msra.mxu0 %v2058_v6  ;;  %v2100_v6 = vld [vmem:[%s2660_s3 + $0x1c8] ss:$36 sps:$4 sm:$0xff]  }
  0x80   :  { %1491 = vmatprep.subr.bf16.mxu0 %v2066_v8  ;;  %v2108_v8 = vld [vmem:[%s2660_s3 + $0x214] ss:$36 sps:$4 sm:$0xff]  }
  0xf5   :  { %v1805_v10 = vpop.f32.mrb[0].mxu0 }
  0xf6   :  { %v1806_v12 = vpop.f32.mrb[1].mxu0 }
  0xf7   :  { %v1807_v13 = vadd.f32 %v1806_v12, %v1805_v10  ;;  %v1808_v14 = vpop.f32.mrb[2].mxu0  ;;  %v1827_v15 = vpop.f32.mrb[0].mxu1  ;;  %v2106_v10 = vld [vmem:[%s2660_s3 + $0x210] ss:$36 sps:$4 sm:$0xff]   ;;  %v2110_v12 = vld [vmem:[%s2660_s3 + $0x68] ss:$36 sps:$4 sm:$0xff]  }
  0xf8   :  { %v1809_v16 = vpop.f32.mrb[3].mxu0  ;;  %v1828_v17 = vpop.f32.mrb[1].mxu1  ;;  %v2112_v14 = vld [vmem:[%s2660_s3 + $0xf8] ss:$36 sps:$4 sm:$0xff]  }
  0xf9   :  { %v704_v18 = vadd.f32 %v1807_v13, %v1642_v11  ;;  %v1829_v19 = vadd.f32 %v1828_v17, %v1827_v15  ;;  %v1830_v20 = vpop.f32.mrb[2].mxu1  ;;  %v2109_v11 = vld [vmem:[%s2660_s3 + $0x20] ss:$36 sps:$4 sm:$0xff]   ;;  %v2111_v13 = vld [vmem:[%s2660_s3 + $0xb0] ss:$36 sps:$4 sm:$0xff]  }
  0xfa   :  { %v1831_v21 = vpop.f32.mrb[3].mxu1  ;;  %v2113_v15 = vld [vmem:[%s2660_s3 + $0x140] ss:$36 sps:$4 sm:$0xff]   ;;  %v2114_v16 = vld [vmem:[%s2660_s3 + $0x188] ss:$36 sps:$4 sm:$0xff]   ;;  %v965_v20 = vsub.s32 2, %v2226_v29 }
  0xfb   :  { %v744_v22 = vadd.f32 %v1829_v19, %v704_v18  ;;  %v2115_v17 = vld [vmem:[%s2660_s3 + $0x1d0] ss:$36 sps:$4 sm:$0xff]   ;;  %v2116_v18 = vld [vmem:[%s2660_s3 + $0x218] ss:$36 sps:$4 sm:$0xff]   ;;  %v957_v19 = vsub.s32 0, %v2226_v29  ;;  %v951_v21 = vld [vmem:[%s2662_s4] sm:$0xff] }
 0x115   :  { %v1849_v23 = vpop.f32.mrb[4].mxu0 }
 0x116   :  { %v1850_v24 = vpop.f32.mrb[5].mxu0 }
 0x117   :  { %v1851_v26 = vadd.f32 %v1850_v24, %v1849_v23  ;;  %v1852_v27 = vpop.f32.mrb[6].mxu0  ;;  %v1871_v28 = vpop.f32.mrb[4].mxu1  ;;  %v969_v23 = vsub.s32 3, %v2226_v29  ;;  %v958_v24 = vrot.slane %v951_v21, %v957_v19 }
 0x118   :  { %v1853_v30 = vpop.f32.mrb[7].mxu0  ;;  %v1872_v31 = vpop.f32.mrb[5].mxu1 }
 0x119   :  { %v784_v32 = vadd.f32 %v1851_v26, %v744_v22  ;;  %v1873_v33 = vadd.f32 %v1872_v31, %v1871_v28  ;;  %v1874_v35 = vpop.f32.mrb[6].mxu1  ;;  %v961_v22 = vsub.s32 1, %v2226_v29  ;;  %v966_v26 = vrot.slane %v951_v21, %v965_v20 }
 0x11a   :  { %v1875_v36 = vpop.f32.mrb[7].mxu1  ;;  %v970_v28 = vrot.slane %v951_v21, %v969_v23 }
 0x11b   :  { %v824_v37 = vadd.f32 %v1873_v33, %v784_v32  ;;  %v962_v27 = vrot.slane %v951_v21, %v961_v22 }
 0x135   :  { %v863_v38 = vpop.f32.mrb[8].mxu0 }
 0x136   :  { %v864_v39 = vadd.f32 %v863_v38, %v824_v37  ;;  %v1913_v40 = vpop.f32.mrb[9].mxu0 }
 0x137   :  { %v866_v41 = vpop.f32.mrb[10].mxu0 }
 0x138   :  { %v869_v42 = vmax.f32 %v864_v39, 0.0  ;;  %v1914_v43 = vpop.f32.mrb[11].mxu0 }
 0x13a   :  { %v2506_v46 = vpack.c.bf16 %v869_v42, %v869_v42 }
 0x13c   :  { %1401 = vmatmul.mubr.bf16.vlgmr.msra.gmra.mrb[8].mxu1 %v2506_v46  ;;  %1442 = vmatmul.mubr.bf16.vlgmr.msra.gmra.mrb[12].mxu0 %v2506_v46 }
 0x13d   :  { %1451 = vmatpush1.bf16.msra.mxu1 %v2061_v44  ;;  %1492 = vmatpush1.bf16.msra.mxu0 %v2064_v45 }
 0x13e   :  { %1452 = vmatprep.subr.bf16.mxu1 %v2069_v47  ;;  %1493 = vmatprep.subr.bf16.mxu0 %v2072_v48 }
 0x13f   :  { %1482 = vmatprep.mubr.bf16.mxu1 %v2120_v9  ;;  %1523 = vmatprep.mubr.bf16.mxu0 %v2120_v9  ;;  %v2103_v9 = vld [vmem:[%s2660_s3 + $0x208] ss:$36 sps:$4 sm:$0xff]  }
 0x141   :  { %1453 = vmatpush1.bf16.msra.mxu1 %v2067_v49  ;;  %1494 = vmatpush1.bf16.msra.mxu0 %v2070_v50 }
 0x142   :  { %1454 = vmatprep.subr.bf16.mxu1 %v2075_v51  ;;  %1495 = vmatprep.subr.bf16.mxu0 %v2078_v52  ;;  %v973_v51 = vsub.s32 4, %v2226_v29  ;;  %v981_v52 = vsub.s32 6, %v2226_v29 }
 0x145   :  { %1455 = vmatpush1.bf16.msra.mxu1 %v2073_v53  ;;  %1496 = vmatpush1.bf16.msra.mxu0 %v2076_v54  ;;  %v977_v53 = vsub.s32 5, %v2226_v29  ;;  %v985_v54 = vsub.s32 7, %v2226_v29 }
 0x146   :  { %1456 = vmatprep.subr.bf16.mxu1 %v2081_v55  ;;  %1497 = vmatprep.subr.bf16.mxu0 %v2084_v56  ;;  %v974_v55 = vrot.slane %v951_v21, %v973_v51  ;;  %v982_v56 = vrot.slane %v951_v21, %v981_v52 }
 0x149   :  { %1457 = vmatpush1.bf16.msra.mxu1 %v2079_v57  ;;  %1498 = vmatpush1.bf16.msra.mxu0 %v2082_v58  ;;  %v978_v57 = vrot.slane %v951_v21, %v977_v53  ;;  %v986_v58 = vrot.slane %v951_v21, %v985_v54 }
 0x14a   :  { %1458 = vmatprep.subr.bf16.mxu1 %v2087_v59  ;;  %1499 = vmatprep.subr.bf16.mxu0 %v2090_v60 }
 0x14d   :  { %1459 = vmatpush1.bf16.msra.mxu1 %v2085_v61  ;;  %1500 = vmatpush1.bf16.msra.mxu0 %v2088_v62 }
 0x14e   :  { %1460 = vmatprep.subr.bf16.mxu1 %v2093_v63  ;;  %1501 = vmatprep.subr.bf16.mxu0 %v2096_v0 }
 0x151   :  { %1461 = vmatpush1.bf16.msra.mxu1 %v2091_v1  ;;  %1502 = vmatpush1.bf16.msra.mxu0 %v2094_v2 }
 0x152   :  { %1462 = vmatprep.subr.bf16.mxu1 %v2099_v3  ;;  %1503 = vmatprep.subr.bf16.mxu0 %v2102_v4 }
 0x155   :  { %1463 = vmatpush1.bf16.msra.mxu1 %v2097_v5  ;;  %1504 = vmatpush1.bf16.msra.mxu0 %v2100_v6 }
 0x156   :  { %1464 = vmatprep.subr.bf16.mxu1 %v2105_v7  ;;  %1505 = vmatprep.subr.bf16.mxu0 %v2108_v8 }
 0x159   :  { %1465 = vmatpush1.bf16.msra.mxu1 %v2103_v9  ;;  %1506 = vmatpush1.bf16.msra.mxu0 %v2106_v10 }
 0x15a   :  { %1915 = vmatprep.subr.bf16.mxu1 %v2118_v25 }
 0x15c   :  { %1483 = vmatmul.mubr.bf16.vlgmr.msra.gmra.mrb[12].mxu1 %v2506_v46  ;;  %1524 = vmatmul.mubr.bf16.vlgmr.msra.gmra.mrb[16].mxu0 %v2506_v46 }
 0x15d   :  { %1916 = vmatpush3.bf16.msra.mxu1 %v2109_v11  ;;  %1931 = vmatprep.mubr.msk.bf16.mxu1 %vm2119_vm0, %v2118_v25 }
 0x15e   :  { %1917 = vmatprep.subr.bf16.mxu1 %v2118_v25 }
 0x161   :  { %1918 = vmatpush3.bf16.msra.mxu1 %v2110_v12 }
 0x162   :  { %1919 = vmatprep.subr.bf16.mxu1 %v2118_v25 }
 0x165   :  { %1920 = vmatpush3.bf16.msra.mxu1 %v2111_v13 }
 0x166   :  { %1921 = vmatprep.subr.bf16.mxu1 %v2118_v25 }
 0x169   :  { %1922 = vmatpush3.bf16.msra.mxu1 %v2112_v14 }
 0x16a   :  { %1923 = vmatprep.subr.bf16.mxu1 %v2118_v25 }
 0x16d   :  { %1924 = vmatpush3.bf16.msra.mxu1 %v2113_v15  ;;  %v1715_v15 = vld [vmem:[%s2662_s4 + $0x8] ss:$0 sm:$0xff] }
 0x16e   :  { %1925 = vmatprep.subr.bf16.mxu1 %v2118_v25 }
 0x171   :  { %1926 = vmatpush3.bf16.msra.mxu1 %v2114_v16 }
 0x172   :  { %1927 = vmatprep.subr.bf16.mxu1 %v2118_v25 }
 0x175   :  { %1928 = vmatpush3.bf16.msra.mxu1 %v2115_v17 }
 0x176   :  { %1929 = vmatprep.subr.bf16.mxu1 %v2118_v25 }
 0x179   :  { %1930 = vmatpush3.bf16.msra.mxu1 %v2116_v18 }
 0x17c   :  { %1932 = vmatmul.mubr.bf16.vlgmr.msra.gmra.mrb[16].mxu1 %v2506_v46 }
 0x20f   :  { %v1402_v25 = vpop.f32.mrb[8].mxu1  ;;  %v1443_v30 = vpop.f32.mrb[12].mxu0 }
 0x210   :  { %v1403_v31 = vadd.f32 %v1402_v25, %v958_v24  ;;  %v1444_v32 = vadd.f32 %v1443_v30, %v966_v26  ;;  %v1404_v33 = vpop.f32.mrb[9].mxu1  ;;  %v1445_v35 = vpop.f32.mrb[13].mxu0 }
 0x211   :  { %v1405_v36 = vadd.f32 %v1404_v33, %v962_v27  ;;  %v1446_v37 = vadd.f32 %v1445_v35, %v970_v28  ;;  %v1406_v38 = vpop.f32.mrb[10].mxu1  ;;  %v1447_v39 = vpop.f32.mrb[14].mxu0 }
 0x212   :  { %v1572_v40 = vmax.f32 %v1403_v31, 0.0  ;;  %v1574_v41 = vmax.f32 %v1444_v32, 0.0  ;;  %v1407_v42 = vpop.f32.mrb[11].mxu1  ;;  %v1448_v43 = vpop.f32.mrb[15].mxu0 }
 0x213   :  { %v1573_v44 = vmax.f32 %v1405_v36, 0.0  ;;  %v1575_v45 = vmax.f32 %v1446_v37, 0.0 }
 0x215   :  { %v1590_v46 = vcombine.low %v1572_v40, %v1573_v44  ;;  %v1591_v47 = vcombine.low %v1574_v41, %v1575_v45 }
 0x217   :  { %v1598_v48 = vrot.slane %v1590_v46, %v2241_v34  ;;  %v1605_v49 = vrot.slane %v1591_v47, %v2241_v34 }
 0x219   :  { %v1606_v50 = vcombine.low %v1598_v48, %v1605_v49 }
 0x21b   :  { %1634 = vst [vmem:[%s2663_s5] sm:$0xff] %v1606_v50 }
 0x22f   :  { %v1484_v59 = vpop.f32.mrb[12].mxu1  ;;  %v1525_v60 = vpop.f32.mrb[16].mxu0 }
 0x230   :  { %v1485_v61 = vadd.f32 %v1484_v59, %v974_v55  ;;  %v1526_v62 = vadd.f32 %v1525_v60, %v982_v56  ;;  %v1486_v63 = vpop.f32.mrb[13].mxu1  ;;  %v1527_v0 = vpop.f32.mrb[17].mxu0 }
 0x231   :  { %v1487_v1 = vadd.f32 %v1486_v63, %v978_v57  ;;  %v1528_v2 = vadd.f32 %v1527_v0, %v986_v58  ;;  %v1488_v3 = vpop.f32.mrb[14].mxu1  ;;  %v1529_v4 = vpop.f32.mrb[18].mxu0 }
 0x232   :  { %v1576_v5 = vmax.f32 %v1485_v61, 0.0  ;;  %v1578_v6 = vmax.f32 %v1526_v62, 0.0  ;;  %v1489_v7 = vpop.f32.mrb[15].mxu1  ;;  %v1530_v8 = vpop.f32.mrb[19].mxu0 }
 0x233   :  { %v1577_v9 = vmax.f32 %v1487_v1, 0.0  ;;  %v1579_v29 = vmax.f32 %v1528_v2, 0.0 }
 0x235   :  { %v1607_v10 = vcombine.low %v1576_v5, %v1577_v9  ;;  %v1608_v11 = vcombine.low %v1578_v6, %v1579_v29 }
 0x237   :  { %v1615_v12 = vrot.slane %v1607_v10, %v2241_v34  ;;  %v1622_v13 = vrot.slane %v1608_v11, %v2241_v34 }
 0x239   :  { %v1623_v14 = vcombine.low %v1615_v12, %v1622_v13 }
 0x23b   :  { %1635 = vst [vmem:[%s2663_s5 + $0x8] sm:$0xff] %v1623_v14 }
 0x24f   :  { %v1566_v16 = vpop.f32.mrb[16].mxu1 }
 0x250   :  { %v1567_v17 = vadd.f32 %v1715_v15, %v1566_v16  ;;  %v1933_v18 = vpop.f32.mrb[17].mxu1 }
 0x251   :  { %v1569_v19 = vpop.f32.mrb[18].mxu1 }
 0x252   :  { %v1580_v20 = vmax.f32 %v1567_v17, 0.0  ;;  %v1934_v21 = vpop.f32.mrb[19].mxu1 }
 0x254   :  { %1788 = vst.sshfl [vmem:[%s2663_s5 + $0x10] sm:$0x3 pattern:$0x76325410] %v1580_v20 }

// kernel: cnn_autoencoder_forward.12
= control target key start
LH: loop header
LB: loop body
LE: loop exit
PB: predicated region body
PF: predicated region fallthrough
CT: control target
= control target key end

     0   :  { %v324_v0 = vmov 0.0   ;;  %vm325_vm0 = vmmov 0   ;;  %vm110_vm1 = vcmask 523264   ;;  %s491_s2 = inlined_call_operand.vmem [shape: bf16[64,128], index: 2, kind: input, shape index: {}]   ;;  %s492_s0 = inlined_call_operand.vmem [shape: f32[98,64], index: 0, kind: input, shape index: {}]   ;;  %s493_s1 = inlined_call_operand.vmem [shape: f32[1,64], index: 1, kind: input, shape index: {}]   ;;  %s494_s3 = inlined_call_operand.vmem [shape: f32[1,128], index: 3, kind: input, shape index: {}]   ;;  %s495_s4 = inlined_call_operand.vmem [shape: f32[98,128], index: 4, kind: output, shape index: {}]  }
   0x1   :  { %274 = vmatprep.subr.bf16.mxu0 %v324_v0  ;;  %v320_v1 = vld [vmem:[%s491_s2] sm:$0xff]   ;;  %310 = vmatprep.subr.bf16.mxu1 %v324_v0  ;;  %v321_v2 = vld [vmem:[%s491_s2 + $0x8] sm:$0xff]   ;;  %v322_v10 = vld [vmem:[%s491_s2 + $0x10] sm:$0xff]  }
   0x2   :  { %282 = vmatprep.mubr.msk.bf16.mxu0 %vm325_vm0, %v324_v0  ;;  %298 = vmatprep.mubr.msk.bf16.mxu1 %vm325_vm0, %v324_v0  ;;  %v18_v3 = vld [vmem:[%s492_s0] sm:$0xff]  ;;  %v19_v4 = vld [vmem:[%s492_s0 + $0x8] sm:$0xff]  ;;  %v20_v17 = vld [vmem:[%s492_s0 + $0x10] sm:$0xff] }
   0x3   :  { %275 = vmatpush3.bf16.msra.mxu0 %v320_v1  ;;  %314 = vmatpush3.bf16.msra.mxu1 %v320_v1  ;;  %v250_v5 = vld [vmem:[%s493_s1] ss:$0 sm:$0xff]  ;;  %v27_v9 = vld [vmem:[%s492_s0 + $0x48] sm:$0xff]  ;;  %v21_v18 = vld [vmem:[%s492_s0 + $0x18] sm:$0xff] }
   0x4   :  { %276 = vmatprep.subr.bf16.mxu0 %v324_v0  ;;  %311 = vmatprep.subr.bf16.mxu1 %v324_v0  ;;  %v38_v6 = vadd.f32 %v250_v5, %v18_v3  ;;  %v39_v7 = vadd.f32 %v250_v5, %v19_v4  ;;  %v26_v8 = vld [vmem:[%s492_s0 + $0x40] sm:$0xff]  ;;  %v47_v12 = vadd.f32 %v250_v5, %v27_v9  ;;  %v323_v19 = vld [vmem:[%s491_s2 + $0x18] sm:$0xff]   ;;  %v28_v20 = vld [vmem:[%s492_s0 + $0x50] sm:$0xff] }
   0x5   :  { %v46_v11 = vadd.f32 %v250_v5, %v26_v8  ;;  %v29_v21 = vld [vmem:[%s492_s0 + $0x58] sm:$0xff]  ;;  %v40_v22 = vadd.f32 %v250_v5, %v20_v17  ;;  %v41_v23 = vadd.f32 %v250_v5, %v21_v18  ;;  %v48_v26 = vadd.f32 %v250_v5, %v28_v20  ;;  %v22_v32 = vld [vmem:[%s492_s0 + $0x20] sm:$0xff]  ;;  %v23_v33 = vld [vmem:[%s492_s0 + $0x28] sm:$0xff] }
   0x6   :  { %v51_v13 = vmax.f32 %v38_v6, 0.0  ;;  %v52_v14 = vmax.f32 %v39_v7, 0.0  ;;  %v60_v16 = vmax.f32 %v47_v12, 0.0  ;;  %v49_v27 = vadd.f32 %v250_v5, %v29_v21  ;;  %v30_v34 = vld [vmem:[%s492_s0 + $0x60] sm:$0x3]  ;;  %v24_v43 = vld [vmem:[%s492_s0 + $0x30] sm:$0xff] }
   0x7   :  { %277 = vmatpush3.bf16.msra.mxu0 %v321_v2  ;;  %315 = vmatpush3.bf16.msra.mxu1 %v321_v2  ;;  %v59_v15 = vmax.f32 %v46_v11, 0.0  ;;  %v53_v28 = vmax.f32 %v40_v22, 0.0  ;;  %v54_v29 = vmax.f32 %v41_v23, 0.0  ;;  %v61_v30 = vmax.f32 %v48_v26, 0.0  ;;  %v25_v44 = vld [vmem:[%s492_s0 + $0x38] sm:$0xff] }
   0x8   :  { %278 = vmatprep.subr.bf16.mxu0 %v324_v0  ;;  %312 = vmatprep.subr.bf16.mxu1 %v324_v0  ;;  %v64_v24 = vpack.c.bf16 %v52_v14, %v51_v13  ;;  %v62_v31 = vmax.f32 %v49_v27, 0.0  ;;  %v42_v35 = vadd.f32 %v250_v5, %v22_v32  ;;  %v43_v38 = vadd.f32 %v250_v5, %v23_v33  ;;  %v437_v52 = vld [vmem:[%s494_s3] ss:$0 sm:$0xff] }
   0x9   :  { %v68_v25 = vpack.c.bf16 %v60_v16, %v59_v15  ;;  %v65_v36 = vpack.c.bf16 %v54_v29, %v53_v28  ;;  %v50_v39 = vadd.f32 %v250_v5, %v30_v34  ;;  %v44_v47 = vadd.f32 %v250_v5, %v24_v43 }
   0xa   :  { %v69_v37 = vpack.c.bf16 %v62_v31, %v61_v30  ;;  %v55_v40 = vmax.f32 %v42_v35, 0.0  ;;  %v56_v41 = vmax.f32 %v43_v38, 0.0  ;;  %v45_v48 = vadd.f32 %v250_v5, %v25_v44 }
   0xb   :  { %279 = vmatpush3.bf16.msra.mxu0 %v322_v10  ;;  %316 = vmatpush3.bf16.msra.mxu1 %v322_v10  ;;  %v63_v42 = vmax.f32 %v50_v39, 0.0  ;;  %v57_v49 = vmax.f32 %v44_v47, 0.0 }
   0xc   :  { %280 = vmatprep.subr.bf16.mxu0 %v324_v0  ;;  %313 = vmatprep.subr.bf16.mxu1 %v324_v0  ;;  %v66_v45 = vpack.c.bf16 %v56_v41, %v55_v40  ;;  %v58_v50 = vmax.f32 %v45_v48, 0.0 }
   0xd   :  { %v70_v46 = vpack.c.bf16 %v63_v42, %v63_v42 }
   0xe   :  { %v67_v51 = vpack.c.bf16 %v58_v50, %v57_v49 }
   0xf   :  { %281 = vmatpush3.bf16.msra.mxu0 %v323_v19  ;;  %317 = vmatpush3.bf16.msra.mxu1 %v323_v19 }
  0x12   :  { %283 = vmatmul.mubr.msk.bf16.vlgmr.msra.gmra.mrb[0].mxu0 %vm110_vm1, %v64_v24  ;;  %299 = vmatmul.mubr.msk.bf16.vlgmr.msra.gmra.mrb[0].mxu1 %vm110_vm1, %v68_v25 }
  0x13   :  { %286 = vmatprep.mubr.msk.bf16.mxu0 %vm325_vm0, %v324_v0  ;;  %302 = vmatprep.mubr.msk.bf16.mxu1 %vm325_vm0, %v324_v0 }
  0x1a   :  { %287 = vmatmul.mubr.msk.bf16.gmra.mrb[4].mxu0 %vm110_vm1, %v65_v36  ;;  %303 = vmatmul.mubr.msk.bf16.gmra.mrb[4].mxu1 %vm110_vm1, %v69_v37 }
  0x1b   :  { %290 = vmatprep.mubr.msk.bf16.mxu0 %vm325_vm0, %v324_v0  ;;  %306 = vmatprep.mubr.msk.bf16.mxu1 %vm325_vm0, %v324_v0 }
  0x22   :  { %291 = vmatmul.mubr.msk.bf16.gmra.mrb[8].mxu0 %vm110_vm1, %v66_v45  ;;  %307 = vmatmul.mubr.msk.bf16.gmra.mrb[8].mxu1 %vm110_vm1, %v70_v46 }
  0x23   :  { %294 = vmatprep.mubr.msk.bf16.mxu0 %vm325_vm0, %v324_v0 }
  0x2a   :  { %295 = vmatmul.mubr.msk.bf16.gmra.mrb[12].mxu0 %vm110_vm1, %v67_v51 }
  0xe5   :  { %v166_v53 = vpop.f32.mrb[0].mxu0  ;;  %v198_v54 = vpop.f32.mrb[0].mxu1 }
  0xe6   :  { %v167_v55 = vadd.f32 %v437_v52, %v166_v53  ;;  %v284_v56 = vpop.f32.mrb[1].mxu0  ;;  %v199_v57 = vadd.f32 %v437_v52, %v198_v54  ;;  %v300_v58 = vpop.f32.mrb[1].mxu1 }
  0xe7   :  { %v169_v59 = vpop.f32.mrb[2].mxu0  ;;  %v201_v60 = vpop.f32.mrb[2].mxu1 }
  0xe8   :  { %v220_v61 = vmax.f32 %v167_v55, 0.0  ;;  %v170_v62 = vadd.f32 %v437_v52, %v169_v59  ;;  %v285_v63 = vpop.f32.mrb[3].mxu0  ;;  %v228_v0 = vmax.f32 %v199_v57, 0.0  ;;  %v202_v1 = vadd.f32 %v437_v52, %v201_v60  ;;  %v301_v2 = vpop.f32.mrb[3].mxu1 }
  0xea   :  { %233 = vst [vmem:[%s495_s4] sm:$0xff] %v220_v61  ;;  %v221_v3 = vmax.f32 %v170_v62, 0.0  ;;  %241 = vst [vmem:[%s495_s4 + $0x40] sm:$0xff] %v228_v0  ;;  %v229_v4 = vmax.f32 %v202_v1, 0.0 }
  0xec   :  { %234 = vst [vmem:[%s495_s4 + $0x8] sm:$0xff] %v221_v3  ;;  %242 = vst [vmem:[%s495_s4 + $0x48] sm:$0xff] %v229_v4 }
  0xed   :  { %v174_v5 = vpop.f32.mrb[4].mxu0  ;;  %v206_v6 = vpop.f32.mrb[4].mxu1 }
  0xee   :  { %v175_v7 = vadd.f32 %v437_v52, %v174_v5  ;;  %v288_v8 = vpop.f32.mrb[5].mxu0  ;;  %v207_v9 = vadd.f32 %v437_v52, %v206_v6  ;;  %v304_v10 = vpop.f32.mrb[5].mxu1 }
  0xef   :  { %v177_v11 = vpop.f32.mrb[6].mxu0  ;;  %v209_v12 = vpop.f32.mrb[6].mxu1 }
  0xf0   :  { %v222_v13 = vmax.f32 %v175_v7, 0.0  ;;  %v178_v14 = vadd.f32 %v437_v52, %v177_v11  ;;  %v289_v15 = vpop.f32.mrb[7].mxu0  ;;  %v230_v16 = vmax.f32 %v207_v9, 0.0  ;;  %v210_v17 = vadd.f32 %v437_v52, %v209_v12  ;;  %v305_v18 = vpop.f32.mrb[7].mxu1 }
  0xf2   :  { %235 = vst [vmem:[%s495_s4 + $0x10] sm:$0xff] %v222_v13  ;;  %v223_v19 = vmax.f32 %v178_v14, 0.0  ;;  %243 = vst [vmem:[%s495_s4 + $0x50] sm:$0xff] %v230_v16  ;;  %v231_v20 = vmax.f32 %v210_v17, 0.0 }
  0xf4   :  { %236 = vst [vmem:[%s495_s4 + $0x18] sm:$0xff] %v223_v19  ;;  %244 = vst [vmem:[%s495_s4 + $0x58] sm:$0xff] %v231_v20 }
  0xf5   :  { %v182_v21 = vpop.f32.mrb[8].mxu0  ;;  %v214_v22 = vpop.f32.mrb[8].mxu1 }
  0xf6   :  { %v183_v23 = vadd.f32 %v437_v52, %v182_v21  ;;  %v292_v24 = vpop.f32.mrb[9].mxu0  ;;  %v215_v25 = vadd.f32 %v437_v52, %v214_v22  ;;  %v308_v26 = vpop.f32.mrb[9].mxu1 }
  0xf7   :  { %v185_v27 = vpop.f32.mrb[10].mxu0  ;;  %v217_v28 = vpop.f32.mrb[10].mxu1 }
  0xf8   :  { %v224_v29 = vmax.f32 %v183_v23, 0.0  ;;  %v186_v30 = vadd.f32 %v437_v52, %v185_v27  ;;  %v293_v31 = vpop.f32.mrb[11].mxu0  ;;  %v232_v32 = vmax.f32 %v215_v25, 0.0  ;;  %v309_v33 = vpop.f32.mrb[11].mxu1 }
  0xfa   :  { %237 = vst [vmem:[%s495_s4 + $0x20] sm:$0xff] %v224_v29  ;;  %v225_v34 = vmax.f32 %v186_v30, 0.0  ;;  %245 = vst [vmem:[%s495_s4 + $0x60] sm:$0x3] %v232_v32 }
  0xfc   :  { %238 = vst [vmem:[%s495_s4 + $0x28] sm:$0xff] %v225_v34 }
  0xfd   :  { %v190_v35 = vpop.f32.mrb[12].mxu0 }
  0xfe   :  { %v191_v36 = vadd.f32 %v437_v52, %v190_v35  ;;  %v296_v37 = vpop.f32.mrb[13].mxu0 }
  0xff   :  { %v193_v38 = vpop.f32.mrb[14].mxu0 }
 0x100   :  { %v226_v39 = vmax.f32 %v191_v36, 0.0  ;;  %v194_v40 = vadd.f32 %v437_v52, %v193_v38  ;;  %v297_v41 = vpop.f32.mrb[15].mxu0 }
 0x102   :  { %239 = vst [vmem:[%s495_s4 + $0x30] sm:$0xff] %v226_v39  ;;  %v227_v42 = vmax.f32 %v194_v40, 0.0 }
 0x104   :  { %240 = vst [vmem:[%s495_s4 + $0x38] sm:$0xff] %v227_v42 }

// kernel: cnn_autoencoder_forward.13
= control target key start
LH: loop header
LB: loop body
LE: loop exit
PB: predicated region body
PF: predicated region fallthrough
CT: control target
= control target key end

     0   :  { %v689_v0 = vmov 0.0   ;;  %vm690_vm0 = vmmov 0   ;;  %vm112_vm1 = vcmask 261120   ;;  %s1144_s1 = inlined_call_operand.vmem [shape: bf16[32,128], index: 1, kind: input, shape index: {}]   ;;  %s1145_s0 = inlined_call_operand.vmem [shape: f32[392,32], index: 0, kind: input, shape index: {}]   ;;  %s1146_s2 = inlined_call_operand.vmem [shape: f32[1,128], index: 2, kind: input, shape index: {}]   ;;  %s1147_s3 = inlined_call_operand.vmem [shape: f32[392,128], index: 3, kind: output, shape index: {}]  }
   0x1   :  { %577 = vmatprep.subr.bf16.mxu0 %v689_v0  ;;  %v687_v1 = vld [vmem:[%s1144_s1] sm:$0xff]   ;;  %681 = vmatprep.subr.bf16.mxu1 %v689_v0  ;;  %v688_v2 = vld [vmem:[%s1144_s1 + $0x8] sm:$0xff]   ;;  %v41_v5 = vld [vmem:[%s1145_s0 + $0xd0] sm:$0xff] }
   0x2   :  { %581 = vmatprep.mubr.msk.bf16.mxu0 %vm690_vm0, %v689_v0  ;;  %633 = vmatprep.mubr.msk.bf16.mxu1 %vm690_vm0, %v689_v0  ;;  %v15_v3 = vld [vmem:[%s1145_s0] sm:$0xff]  ;;  %v16_v4 = vld [vmem:[%s1145_s0 + $0x8] sm:$0xff]  ;;  %v42_v6 = vld [vmem:[%s1145_s0 + $0xd8] sm:$0xff] }
   0x3   :  { %578 = vmatpush3.bf16.msra.mxu0 %v687_v1  ;;  %683 = vmatpush3.bf16.msra.mxu1 %v687_v1  ;;  %v64_v7 = vpack.c.bf16 %v16_v4, %v15_v3  ;;  %v77_v8 = vpack.c.bf16 %v42_v6, %v41_v5  ;;  %v17_v9 = vld [vmem:[%s1145_s0 + $0x10] sm:$0xff]  ;;  %v18_v10 = vld [vmem:[%s1145_s0 + $0x18] sm:$0xff]  ;;  %v43_v11 = vld [vmem:[%s1145_s0 + $0xe0] sm:$0xff] }
   0x4   :  { %579 = vmatprep.subr.bf16.mxu0 %v689_v0  ;;  %682 = vmatprep.subr.bf16.mxu1 %v689_v0  ;;  %v44_v12 = vld [vmem:[%s1145_s0 + $0xe8] sm:$0xff]  ;;  %v65_v13 = vpack.c.bf16 %v18_v10, %v17_v9  ;;  %v19_v15 = vld [vmem:[%s1145_s0 + $0x20] sm:$0xff]  ;;  %v45_v17 = vld [vmem:[%s1145_s0 + $0xf0] sm:$0xff] }
   0x5   :  { %v78_v14 = vpack.c.bf16 %v44_v12, %v43_v11  ;;  %v20_v16 = vld [vmem:[%s1145_s0 + $0x28] sm:$0xff]  ;;  %v46_v18 = vld [vmem:[%s1145_s0 + $0xf8] sm:$0xff]  ;;  %v21_v21 = vld [vmem:[%s1145_s0 + $0x30] sm:$0xff] }
   0x6   :  { %v66_v19 = vpack.c.bf16 %v20_v16, %v19_v15  ;;  %v79_v20 = vpack.c.bf16 %v46_v18, %v45_v17  ;;  %v22_v22 = vld [vmem:[%s1145_s0 + $0x38] sm:$0xff]  ;;  %v47_v23 = vld [vmem:[%s1145_s0 + $0x100] sm:$0xff]  ;;  %v48_v24 = vld [vmem:[%s1145_s0 + $0x108] sm:$0xff] }
   0x7   :  { %580 = vmatpush3.bf16.msra.mxu0 %v688_v2  ;;  %684 = vmatpush3.bf16.msra.mxu1 %v688_v2  ;;  %v67_v25 = vpack.c.bf16 %v22_v22, %v21_v21  ;;  %v80_v26 = vpack.c.bf16 %v48_v24, %v47_v23  ;;  %v23_v27 = vld [vmem:[%s1145_s0 + $0x40] sm:$0xff]  ;;  %v24_v28 = vld [vmem:[%s1145_s0 + $0x48] sm:$0xff]  ;;  %v49_v29 = vld [vmem:[%s1145_s0 + $0x110] sm:$0xff] }
   0x8   :  { %v50_v30 = vld [vmem:[%s1145_s0 + $0x118] sm:$0xff]  ;;  %v68_v31 = vpack.c.bf16 %v24_v28, %v23_v27  ;;  %v25_v33 = vld [vmem:[%s1145_s0 + $0x50] sm:$0xff]  ;;  %v51_v35 = vld [vmem:[%s1145_s0 + $0x120] sm:$0xff] }
   0x9   :  { %v81_v32 = vpack.c.bf16 %v50_v30, %v49_v29  ;;  %v26_v34 = vld [vmem:[%s1145_s0 + $0x58] sm:$0xff]  ;;  %v52_v36 = vld [vmem:[%s1145_s0 + $0x128] sm:$0xff]  ;;  %v27_v39 = vld [vmem:[%s1145_s0 + $0x60] sm:$0xff] }
   0xa   :  { %582 = vmatmul.mubr.msk.bf16.vlgmr.msra.gmra.mrb[0].mxu0 %vm112_vm1, %v64_v7  ;;  %634 = vmatmul.mubr.msk.bf16.vlgmr.msra.gmra.mrb[0].mxu1 %vm112_vm1, %v77_v8  ;;  %v69_v37 = vpack.c.bf16 %v26_v34, %v25_v33  ;;  %v82_v38 = vpack.c.bf16 %v52_v36, %v51_v35  ;;  %v28_v40 = vld [vmem:[%s1145_s0 + $0x68] sm:$0xff]  ;;  %v53_v41 = vld [vmem:[%s1145_s0 + $0x130] sm:$0xff]  ;;  %v54_v42 = vld [vmem:[%s1145_s0 + $0x138] sm:$0xff] }
   0xb   :  { %585 = vmatprep.mubr.msk.bf16.mxu0 %vm690_vm0, %v689_v0  ;;  %637 = vmatprep.mubr.msk.bf16.mxu1 %vm690_vm0, %v689_v0  ;;  %v70_v43 = vpack.c.bf16 %v28_v40, %v27_v39  ;;  %v83_v44 = vpack.c.bf16 %v54_v42, %v53_v41  ;;  %v29_v45 = vld [vmem:[%s1145_s0 + $0x70] sm:$0xff]  ;;  %v30_v46 = vld [vmem:[%s1145_s0 + $0x78] sm:$0xff]  ;;  %v55_v47 = vld [vmem:[%s1145_s0 + $0x140] sm:$0xff] }
   0xc   :  { %v56_v48 = vld [vmem:[%s1145_s0 + $0x148] sm:$0xff]  ;;  %v71_v49 = vpack.c.bf16 %v30_v46, %v29_v45  ;;  %v31_v51 = vld [vmem:[%s1145_s0 + $0x80] sm:$0xff]  ;;  %v57_v53 = vld [vmem:[%s1145_s0 + $0x150] sm:$0xff] }
   0xd   :  { %v84_v50 = vpack.c.bf16 %v56_v48, %v55_v47  ;;  %v32_v52 = vld [vmem:[%s1145_s0 + $0x88] sm:$0xff]  ;;  %v58_v54 = vld [vmem:[%s1145_s0 + $0x158] sm:$0xff]  ;;  %v33_v57 = vld [vmem:[%s1145_s0 + $0x90] sm:$0xff] }
   0xe   :  { %v72_v55 = vpack.c.bf16 %v32_v52, %v31_v51  ;;  %v85_v56 = vpack.c.bf16 %v58_v54, %v57_v53  ;;  %v34_v58 = vld [vmem:[%s1145_s0 + $0x98] sm:$0xff]  ;;  %v59_v59 = vld [vmem:[%s1145_s0 + $0x160] sm:$0xff]  ;;  %v60_v60 = vld [vmem:[%s1145_s0 + $0x168] sm:$0xff] }
   0xf   :  { %v73_v61 = vpack.c.bf16 %v34_v58, %v33_v57  ;;  %v86_v62 = vpack.c.bf16 %v60_v60, %v59_v59  ;;  %v35_v63 = vld [vmem:[%s1145_s0 + $0xa0] sm:$0xff]  ;;  %v36_v1 = vld [vmem:[%s1145_s0 + $0xa8] sm:$0xff]  ;;  %v61_v2 = vld [vmem:[%s1145_s0 + $0x170] sm:$0xff] }
  0x10   :  { %v62_v3 = vld [vmem:[%s1145_s0 + $0x178] sm:$0xff]  ;;  %v74_v4 = vpack.c.bf16 %v36_v1, %v35_v63  ;;  %v37_v6 = vld [vmem:[%s1145_s0 + $0xb0] sm:$0xff]  ;;  %v63_v8 = vld [vmem:[%s1145_s0 + $0x180] sm:$0xff] }
  0x11   :  { %v87_v5 = vpack.c.bf16 %v62_v3, %v61_v2  ;;  %v38_v7 = vld [vmem:[%s1145_s0 + $0xb8] sm:$0xff]  ;;  %v88_v10 = vpack.c.bf16 %v63_v8, %v63_v8  ;;  %v39_v11 = vld [vmem:[%s1145_s0 + $0xc0] sm:$0xff]  ;;  %v40_v12 = vld [vmem:[%s1145_s0 + $0xc8] sm:$0xff] }
  0x12   :  { %586 = vmatmul.mubr.msk.bf16.gmra.mrb[4].mxu0 %vm112_vm1, %v65_v13  ;;  %638 = vmatmul.mubr.msk.bf16.gmra.mrb[4].mxu1 %vm112_vm1, %v78_v14  ;;  %v75_v9 = vpack.c.bf16 %v38_v7, %v37_v6  ;;  %v76_v13 = vpack.c.bf16 %v40_v12, %v39_v11  ;;  %v946_v14 = vld [vmem:[%s1146_s2] ss:$0 sm:$0xff] }
  0x13   :  { %589 = vmatprep.mubr.msk.bf16.mxu0 %vm690_vm0, %v689_v0  ;;  %641 = vmatprep.mubr.msk.bf16.mxu1 %vm690_vm0, %v689_v0 }
  0x1a   :  { %590 = vmatmul.mubr.msk.bf16.gmra.mrb[8].mxu0 %vm112_vm1, %v66_v19  ;;  %642 = vmatmul.mubr.msk.bf16.gmra.mrb[8].mxu1 %vm112_vm1, %v79_v20 }
  0x1b   :  { %593 = vmatprep.mubr.msk.bf16.mxu0 %vm690_vm0, %v689_v0  ;;  %645 = vmatprep.mubr.msk.bf16.mxu1 %vm690_vm0, %v689_v0 }
  0x22   :  { %594 = vmatmul.mubr.msk.bf16.gmra.mrb[12].mxu0 %vm112_vm1, %v67_v25  ;;  %646 = vmatmul.mubr.msk.bf16.gmra.mrb[12].mxu1 %vm112_vm1, %v80_v26 }
  0x23   :  { %597 = vmatprep.mubr.msk.bf16.mxu0 %vm690_vm0, %v689_v0  ;;  %649 = vmatprep.mubr.msk.bf16.mxu1 %vm690_vm0, %v689_v0 }
  0x2a   :  { %598 = vmatmul.mubr.msk.bf16.gmra.mrb[16].mxu0 %vm112_vm1, %v68_v31  ;;  %650 = vmatmul.mubr.msk.bf16.gmra.mrb[16].mxu1 %vm112_vm1, %v81_v32 }
  0x2b   :  { %601 = vmatprep.mubr.msk.bf16.mxu0 %vm690_vm0, %v689_v0  ;;  %653 = vmatprep.mubr.msk.bf16.mxu1 %vm690_vm0, %v689_v0 }
  0x32   :  { %602 = vmatmul.mubr.msk.bf16.gmra.mrb[20].mxu0 %vm112_vm1, %v69_v37  ;;  %654 = vmatmul.mubr.msk.bf16.gmra.mrb[20].mxu1 %vm112_vm1, %v82_v38 }
  0x33   :  { %605 = vmatprep.mubr.msk.bf16.mxu0 %vm690_vm0, %v689_v0  ;;  %657 = vmatprep.mubr.msk.bf16.mxu1 %vm690_vm0, %v689_v0 }
  0x3a   :  { %606 = vmatmul.mubr.msk.bf16.gmra.mrb[24].mxu0 %vm112_vm1, %v70_v43  ;;  %658 = vmatmul.mubr.msk.bf16.gmra.mrb[24].mxu1 %vm112_vm1, %v83_v44 }
  0x3b   :  { %609 = vmatprep.mubr.msk.bf16.mxu0 %vm690_vm0, %v689_v0  ;;  %661 = vmatprep.mubr.msk.bf16.mxu1 %vm690_vm0, %v689_v0 }
  0x42   :  { %610 = vmatmul.mubr.msk.bf16.gmra.mrb[28].mxu0 %vm112_vm1, %v71_v49  ;;  %662 = vmatmul.mubr.msk.bf16.gmra.mrb[28].mxu1 %vm112_vm1, %v84_v50 }
  0x43   :  { %613 = vmatprep.mubr.msk.bf16.mxu0 %vm690_vm0, %v689_v0  ;;  %665 = vmatprep.mubr.msk.bf16.mxu1 %vm690_vm0, %v689_v0 }
  0x4a   :  { %614 = vmatmul.mubr.msk.bf16.gmra.mrb[32].mxu0 %vm112_vm1, %v72_v55  ;;  %666 = vmatmul.mubr.msk.bf16.gmra.mrb[32].mxu1 %vm112_vm1, %v85_v56 }
  0x4b   :  { %617 = vmatprep.mubr.msk.bf16.mxu0 %vm690_vm0, %v689_v0  ;;  %669 = vmatprep.mubr.msk.bf16.mxu1 %vm690_vm0, %v689_v0 }
  0x52   :  { %618 = vmatmul.mubr.msk.bf16.gmra.mrb[36].mxu0 %vm112_vm1, %v73_v61  ;;  %670 = vmatmul.mubr.msk.bf16.gmra.mrb[36].mxu1 %vm112_vm1, %v86_v62 }
  0x53   :  { %621 = vmatprep.mubr.msk.bf16.mxu0 %vm690_vm0, %v689_v0  ;;  %673 = vmatprep.mubr.msk.bf16.mxu1 %vm690_vm0, %v689_v0 }
  0x5a   :  { %622 = vmatmul.mubr.msk.bf16.gmra.mrb[40].mxu0 %vm112_vm1, %v74_v4  ;;  %674 = vmatmul.mubr.msk.bf16.gmra.mrb[40].mxu1 %vm112_vm1, %v87_v5 }
  0x5b   :  { %625 = vmatprep.mubr.msk.bf16.mxu0 %vm690_vm0, %v689_v0  ;;  %677 = vmatprep.mubr.msk.bf16.mxu1 %vm690_vm0, %v689_v0 }
  0x62   :  { %626 = vmatmul.mubr.msk.bf16.gmra.mrb[44].mxu0 %vm112_vm1, %v75_v9  ;;  %678 = vmatmul.mubr.msk.bf16.gmra.mrb[44].mxu1 %vm112_vm1, %v88_v10 }
  0x63   :  { %629 = vmatprep.mubr.msk.bf16.mxu0 %vm690_vm0, %v689_v0 }
  0x6a   :  { %630 = vmatmul.mubr.msk.bf16.gmra.mrb[48].mxu0 %vm112_vm1, %v76_v13 }
  0xdd   :  { %v222_v15 = vpop.f32.mrb[0].mxu0  ;;  %v326_v16 = vpop.f32.mrb[0].mxu1 }
  0xde   :  { %v223_v0 = vadd.f32 %v946_v14, %v222_v15  ;;  %v583_v17 = vpop.f32.mrb[1].mxu0  ;;  %v327_v18 = vadd.f32 %v946_v14, %v326_v16  ;;  %v635_v19 = vpop.f32.mrb[1].mxu1 }
  0xdf   :  { %v225_v20 = vpop.f32.mrb[2].mxu0  ;;  %v329_v21 = vpop.f32.mrb[2].mxu1 }
  0xe0   :  { %v420_v22 = vmax.f32 %v223_v0, 0.0  ;;  %v226_v23 = vadd.f32 %v946_v14, %v225_v20  ;;  %v584_v24 = vpop.f32.mrb[3].mxu0  ;;  %v446_v25 = vmax.f32 %v327_v18, 0.0  ;;  %v330_v26 = vadd.f32 %v946_v14, %v329_v21  ;;  %v636_v27 = vpop.f32.mrb[3].mxu1 }
  0xe2   :  { %469 = vst [vmem:[%s1147_s3] sm:$0xff] %v420_v22  ;;  %v421_v28 = vmax.f32 %v226_v23, 0.0  ;;  %495 = vst [vmem:[%s1147_s3 + $0xd0] sm:$0xff] %v446_v25  ;;  %v447_v29 = vmax.f32 %v330_v26, 0.0 }
  0xe4   :  { %470 = vst [vmem:[%s1147_s3 + $0x8] sm:$0xff] %v421_v28  ;;  %496 = vst [vmem:[%s1147_s3 + $0xd8] sm:$0xff] %v447_v29 }
  0xe5   :  { %v230_v30 = vpop.f32.mrb[4].mxu0  ;;  %v334_v31 = vpop.f32.mrb[4].mxu1 }
  0xe6   :  { %v231_v32 = vadd.f32 %v946_v14, %v230_v30  ;;  %v587_v33 = vpop.f32.mrb[5].mxu0  ;;  %v335_v34 = vadd.f32 %v946_v14, %v334_v31  ;;  %v639_v35 = vpop.f32.mrb[5].mxu1 }
  0xe7   :  { %v233_v36 = vpop.f32.mrb[6].mxu0  ;;  %v337_v37 = vpop.f32.mrb[6].mxu1 }
  0xe8   :  { %v422_v38 = vmax.f32 %v231_v32, 0.0  ;;  %v234_v39 = vadd.f32 %v946_v14, %v233_v36  ;;  %v588_v40 = vpop.f32.mrb[7].mxu0  ;;  %v448_v41 = vmax.f32 %v335_v34, 0.0  ;;  %v338_v42 = vadd.f32 %v946_v14, %v337_v37  ;;  %v640_v43 = vpop.f32.mrb[7].mxu1 }
  0xea   :  { %471 = vst [vmem:[%s1147_s3 + $0x10] sm:$0xff] %v422_v38  ;;  %v423_v44 = vmax.f32 %v234_v39, 0.0  ;;  %497 = vst [vmem:[%s1147_s3 + $0xe0] sm:$0xff] %v448_v41  ;;  %v449_v45 = vmax.f32 %v338_v42, 0.0 }
  0xec   :  { %472 = vst [vmem:[%s1147_s3 + $0x18] sm:$0xff] %v423_v44  ;;  %498 = vst [vmem:[%s1147_s3 + $0xe8] sm:$0xff] %v449_v45 }
  0xed   :  { %v238_v46 = vpop.f32.mrb[8].mxu0  ;;  %v342_v47 = vpop.f32.mrb[8].mxu1 }
  0xee   :  { %v239_v48 = vadd.f32 %v946_v14, %v238_v46  ;;  %v591_v49 = vpop.f32.mrb[9].mxu0  ;;  %v343_v50 = vadd.f32 %v946_v14, %v342_v47  ;;  %v643_v51 = vpop.f32.mrb[9].mxu1 }
  0xef   :  { %v241_v52 = vpop.f32.mrb[10].mxu0  ;;  %v345_v53 = vpop.f32.mrb[10].mxu1 }
  0xf0   :  { %v424_v54 = vmax.f32 %v239_v48, 0.0  ;;  %v242_v55 = vadd.f32 %v946_v14, %v241_v52  ;;  %v592_v56 = vpop.f32.mrb[11].mxu0  ;;  %v450_v57 = vmax.f32 %v343_v50, 0.0  ;;  %v346_v58 = vadd.f32 %v946_v14, %v345_v53  ;;  %v644_v59 = vpop.f32.mrb[11].mxu1 }
  0xf2   :  { %473 = vst [vmem:[%s1147_s3 + $0x20] sm:$0xff] %v424_v54  ;;  %v425_v60 = vmax.f32 %v242_v55, 0.0  ;;  %499 = vst [vmem:[%s1147_s3 + $0xf0] sm:$0xff] %v450_v57  ;;  %v451_v61 = vmax.f32 %v346_v58, 0.0 }
  0xf4   :  { %474 = vst [vmem:[%s1147_s3 + $0x28] sm:$0xff] %v425_v60  ;;  %500 = vst [vmem:[%s1147_s3 + $0xf8] sm:$0xff] %v451_v61 }
  0xf5   :  { %v246_v62 = vpop.f32.mrb[12].mxu0  ;;  %v350_v63 = vpop.f32.mrb[12].mxu1 }
  0xf6   :  { %v247_v1 = vadd.f32 %v946_v14, %v246_v62  ;;  %v595_v2 = vpop.f32.mrb[13].mxu0  ;;  %v351_v3 = vadd.f32 %v946_v14, %v350_v63  ;;  %v647_v4 = vpop.f32.mrb[13].mxu1 }
  0xf7   :  { %v249_v5 = vpop.f32.mrb[14].mxu0  ;;  %v353_v6 = vpop.f32.mrb[14].mxu1 }
  0xf8   :  { %v426_v7 = vmax.f32 %v247_v1, 0.0  ;;  %v250_v8 = vadd.f32 %v946_v14, %v249_v5  ;;  %v596_v9 = vpop.f32.mrb[15].mxu0  ;;  %v452_v10 = vmax.f32 %v351_v3, 0.0  ;;  %v354_v11 = vadd.f32 %v946_v14, %v353_v6  ;;  %v648_v12 = vpop.f32.mrb[15].mxu1 }
  0xfa   :  { %475 = vst [vmem:[%s1147_s3 + $0x30] sm:$0xff] %v426_v7  ;;  %v427_v13 = vmax.f32 %v250_v8, 0.0  ;;  %501 = vst [vmem:[%s1147_s3 + $0x100] sm:$0xff] %v452_v10  ;;  %v453_v15 = vmax.f32 %v354_v11, 0.0 }
  0xfc   :  { %476 = vst [vmem:[%s1147_s3 + $0x38] sm:$0xff] %v427_v13  ;;  %502 = vst [vmem:[%s1147_s3 + $0x108] sm:$0xff] %v453_v15 }
  0xfd   :  { %v254_v16 = vpop.f32.mrb[16].mxu0  ;;  %v358_v0 = vpop.f32.mrb[16].mxu1 }
  0xfe   :  { %v255_v17 = vadd.f32 %v946_v14, %v254_v16  ;;  %v599_v18 = vpop.f32.mrb[17].mxu0  ;;  %v359_v19 = vadd.f32 %v946_v14, %v358_v0  ;;  %v651_v20 = vpop.f32.mrb[17].mxu1 }
  0xff   :  { %v257_v21 = vpop.f32.mrb[18].mxu0  ;;  %v361_v22 = vpop.f32.mrb[18].mxu1 }
 0x100   :  { %v428_v23 = vmax.f32 %v255_v17, 0.0  ;;  %v258_v24 = vadd.f32 %v946_v14, %v257_v21  ;;  %v600_v25 = vpop.f32.mrb[19].mxu0  ;;  %v454_v26 = vmax.f32 %v359_v19, 0.0  ;;  %v362_v27 = vadd.f32 %v946_v14, %v361_v22  ;;  %v652_v28 = vpop.f32.mrb[19].mxu1 }
 0x102   :  { %477 = vst [vmem:[%s1147_s3 + $0x40] sm:$0xff] %v428_v23  ;;  %v429_v29 = vmax.f32 %v258_v24, 0.0  ;;  %503 = vst [vmem:[%s1147_s3 + $0x110] sm:$0xff] %v454_v26  ;;  %v455_v30 = vmax.f32 %v362_v27, 0.0 }
 0x104   :  { %478 = vst [vmem:[%s1147_s3 + $0x48] sm:$0xff] %v429_v29  ;;  %504 = vst [vmem:[%s1147_s3 + $0x118] sm:$0xff] %v455_v30 }
 0x105   :  { %v262_v31 = vpop.f32.mrb[20].mxu0  ;;  %v366_v32 = vpop.f32.mrb[20].mxu1 }
 0x106   :  { %v263_v33 = vadd.f32 %v946_v14, %v262_v31  ;;  %v603_v34 = vpop.f32.mrb[21].mxu0  ;;  %v367_v35 = vadd.f32 %v946_v14, %v366_v32  ;;  %v655_v36 = vpop.f32.mrb[21].mxu1 }
 0x107   :  { %v265_v37 = vpop.f32.mrb[22].mxu0  ;;  %v369_v38 = vpop.f32.mrb[22].mxu1 }
 0x108   :  { %v430_v39 = vmax.f32 %v263_v33, 0.0  ;;  %v266_v40 = vadd.f32 %v946_v14, %v265_v37  ;;  %v604_v41 = vpop.f32.mrb[23].mxu0  ;;  %v456_v42 = vmax.f32 %v367_v35, 0.0  ;;  %v370_v43 = vadd.f32 %v946_v14, %v369_v38  ;;  %v656_v44 = vpop.f32.mrb[23].mxu1 }
 0x10a   :  { %479 = vst [vmem:[%s1147_s3 + $0x50] sm:$0xff] %v430_v39  ;;  %v431_v45 = vmax.f32 %v266_v40, 0.0  ;;  %505 = vst [vmem:[%s1147_s3 + $0x120] sm:$0xff] %v456_v42  ;;  %v457_v46 = vmax.f32 %v370_v43, 0.0 }
 0x10c   :  { %480 = vst [vmem:[%s1147_s3 + $0x58] sm:$0xff] %v431_v45  ;;  %506 = vst [vmem:[%s1147_s3 + $0x128] sm:$0xff] %v457_v46 }
 0x10d   :  { %v270_v47 = vpop.f32.mrb[24].mxu0  ;;  %v374_v48 = vpop.f32.mrb[24].mxu1 }
 0x10e   :  { %v271_v49 = vadd.f32 %v946_v14, %v270_v47  ;;  %v607_v50 = vpop.f32.mrb[25].mxu0  ;;  %v375_v51 = vadd.f32 %v946_v14, %v374_v48  ;;  %v659_v52 = vpop.f32.mrb[25].mxu1 }
 0x10f   :  { %v273_v53 = vpop.f32.mrb[26].mxu0  ;;  %v377_v54 = vpop.f32.mrb[26].mxu1 }
 0x110   :  { %v432_v55 = vmax.f32 %v271_v49, 0.0  ;;  %v274_v56 = vadd.f32 %v946_v14, %v273_v53  ;;  %v608_v57 = vpop.f32.mrb[27].mxu0  ;;  %v458_v58 = vmax.f32 %v375_v51, 0.0  ;;  %v378_v59 = vadd.f32 %v946_v14, %v377_v54  ;;  %v660_v60 = vpop.f32.mrb[27].mxu1 }
 0x112   :  { %481 = vst [vmem:[%s1147_s3 + $0x60] sm:$0xff] %v432_v55  ;;  %v433_v61 = vmax.f32 %v274_v56, 0.0  ;;  %507 = vst [vmem:[%s1147_s3 + $0x130] sm:$0xff] %v458_v58  ;;  %v459_v62 = vmax.f32 %v378_v59, 0.0 }
 0x114   :  { %482 = vst [vmem:[%s1147_s3 + $0x68] sm:$0xff] %v433_v61  ;;  %508 = vst [vmem:[%s1147_s3 + $0x138] sm:$0xff] %v459_v62 }
 0x115   :  { %v278_v63 = vpop.f32.mrb[28].mxu0  ;;  %v382_v1 = vpop.f32.mrb[28].mxu1 }
 0x116   :  { %v279_v2 = vadd.f32 %v946_v14, %v278_v63  ;;  %v611_v3 = vpop.f32.mrb[29].mxu0  ;;  %v383_v4 = vadd.f32 %v946_v14, %v382_v1  ;;  %v663_v5 = vpop.f32.mrb[29].mxu1 }
 0x117   :  { %v281_v6 = vpop.f32.mrb[30].mxu0  ;;  %v385_v7 = vpop.f32.mrb[30].mxu1 }
 0x118   :  { %v434_v8 = vmax.f32 %v279_v2, 0.0  ;;  %v282_v9 = vadd.f32 %v946_v14, %v281_v6  ;;  %v612_v10 = vpop.f32.mrb[31].mxu0  ;;  %v460_v11 = vmax.f32 %v383_v4, 0.0  ;;  %v386_v12 = vadd.f32 %v946_v14, %v385_v7  ;;  %v664_v13 = vpop.f32.mrb[31].mxu1 }
 0x11a   :  { %483 = vst [vmem:[%s1147_s3 + $0x70] sm:$0xff] %v434_v8  ;;  %v435_v15 = vmax.f32 %v282_v9, 0.0  ;;  %509 = vst [vmem:[%s1147_s3 + $0x140] sm:$0xff] %v460_v11  ;;  %v461_v16 = vmax.f32 %v386_v12, 0.0 }
 0x11c   :  { %484 = vst [vmem:[%s1147_s3 + $0x78] sm:$0xff] %v435_v15  ;;  %510 = vst [vmem:[%s1147_s3 + $0x148] sm:$0xff] %v461_v16 }
 0x11d   :  { %v286_v0 = vpop.f32.mrb[32].mxu0  ;;  %v390_v17 = vpop.f32.mrb[32].mxu1 }
 0x11e   :  { %v287_v18 = vadd.f32 %v946_v14, %v286_v0  ;;  %v615_v19 = vpop.f32.mrb[33].mxu0  ;;  %v391_v20 = vadd.f32 %v946_v14, %v390_v17  ;;  %v667_v21 = vpop.f32.mrb[33].mxu1 }
 0x11f   :  { %v289_v22 = vpop.f32.mrb[34].mxu0  ;;  %v393_v23 = vpop.f32.mrb[34].mxu1 }
 0x120   :  { %v436_v24 = vmax.f32 %v287_v18, 0.0  ;;  %v290_v25 = vadd.f32 %v946_v14, %v289_v22  ;;  %v616_v26 = vpop.f32.mrb[35].mxu0  ;;  %v462_v27 = vmax.f32 %v391_v20, 0.0  ;;  %v394_v28 = vadd.f32 %v946_v14, %v393_v23  ;;  %v668_v29 = vpop.f32.mrb[35].mxu1 }
 0x122   :  { %485 = vst [vmem:[%s1147_s3 + $0x80] sm:$0xff] %v436_v24  ;;  %v437_v30 = vmax.f32 %v290_v25, 0.0  ;;  %511 = vst [vmem:[%s1147_s3 + $0x150] sm:$0xff] %v462_v27  ;;  %v463_v31 = vmax.f32 %v394_v28, 0.0 }
 0x124   :  { %486 = vst [vmem:[%s1147_s3 + $0x88] sm:$0xff] %v437_v30  ;;  %512 = vst [vmem:[%s1147_s3 + $0x158] sm:$0xff] %v463_v31 }
 0x125   :  { %v294_v32 = vpop.f32.mrb[36].mxu0  ;;  %v398_v33 = vpop.f32.mrb[36].mxu1 }
 0x126   :  { %v295_v34 = vadd.f32 %v946_v14, %v294_v32  ;;  %v619_v35 = vpop.f32.mrb[37].mxu0  ;;  %v399_v36 = vadd.f32 %v946_v14, %v398_v33  ;;  %v671_v37 = vpop.f32.mrb[37].mxu1 }
 0x127   :  { %v297_v38 = vpop.f32.mrb[38].mxu0  ;;  %v401_v39 = vpop.f32.mrb[38].mxu1 }
 0x128   :  { %v438_v40 = vmax.f32 %v295_v34, 0.0  ;;  %v298_v41 = vadd.f32 %v946_v14, %v297_v38  ;;  %v620_v42 = vpop.f32.mrb[39].mxu0  ;;  %v464_v43 = vmax.f32 %v399_v36, 0.0  ;;  %v402_v44 = vadd.f32 %v946_v14, %v401_v39  ;;  %v672_v45 = vpop.f32.mrb[39].mxu1 }
 0x12a   :  { %487 = vst [vmem:[%s1147_s3 + $0x90] sm:$0xff] %v438_v40  ;;  %v439_v46 = vmax.f32 %v298_v41, 0.0  ;;  %513 = vst [vmem:[%s1147_s3 + $0x160] sm:$0xff] %v464_v43  ;;  %v465_v47 = vmax.f32 %v402_v44, 0.0 }
 0x12c   :  { %488 = vst [vmem:[%s1147_s3 + $0x98] sm:$0xff] %v439_v46  ;;  %514 = vst [vmem:[%s1147_s3 + $0x168] sm:$0xff] %v465_v47 }
 0x12d   :  { %v302_v48 = vpop.f32.mrb[40].mxu0  ;;  %v406_v49 = vpop.f32.mrb[40].mxu1 }
 0x12e   :  { %v303_v50 = vadd.f32 %v946_v14, %v302_v48  ;;  %v623_v51 = vpop.f32.mrb[41].mxu0  ;;  %v407_v52 = vadd.f32 %v946_v14, %v406_v49  ;;  %v675_v53 = vpop.f32.mrb[41].mxu1 }
 0x12f   :  { %v305_v54 = vpop.f32.mrb[42].mxu0  ;;  %v409_v55 = vpop.f32.mrb[42].mxu1 }
 0x130   :  { %v440_v56 = vmax.f32 %v303_v50, 0.0  ;;  %v306_v57 = vadd.f32 %v946_v14, %v305_v54  ;;  %v624_v58 = vpop.f32.mrb[43].mxu0  ;;  %v466_v59 = vmax.f32 %v407_v52, 0.0  ;;  %v410_v60 = vadd.f32 %v946_v14, %v409_v55  ;;  %v676_v61 = vpop.f32.mrb[43].mxu1 }
 0x132   :  { %489 = vst [vmem:[%s1147_s3 + $0xa0] sm:$0xff] %v440_v56  ;;  %v441_v62 = vmax.f32 %v306_v57, 0.0  ;;  %515 = vst [vmem:[%s1147_s3 + $0x170] sm:$0xff] %v466_v59  ;;  %v467_v63 = vmax.f32 %v410_v60, 0.0 }
 0x134   :  { %490 = vst [vmem:[%s1147_s3 + $0xa8] sm:$0xff] %v441_v62  ;;  %516 = vst [vmem:[%s1147_s3 + $0x178] sm:$0xff] %v467_v63 }
 0x135   :  { %v310_v1 = vpop.f32.mrb[44].mxu0  ;;  %v414_v2 = vpop.f32.mrb[44].mxu1 }
 0x136   :  { %v311_v3 = vadd.f32 %v946_v14, %v310_v1  ;;  %v627_v4 = vpop.f32.mrb[45].mxu0  ;;  %v415_v5 = vadd.f32 %v946_v14, %v414_v2  ;;  %v679_v6 = vpop.f32.mrb[45].mxu1 }
 0x137   :  { %v313_v7 = vpop.f32.mrb[46].mxu0  ;;  %v417_v8 = vpop.f32.mrb[46].mxu1 }
 0x138   :  { %v442_v9 = vmax.f32 %v311_v3, 0.0  ;;  %v314_v10 = vadd.f32 %v946_v14, %v313_v7  ;;  %v628_v11 = vpop.f32.mrb[47].mxu0  ;;  %v468_v12 = vmax.f32 %v415_v5, 0.0  ;;  %v680_v13 = vpop.f32.mrb[47].mxu1 }
 0x13a   :  { %491 = vst [vmem:[%s1147_s3 + $0xb0] sm:$0xff] %v442_v9  ;;  %v443_v15 = vmax.f32 %v314_v10, 0.0  ;;  %517 = vst [vmem:[%s1147_s3 + $0x180] sm:$0xff] %v468_v12 }
 0x13c   :  { %492 = vst [vmem:[%s1147_s3 + $0xb8] sm:$0xff] %v443_v15 }
 0x13d   :  { %v318_v16 = vpop.f32.mrb[48].mxu0 }
 0x13e   :  { %v319_v0 = vadd.f32 %v946_v14, %v318_v16  ;;  %v631_v17 = vpop.f32.mrb[49].mxu0 }
 0x13f   :  { %v321_v18 = vpop.f32.mrb[50].mxu0 }
 0x140   :  { %v444_v19 = vmax.f32 %v319_v0, 0.0  ;;  %v322_v20 = vadd.f32 %v946_v14, %v321_v18  ;;  %v632_v21 = vpop.f32.mrb[51].mxu0 }
 0x142   :  { %493 = vst [vmem:[%s1147_s3 + $0xc0] sm:$0xff] %v444_v19  ;;  %v445_v22 = vmax.f32 %v322_v20, 0.0 }
 0x144   :  { %494 = vst [vmem:[%s1147_s3 + $0xc8] sm:$0xff] %v445_v22 }

</bundles_post_ra>
